<compile_context>
chip_gen: v7x
topology: tpu7x:2x2x1
jax: 0.10.0
libtpu: 0.0.40
codegen_flags: <defaults>
</compile_context>

<pallas_src>
import jax
import jax.numpy as jnp
from jax.experimental import pallas as pl
from jax.experimental.pallas import tpu as pltpu


# ----------------------------- kernels --------------------------------------
def _kernel_blocked_gate(gate_ref, x_ref, o_ref):
    # gate_ref: (tc, 1), x_ref: (tc, HW).  Compute in f32, cast to out dtype.
    g = jax.nn.sigmoid(gate_ref[...].astype(jnp.float32))
    o_ref[...] = (x_ref[...].astype(jnp.float32) * g).astype(o_ref.dtype)


def _make_resident_gate_kernel(tc):
    # gate_ref holds the whole (padded) gate; slice this step's tc rows.
    def kernel(gate_ref, x_ref, o_ref):
        start = pl.multiple_of(pl.program_id(0) * tc, tc)
        g = jax.nn.sigmoid(gate_ref[pl.ds(start, tc), :].astype(jnp.float32))
        o_ref[...] = (x_ref[...].astype(jnp.float32) * g).astype(o_ref.dtype)
    return kernel


# --------------------------- tile selection ----------------------------------
def _tpu_generation_params():
    """Return (vmem_budget_bytes, vmem_limit_bytes, prefer_blocks)."""
    vmem_cap = 128 * 1024 * 1024
    num_tc = None
    try:
        info = pltpu.get_tpu_info()
        vmem_cap = int(getattr(info, "vmem_capacity_bytes", vmem_cap))
        for attr in ("num_cores", "tensorcore_count", "core_count",
                     "num_tensorcores"):
            v = getattr(info, attr, None)
            if v:
                num_tc = int(v)
                break
    except Exception:
        pass
    if num_tc is None:
        # Heuristic: 64 MiB per-TC VMEM => v7x-class chip with 2 TCs.
        num_tc = 2 if vmem_cap <= 64 * 1024 * 1024 else 1
    if vmem_cap <= 64 * 1024 * 1024:          # v7x-class (64 MiB VMEM / TC)
        budget, limit = 12 * 1024 * 1024, 32 * 1024 * 1024
    else:                                      # v5e / v6e (128 MiB VMEM)
        budget, limit = 24 * 1024 * 1024, 64 * 1024 * 1024
    return budget, limit, max(1, num_tc)


def _pick_tile(NC, HW, row_itemsize, sub, budget_bytes, prefer_blocks):
    """Choose (num_blocks, rows_per_block) for a (NC, HW) elementwise op.

    rows_per_block is a multiple of `sub` (dtype-specific sublane minimum)
    unless it covers the full NC extent.  The grid uses cdiv, so the ragged
    last block is simply clipped by Pallas — no exact divisibility needed.
    """
    hw_pad = -(-HW // 128) * 128              # lane padding inside VMEM
    bytes_per_row = hw_pad * row_itemsize
    # per-step VMEM footprint ~ 2x double-buffered (in block + out block)
    rows_cap = budget_bytes // (4 * bytes_per_row)
    rows_cap = max(sub, (rows_cap // sub) * sub)
    tc = rows_cap
    if prefer_blocks > 1:
        tc_par = -(-NC // prefer_blocks)      # ceil(NC / prefer_blocks)
        tc_par = -(-tc_par // sub) * sub      # round up to sublane multiple
        tc = min(tc, tc_par)
    if tc >= NC:
        return 1, NC                          # single full-extent block
    return -(-NC // tc), tc                   # cdiv grid, ragged last block OK


# ------------------------------ wrapper --------------------------------------
def sigmoid_mul(x764, x760, *, out_dtype=None, donate_x=False,
                vmem_budget_bytes=None, prefer_blocks=None):
    """out = x760 * sigmoid(x764); x764: (N,C,1,1), x760: (N,C,H,W)."""
    N, C, H, W = x760.shape
    assert x764.shape == (N, C, 1, 1)
    NC, HW = N * C, H * W
    out_dt = jnp.dtype(out_dtype) if out_dtype is not None else jnp.dtype(x760.dtype)

    gate2d = x764.reshape(NC, 1)
    x2d = x760.reshape(NC, HW)

    budget, vmem_limit, auto_blocks = _tpu_generation_params()
    if vmem_budget_bytes is not None:
        budget = vmem_budget_bytes
    if prefer_blocks is None:
        prefer_blocks = auto_blocks

    # Sublane minimum is set by the narrowest dtype among tiled buffers.
    min_itemsize = min(jnp.dtype(x760.dtype).itemsize,
                       jnp.dtype(x764.dtype).itemsize,
                       out_dt.itemsize)
    sub = max(8, 32 // min_itemsize)          # 8 f32 / 16 bf16 / 32 int8

    nb, tc = _pick_tile(NC, HW, jnp.dtype(x760.dtype).itemsize, sub,
                        budget, prefer_blocks)

    # Resident-gate path: whole gate sits in VMEM once (constant block index),
    # sliced per grid step.  Only worth it (and only needed) when nb > 1, and
    # only if its lane-padded footprint stays small.
    gate_itemsize = jnp.dtype(x764.dtype).itemsize
    gate_vmem_bytes = nb * tc * 128 * gate_itemsize
    use_resident_gate = nb > 1 and gate_vmem_bytes <= 4 * 1024 * 1024

    if use_resident_gate:
        nc_pad = nb * tc
        if nc_pad != NC:                      # pad so pl.ds never reads OOB
            gate2d = jnp.pad(gate2d, ((0, nc_pad - NC), (0, 0)))
        gate_spec = pl.BlockSpec((nc_pad, 1), lambda i: (0, 0))
        kernel = _make_resident_gate_kernel(tc)
    else:
        gate_spec = pl.BlockSpec((tc, 1), lambda i: (i, 0))
        kernel = _kernel_blocked_gate

    aliases = {}
    if donate_x and out_dt == jnp.dtype(x760.dtype):
        aliases = {1: 0}                      # write output in place over x2d

    out2d = pl.pallas_call(
        kernel,
        out_shape=jax.ShapeDtypeStruct((NC, HW), out_dt),
        grid_spec=pltpu.PrefetchScalarGridSpec(
            num_scalar_prefetch=0,
            grid=(nb,),
            in_specs=[
                gate_spec,                                     # gate
                pl.BlockSpec((tc, HW), lambda i: (i, 0)),      # features
            ],
            out_specs=pl.BlockSpec((tc, HW), lambda i: (i, 0)),
        ),
        compiler_params=pltpu.CompilerParams(
            dimension_semantics=("parallel",),
            vmem_limit_bytes=vmem_limit,
        ),
        input_output_aliases=aliases,
    )(gate2d, x2d)

    return out2d.reshape(N, C, H, W)


# -------------------------------- test ---------------------------------------
if __name__ == "__main__":
    key = jax.random.PRNGKey(0)
    k1, k2, k3, k4, k5, k6 = jax.random.split(key, 6)

    # --- Module's shapes: x760 (1, 2304, 7, 7), x764 (1, 2304, 1, 1), f32 ---
    N, C, H, W = 1, 2304, 7, 7
    x760 = jax.random.normal(k1, (N, C, H, W), dtype=jnp.float32)
    x764 = jax.random.normal(k2, (N, C, 1, 1), dtype=jnp.float32)
    out = jax.block_until_ready(sigmoid_mul(x764, x760))
    ref = x760 * jax.nn.sigmoid(x764)
    assert out.shape == ref.shape and out.dtype == ref.dtype
    assert jnp.allclose(out, ref, atol=1e-6, rtol=1e-5)

    # --- Ragged NC: exercises the cdiv grid + resident-gate slicing path ----
    N2, C2, H2, W2 = 1, 100, 5, 5
    y2 = jax.random.normal(k3, (N2, C2, H2, W2), dtype=jnp.float32)
    g2 = jax.random.normal(k4, (N2, C2, 1, 1), dtype=jnp.float32)
    out2 = jax.block_until_ready(sigmoid_mul(g2, y2, prefer_blocks=2))
    ref2 = y2 * jax.nn.sigmoid(g2)
    assert jnp.allclose(out2, ref2, atol=1e-6, rtol=1e-5)

    # --- bf16 I/O (halves HBM traffic; compute stays f32 inside kernel) -----
    N3, C3, H3, W3 = 2, 96, 4, 4
    y3 = jax.random.normal(k5, (N3, C3, H3, W3), dtype=jnp.bfloat16)
    g3 = jax.random.normal(k6, (N3, C3, 1, 1), dtype=jnp.bfloat16)
    out3 = jax.block_until_ready(sigmoid_mul(g3, y3, prefer_blocks=2))
    ref3 = (y3.astype(jnp.float32) * jax.nn.sigmoid(g3.astype(jnp.float32))
            ).astype(jnp.bfloat16)
    assert out3.dtype == jnp.bfloat16
    assert jnp.allclose(out3.astype(jnp.float32), ref3.astype(jnp.float32),
                        atol=2e-2, rtol=2e-2)

    print("KERNEL_OK")
</pallas_src>

<mosaic_0001>
module attributes {stable_mosaic.version = 11 : i64} {
  func.func @_kernel_blocked_gate(%arg0: i32, %arg1: memref<2304x1xf32, #tpu.memory_space<vmem>>, %arg2: memref<2304x49xf32, #tpu.memory_space<vmem>>, %arg3: memref<2304x49xf32, #tpu.memory_space<vmem>>) attributes {dimension_semantics = [#tpu.dimension_semantics<parallel>], iteration_bounds = array<i64: 1>, scalar_prefetch = 0 : i64, scratch_operands = 0 : i64, tpu.core_type = #tpu.core_type<tc>, window_params = [{transform_indices = @transform_0, window_bounds = array<i64: 2304, 1>}, {transform_indices = @transform_1, window_bounds = array<i64: 2304, 49>}, {transform_indices = @transform_2, window_bounds = array<i64: 2304, 49>}]} {
    %c0 = arith.constant 0 : index
    %c0_0 = arith.constant 0 : index
    %0 = vector.load %arg1[%c0, %c0_0] : memref<2304x1xf32, #tpu.memory_space<vmem>>, vector<2304x1xf32>
    %1 = arith.negf %0 : vector<2304x1xf32>
    %2 = math.exp %1 : vector<2304x1xf32>
    %cst = arith.constant 1.000000e+00 : f32
    %3 = vector.broadcast %cst : f32 to vector<2304x1xf32>
    %4 = arith.addf %3, %2 : vector<2304x1xf32>
    %5 = arith.divf %3, %4 : vector<2304x1xf32>
    %c0_1 = arith.constant 0 : index
    %c0_2 = arith.constant 0 : index
    %6 = vector.load %arg2[%c0_1, %c0_2] : memref<2304x49xf32, #tpu.memory_space<vmem>>, vector<2304x49xf32>
    %7 = vector.broadcast %5 : vector<2304x1xf32> to vector<2304x49xf32>
    %8 = arith.mulf %6, %7 : vector<2304x49xf32>
    %c0_3 = arith.constant 0 : index
    %c0_4 = arith.constant 0 : index
    %9 = vector.load %arg3[%c0_3, %c0_4] : memref<2304x49xf32, #tpu.memory_space<vmem>>, vector<2304x49xf32>
    tpu.vector_store %arg3[%c0_3, %c0_4], %8 {strides = array<i32>} : memref<2304x49xf32, #tpu.memory_space<vmem>>, vector<2304x49xf32>,
    return
  }
  func.func @transform_0(%arg0: i32) -> (i32, i32) {
    %c0_i32 = arith.constant 0 : i32
    %c0_i32_0 = arith.constant 0 : i32
    return %arg0, %c0_i32 : i32, i32
  }
  func.func @transform_1(%arg0: i32) -> (i32, i32) {
    %c0_i32 = arith.constant 0 : i32
    %c0_i32_0 = arith.constant 0 : i32
    return %arg0, %c0_i32 : i32, i32
  }
  func.func @transform_2(%arg0: i32) -> (i32, i32) {
    %c0_i32 = arith.constant 0 : i32
    %c0_i32_0 = arith.constant 0 : i32
    return %arg0, %c0_i32 : i32, i32
  }
}

</mosaic_0001>

<bundles_post_ra>
// kernel: tpu_custom_call.1
= control target key start
LH: loop header
LB: loop body
LE: loop exit
PB: predicated region body
PF: predicated region fallthrough
CT: control target
= control target key end

     0   :  { %7 = vsyncpa [#allocation3], 0  ;;  %s6343_s0 = inlined_call_operand.hbm [shape: f32[2304,1], index: 0, kind: input, shape index: {}]   ;;  %s6344_s1 = inlined_call_operand.hbm [shape: f32[2304,49], index: 1, kind: input, shape index: {}]   ;;  %s6345_s2 = inlined_call_operand.hbm [shape: f32[2304,49], index: 2, kind: output, shape index: {}]  }
   0x1   :  { %8 = vsyncpa [#allocation6], 0 }
   0x2   :  { %9 = vsyncpa [#allocation4], 0  ;;  %s5899_s9 = smov [#allocation2]   ;;  %s5827_s13 = scalar_lea.hbm %s6343_s0, 36864 }
   0x3   :  { %s15_s10 = sshll.u32 %s5899_s9, 4  ;;  %p5828_p0 = scmp.ne.s32.totalorder %s6343_s0, %s5827_s13  ;;  %s16_s10 = int_to_ptr.vmem [resolvable:$true] %s15_s10 }
   0x4   :  { %p5831_p1 = scmp.lt.u32.totalorder %s5827_s13, %s6343_s0 }
   0x6   :  { %p5833_p2 = pnand %p5831_p1, %p5828_p0 }
   0x8   :  { %5836 = shalt.err (!%p5833_p2)
}
   0x9   :  { %s5837_s18 = scalar_lea.vmem %s16_s10, 36864  ;;  %p5842_p4 = scmp.lt.s32.totalorder %s16_s10, %s16_s10 }
   0xa   :  { %p5838_p3 = scmp.ne.s32.totalorder %s16_s10, %s5837_s18  ;;  %p5843_p5 = scmp.lt.s32.totalorder %s5837_s18, %s5837_s18 }
   0xc   :  { %p5844_p6 = por %p5843_p5, %p5842_p4 }
   0xe   :  { %p5845_p7 = pnand %p5844_p6, %p5838_p3 }
  0x10   :  { %5848 = shalt.err (!%p5845_p7)
}
  0x11   :  { %s5900_s19 = smov 128   ;;  %s5901_s20 = smov 8  }
  0x12   :  { %21 = dma.hbm_to_vmem [thread:$0]  %s6343_s0, 36864, %s16_s10, [#allocation3], %s5900_s19, %s5900_s19, %s5901_s20  }
  0x13   :  { %s5902_s23 = smov [#allocation5]   ;;  %s5849_s27 = scalar_lea.hbm %s6344_s1, 36864 }
  0x14   :  { %s27_s24 = sshll.u32 %s5902_s23, 4  ;;  %p5850_p8 = scmp.ne.s32.totalorder %s6344_s1, %s5849_s27  ;;  %s28_s24 = int_to_ptr.vmem [resolvable:$true] %s27_s24 }
  0x15   :  { %p5853_p9 = scmp.lt.u32.totalorder %s5849_s27, %s6344_s1 }
  0x17   :  { %p5855_p10 = pnand %p5853_p9, %p5850_p8 }
  0x19   :  { %5858 = shalt.err (!%p5855_p10)
}
  0x1a   :  { %s5859_s4 = scalar_lea.vmem %s28_s24, 36864  ;;  %p5864_p12 = scmp.lt.s32.totalorder %s28_s24, %s28_s24 }
  0x1b   :  { %p5860_p11 = scmp.ne.s32.totalorder %s28_s24, %s5859_s4  ;;  %p5865_p13 = scmp.lt.s32.totalorder %s5859_s4, %s5859_s4 }
  0x1d   :  { %p5866_p0 = por %p5865_p13, %p5864_p12 }
  0x1f   :  { %p5867_p1 = pnand %p5866_p0, %p5860_p11 }
  0x21   :  { %5870 = shalt.err (!%p5867_p1)
}
  0x22   :  { %33 = dma.hbm_to_vmem [thread:$0]  %s6344_s1, 36864, %s28_s24, [#allocation6], %s5900_s19, %s5900_s19, %s5901_s20  }
  0x23   :  { %5893 = dma.done.wait [#allocation3], 36864  }
  0x24   :  { %5894 = vsyncadd [#allocation3], 4294930432 }
  0x25   :  { %5895 = dma.done.wait [#allocation6], 36864  }
  0x26   :  { %5896 = vsyncadd [#allocation6], 4294930432  ;;  %v5903_v0 = vmov 0   ;;  %v42_v1 = vld [vmem:[#allocation2 + $0x10] sm:$0xff]  ;;  %v40_v2 = vld [vmem:[#allocation2] sm:$0xff]  ;;  %vm4072_vm0 = vcmask 400384  }
  0x27   :  { %4674 = vset.pattern.permute.xlu1 %v5903_v0  ;;  %4673 = vset.pattern.permute.xlu0 %v5903_v0  ;;  %v43_v3 = vld [vmem:[#allocation2 + $0x18] sm:$0xff]  ;;  %v4381_v4 = vmul.f32 -1.442695, %v42_v1  ;;  %v4379_v5 = vmul.f32 -1.442695, %v40_v2  ;;  %v41_v7 = vld [vmem:[#allocation2 + $0x8] sm:$0xff] }
  0x28   :  { %v4382_v6 = vmul.f32 -1.442695, %v43_v3  ;;  %v45_v8 = vld [vmem:[#allocation2 + $0x28] sm:$0xff]  ;;  %v44_v9 = vld [vmem:[#allocation2 + $0x20] sm:$0xff]  ;;  %v4380_v10 = vmul.f32 -1.442695, %v41_v7 }
  0x29   :  { %4675 = vpow2.f32 %v4381_v4  ;;  %v4384_v11 = vmul.f32 -1.442695, %v45_v8  ;;  %v4383_v12 = vmul.f32 -1.442695, %v44_v9  ;;  %v47_v13 = vld [vmem:[#allocation2 + $0x38] sm:$0xff]  ;;  %v46_v14 = vld [vmem:[#allocation2 + $0x30] sm:$0xff] }
  0x2a   :  { %4677 = vpow2.f32 %v4379_v5  ;;  %v49_v15 = vld [vmem:[#allocation2 + $0x48] sm:$0xff]  ;;  %v4386_v16 = vmul.f32 -1.442695, %v47_v13  ;;  %v4385_v17 = vmul.f32 -1.442695, %v46_v14  ;;  %v48_v18 = vld [vmem:[#allocation2 + $0x40] sm:$0xff] }
  0x2b   :  { %4679 = vpow2.f32 %v4382_v6  ;;  %v51_v19 = vld [vmem:[#allocation2 + $0x58] sm:$0xff]  ;;  %v4388_v20 = vmul.f32 -1.442695, %v49_v15  ;;  %v50_v21 = vld [vmem:[#allocation2 + $0x50] sm:$0xff]  ;;  %v4387_v22 = vmul.f32 -1.442695, %v48_v18 }
  0x2c   :  { %4681 = vpow2.f32 %v4380_v10  ;;  %v53_v23 = vld [vmem:[#allocation2 + $0x68] sm:$0xff]  ;;  %v4390_v24 = vmul.f32 -1.442695, %v51_v19  ;;  %v4389_v25 = vmul.f32 -1.442695, %v50_v21  ;;  %v52_v46 = vld [vmem:[#allocation2 + $0x60] sm:$0xff] }
  0x2d   :  { %4683 = vpow2.f32 %v4384_v11  ;;  %v4392_v26 = vmul.f32 -1.442695, %v53_v23  ;;  %v55_v49 = vld [vmem:[#allocation2 + $0x78] sm:$0xff]  ;;  %v54_v52 = vld [vmem:[#allocation2 + $0x70] sm:$0xff]  ;;  %v4391_v55 = vmul.f32 -1.442695, %v52_v46 }
  0x2e   :  { %4685 = vpow2.f32 %v4383_v12  ;;  %v57_v56 = vld [vmem:[#allocation2 + $0x88] sm:$0xff]  ;;  %v4394_v59 = vmul.f32 -1.442695, %v55_v49  ;;  %v56_v60 = vld [vmem:[#allocation2 + $0x80] sm:$0xff]  ;;  %v4393_v62 = vmul.f32 -1.442695, %v54_v52 }
  0x2f   :  { %4687 = vpow2.f32 %v4386_v16  ;;  %v59_v63 = vld [vmem:[#allocation2 + $0x98] sm:$0xff]  ;;  %v4396_v1 = vmul.f32 -1.442695, %v57_v56  ;;  %v58_v2 = vld [vmem:[#allocation2 + $0x90] sm:$0xff]  ;;  %v4395_v4 = vmul.f32 -1.442695, %v56_v60 }
  0x30   :  { %4689 = vpow2.f32 %v4385_v17  ;;  %v61_v5 = vld [vmem:[#allocation2 + $0xa8] sm:$0xff]  ;;  %v4398_v7 = vmul.f32 -1.442695, %v59_v63  ;;  %v60_v8 = vld [vmem:[#allocation2 + $0xa0] sm:$0xff]  ;;  %v4397_v10 = vmul.f32 -1.442695, %v58_v2 }
  0x31   :  { %4691 = vpow2.f32 %v4388_v20  ;;  %v63_v11 = vld [vmem:[#allocation2 + $0xb8] sm:$0xff]  ;;  %v4400_v13 = vmul.f32 -1.442695, %v61_v5  ;;  %v62_v14 = vld [vmem:[#allocation2 + $0xb0] sm:$0xff]  ;;  %v4399_v16 = vmul.f32 -1.442695, %v60_v8 }
  0x32   :  { %4693 = vpow2.f32 %v4387_v22  ;;  %v65_v17 = vld [vmem:[#allocation2 + $0xc8] sm:$0xff]  ;;  %v4402_v19 = vmul.f32 -1.442695, %v63_v11  ;;  %v64_v20 = vld [vmem:[#allocation2 + $0xc0] sm:$0xff]  ;;  %v4401_v22 = vmul.f32 -1.442695, %v62_v14 }
  0x33   :  { %v4676_v27 = vpop.eup %4675  ;;  %4695 = vpow2.f32 %v4390_v24  ;;  %v4404_v24 = vmul.f32 -1.442695, %v65_v17  ;;  %s5904_s1 = smov [#allocation7]  }
  0x34   :  { %v4678_v28 = vpop.eup %4677  ;;  %v1194_v29 = vadd.f32 1.0, %v4676_v27  ;;  %4697 = vpow2.f32 %v4389_v25  ;;  %s4366_s6 = sshll.u32 %s5904_s1, 4  ;;  %s4367_s6 = int_to_ptr.vmem [resolvable:$true] %s4366_s6 }
  0x35   :  { %v4680_v30 = vpop.eup %4679  ;;  %v1192_v31 = vadd.f32 1.0, %v4678_v28  ;;  %4699 = vpow2.f32 %v4392_v26  ;;  %v4403_v26 = vmul.f32 -1.442695, %v64_v20  ;;  %s5871_s7 = scalar_lea.vmem %s4367_s6, 36864  ;;  %p5876_p3 = scmp.lt.s32.totalorder %s4367_s6, %s4367_s6 }
  0x36   :  { %v4682_v32 = vpop.eup %4681  ;;  %4701 = vrcp.f32 %v1194_v29  ;;  %v1195_v33 = vadd.f32 1.0, %v4680_v30  ;;  %p5872_p2 = scmp.ne.s32.totalorder %s4367_s6, %s5871_s7  ;;  %p5877_p4 = scmp.lt.s32.totalorder %s5871_s7, %s5871_s7 }
  0x37   :  { %v4684_v34 = vpop.eup %4683  ;;  %4703 = vrcp.f32 %v1192_v31  ;;  %v1193_v35 = vadd.f32 1.0, %v4682_v32 }
  0x38   :  { %v4686_v36 = vpop.eup %4685  ;;  %4705 = vrcp.f32 %v1195_v33  ;;  %v1197_v37 = vadd.f32 1.0, %v4684_v34  ;;  %p5878_p5 = por %p5877_p4, %p5876_p3 }
  0x39   :  { %v4688_v38 = vpop.eup %4687  ;;  %4707 = vrcp.f32 %v1193_v35  ;;  %v1196_v39 = vadd.f32 1.0, %v4686_v36 }
  0x3a   :  { %v4690_v40 = vpop.eup %4689  ;;  %4709 = vrcp.f32 %v1197_v37  ;;  %v1199_v41 = vadd.f32 1.0, %v4688_v38  ;;  %p5879_p6 = pnand %p5878_p5, %p5872_p2 }
  0x3b   :  { %v4692_v42 = vpop.eup %4691  ;;  %4711 = vrcp.f32 %v1196_v39  ;;  %v1198_v43 = vadd.f32 1.0, %v4690_v40 }
  0x3c   :  { %v4694_v44 = vpop.eup %4693  ;;  %4713 = vrcp.f32 %v1199_v41  ;;  %v1201_v45 = vadd.f32 1.0, %v4692_v42 }
  0x3d   :  { %v4696_v47 = vpop.eup %4695  ;;  %4715 = vrcp.f32 %v1198_v43  ;;  %v1200_v48 = vadd.f32 1.0, %v4694_v44 }
  0x3e   :  { %v4698_v50 = vpop.eup %4697  ;;  %4717 = vrcp.f32 %v1201_v45  ;;  %v1203_v51 = vadd.f32 1.0, %v4696_v47  ;;  %v67_v47 = vld [vmem:[#allocation2 + $0xd8] sm:$0xff] }
  0x3f   :  { %v4700_v53 = vpop.eup %4699  ;;  %4719 = vrcp.f32 %v1200_v48  ;;  %v1202_v54 = vadd.f32 1.0, %v4698_v50  ;;  %v66_v50 = vld [vmem:[#allocation2 + $0xd0] sm:$0xff]  ;;  %v4406_v56 = vmul.f32 -1.442695, %v67_v47 }
  0x40   :  { %v4702_v57 = vpop.eup %4701  ;;  %4721 = vrcp.f32 %v1203_v51  ;;  %v1205_v58 = vadd.f32 1.0, %v4700_v53  ;;  %v69_v53 = vld [vmem:[#allocation2 + $0xe8] sm:$0xff]  ;;  %v4405_v60 = vmul.f32 -1.442695, %v66_v50 }
  0x41   :  { %v4704_v61 = vpop.eup %4703  ;;  %2356 = vperm.xlu1 %4674, %v4702_v57   ;;  %4723 = vrcp.f32 %v1202_v54  ;;  %v68_v57 = vld [vmem:[#allocation2 + $0xe0] sm:$0xff]  ;;  %v4408_v63 = vmul.f32 -1.442695, %v69_v53 }
  0x42   :  { %v4706_v0 = vpop.eup %4705  ;;  %2346 = vperm.xlu0 %4673, %v4704_v61   ;;  %4725 = vrcp.f32 %v1205_v58  ;;  %v71_v61 = vld [vmem:[#allocation2 + $0xf8] sm:$0xff]  ;;  %v4407_v2 = vmul.f32 -1.442695, %v68_v57 }
  0x43   :  { %v4708_v3 = vpop.eup %4707  ;;  %4727 = vpow2.f32 %v4391_v55  ;;  %v4410_v5 = vmul.f32 -1.442695, %v71_v61 }
  0x44   :  { %v4710_v6 = vpop.eup %4709  ;;  %4729 = vpow2.f32 %v4394_v59 }
  0x45   :  { %v4712_v9 = vpop.eup %4711  ;;  %2361 = vperm.xlu1 %4674, %v4706_v0   ;;  %4731 = vpow2.f32 %v4393_v62  ;;  %v70_v0 = vld [vmem:[#allocation2 + $0xf0] sm:$0xff] }
  0x46   :  { %v4714_v12 = vpop.eup %4713  ;;  %2351 = vperm.xlu0 %4673, %v4708_v3   ;;  %4733 = vpow2.f32 %v4396_v1  ;;  %v73_v3 = vld [vmem:[#allocation2 + $0x108] sm:$0xff]  ;;  %v4409_v8 = vmul.f32 -1.442695, %v70_v0 }
  0x47   :  { %v4716_v15 = vpop.eup %4715  ;;  %4735 = vpow2.f32 %v4395_v4  ;;  %v4412_v11 = vmul.f32 -1.442695, %v73_v3 }
  0x48   :  { %v4718_v18 = vpop.eup %4717  ;;  %4737 = vpow2.f32 %v4398_v7 }
  0x49   :  { %v4720_v21 = vpop.eup %4719  ;;  %2371 = vperm.xlu1 %4674, %v4710_v6   ;;  %4739 = vpow2.f32 %v4397_v10  ;;  %v72_v6 = vld [vmem:[#allocation2 + $0x100] sm:$0xff] }
  0x4a   :  { %v4722_v23 = vpop.eup %4721  ;;  %2366 = vperm.xlu0 %4673, %v4712_v9   ;;  %4741 = vpow2.f32 %v4400_v13  ;;  %v75_v9 = vld [vmem:[#allocation2 + $0x118] sm:$0xff]  ;;  %v4411_v14 = vmul.f32 -1.442695, %v72_v6 }
  0x4b   :  { %v4724_v25 = vpop.eup %4723  ;;  %4743 = vpow2.f32 %v4399_v16  ;;  %v4414_v17 = vmul.f32 -1.442695, %v75_v9 }
  0x4c   :  { %v4726_v27 = vpop.eup %4725  ;;  %4745 = vpow2.f32 %v4402_v19 }
  0x4d   :  { %v4728_v28 = vpop.eup %4727  ;;  %2381 = vperm.xlu1 %4674, %v4714_v12   ;;  %4747 = vpow2.f32 %v4401_v22  ;;  %v74_v12 = vld [vmem:[#allocation2 + $0x110] sm:$0xff] }
  0x4e   :  { %v4730_v29 = vpop.eup %4729  ;;  %2376 = vperm.xlu0 %4673, %v4716_v15   ;;  %v1204_v30 = vadd.f32 1.0, %v4728_v28  ;;  %4749 = vpow2.f32 %v4404_v24  ;;  %v77_v15 = vld [vmem:[#allocation2 + $0x128] sm:$0xff]  ;;  %v4413_v20 = vmul.f32 -1.442695, %v74_v12 }
  0x4f   :  { %v4732_v31 = vpop.eup %4731  ;;  %v1207_v32 = vadd.f32 1.0, %v4730_v29  ;;  %4751 = vpow2.f32 %v4403_v26 }
  0x50   :  { %v4734_v33 = vpop.eup %4733  ;;  %4753 = vrcp.f32 %v1204_v30  ;;  %v1206_v34 = vadd.f32 1.0, %v4732_v31 }
  0x51   :  { %v4736_v35 = vpop.eup %4735  ;;  %2391 = vperm.xlu1 %4674, %v4718_v18   ;;  %4755 = vrcp.f32 %v1207_v32  ;;  %v1209_v36 = vadd.f32 1.0, %v4734_v33  ;;  %v76_v18 = vld [vmem:[#allocation2 + $0x120] sm:$0xff] }
  0x52   :  { %v4738_v37 = vpop.eup %4737  ;;  %2386 = vperm.xlu0 %4673, %v4720_v21   ;;  %4757 = vrcp.f32 %v1206_v34  ;;  %v1208_v38 = vadd.f32 1.0, %v4736_v35  ;;  %v79_v21 = vld [vmem:[#allocation2 + $0x138] sm:$0xff] }
  0x53   :  { %v4740_v39 = vpop.eup %4739  ;;  %4759 = vrcp.f32 %v1209_v36  ;;  %v1211_v40 = vadd.f32 1.0, %v4738_v37 }
  0x54   :  { %v4742_v41 = vpop.eup %4741  ;;  %4761 = vrcp.f32 %v1208_v38  ;;  %v1210_v42 = vadd.f32 1.0, %v4740_v39 }
  0x55   :  { %v4744_v43 = vpop.eup %4743  ;;  %2401 = vperm.xlu1 %4674, %v4722_v23   ;;  %4763 = vrcp.f32 %v1211_v40  ;;  %v1213_v44 = vadd.f32 1.0, %v4742_v41  ;;  %v4416_v23 = vmul.f32 -1.442695, %v77_v15 }
  0x56   :  { %v4746_v45 = vpop.eup %4745  ;;  %2396 = vperm.xlu0 %4673, %v4724_v25   ;;  %4765 = vrcp.f32 %v1210_v42  ;;  %v1212_v46 = vadd.f32 1.0, %v4744_v43  ;;  %v4415_v25 = vmul.f32 -1.442695, %v76_v18 }
  0x57   :  { %v4748_v48 = vpop.eup %4747  ;;  %4767 = vrcp.f32 %v1213_v44  ;;  %v1215_v49 = vadd.f32 1.0, %v4746_v45 }
  0x58   :  { %v4750_v51 = vpop.eup %4749  ;;  %4769 = vrcp.f32 %v1212_v46  ;;  %v1214_v52 = vadd.f32 1.0, %v4748_v48  ;;  %v78_v48 = vld [vmem:[#allocation2 + $0x130] sm:$0xff] }
  0x59   :  { %v4752_v54 = vpop.eup %4751  ;;  %2411 = vperm.xlu1 %4674, %v4726_v27   ;;  %4771 = vrcp.f32 %v1215_v49  ;;  %v1217_v55 = vadd.f32 1.0, %v4750_v51  ;;  %v4418_v27 = vmul.f32 -1.442695, %v79_v21  ;;  %v81_v51 = vld [vmem:[#allocation2 + $0x148] sm:$0xff]  ;;  %v4417_v57 = vmul.f32 -1.442695, %v78_v48 }
  0x5a   :  { %v4754_v58 = vpop.eup %4753  ;;  %4773 = vrcp.f32 %v1214_v52  ;;  %v1216_v59 = vadd.f32 1.0, %v4752_v54  ;;  %v80_v54 = vld [vmem:[#allocation2 + $0x140] sm:$0xff]  ;;  %v4420_v61 = vmul.f32 -1.442695, %v81_v51 }
  0x5b   :  { %v4756_v62 = vpop.eup %4755  ;;  %2406 = vperm.xlu0 %4673, %v4754_v58   ;;  %4775 = vrcp.f32 %v1217_v55  ;;  %v83_v58 = vld [vmem:[#allocation2 + $0x158] sm:$0xff]  ;;  %v4419_v0 = vmul.f32 -1.442695, %v80_v54 }
  0x5c   :  { %v4758_v1 = vpop.eup %4757  ;;  %4777 = vrcp.f32 %v1216_v59  ;;  %v4422_v3 = vmul.f32 -1.442695, %v83_v58 }
  0x5d   :  { %v4760_v4 = vpop.eup %4759  ;;  %2421 = vperm.xlu1 %4674, %v4756_v62   ;;  %4779 = vpow2.f32 %v4406_v56  ;;  %v82_v62 = vld [vmem:[#allocation2 + $0x150] sm:$0xff] }
  0x5e   :  { %v4762_v7 = vpop.eup %4761  ;;  %4781 = vpow2.f32 %v4405_v60  ;;  %v4421_v6 = vmul.f32 -1.442695, %v82_v62 }
  0x5f   :  { %v4764_v10 = vpop.eup %4763  ;;  %2416 = vperm.xlu0 %4673, %v4758_v1   ;;  %4783 = vpow2.f32 %v4408_v63  ;;  %v85_v1 = vld [vmem:[#allocation2 + $0x168] sm:$0xff] }
  0x60   :  { %v4766_v13 = vpop.eup %4765  ;;  %4785 = vpow2.f32 %v4407_v2  ;;  %v4424_v9 = vmul.f32 -1.442695, %v85_v1 }
  0x61   :  { %v4768_v16 = vpop.eup %4767  ;;  %2431 = vperm.xlu1 %4674, %v4760_v4   ;;  %4787 = vpow2.f32 %v4410_v5  ;;  %v84_v4 = vld [vmem:[#allocation2 + $0x160] sm:$0xff] }
  0x62   :  { %v4770_v19 = vpop.eup %4769  ;;  %4789 = vpow2.f32 %v4409_v8  ;;  %v4423_v12 = vmul.f32 -1.442695, %v84_v4 }
  0x63   :  { %v4772_v22 = vpop.eup %4771  ;;  %2426 = vperm.xlu0 %4673, %v4762_v7   ;;  %4791 = vpow2.f32 %v4412_v11  ;;  %v87_v7 = vld [vmem:[#allocation2 + $0x178] sm:$0xff] }
  0x64   :  { %v4774_v24 = vpop.eup %4773  ;;  %4793 = vpow2.f32 %v4411_v14  ;;  %v4426_v15 = vmul.f32 -1.442695, %v87_v7 }
  0x65   :  { %v4776_v26 = vpop.eup %4775  ;;  %2441 = vperm.xlu1 %4674, %v4764_v10   ;;  %4795 = vpow2.f32 %v4414_v17  ;;  %v86_v10 = vld [vmem:[#allocation2 + $0x170] sm:$0xff] }
  0x66   :  { %v4778_v28 = vpop.eup %4777  ;;  %4797 = vpow2.f32 %v4413_v20  ;;  %v4425_v18 = vmul.f32 -1.442695, %v86_v10 }
  0x67   :  { %v4780_v29 = vpop.eup %4779  ;;  %2436 = vperm.xlu0 %4673, %v4766_v13   ;;  %4799 = vpow2.f32 %v4416_v23  ;;  %v89_v13 = vld [vmem:[#allocation2 + $0x188] sm:$0xff] }
  0x68   :  { %v4782_v30 = vpop.eup %4781  ;;  %v1219_v31 = vadd.f32 1.0, %v4780_v29  ;;  %4801 = vpow2.f32 %v4415_v25  ;;  %v4428_v21 = vmul.f32 -1.442695, %v89_v13 }
  0x69   :  { %v4784_v32 = vpop.eup %4783  ;;  %2451 = vperm.xlu1 %4674, %v4768_v16   ;;  %v1218_v33 = vadd.f32 1.0, %v4782_v30  ;;  %4803 = vpow2.f32 %v4418_v27  ;;  %v88_v16 = vld [vmem:[#allocation2 + $0x180] sm:$0xff] }
  0x6a   :  { %v4786_v34 = vpop.eup %4785  ;;  %4805 = vrcp.f32 %v1219_v31  ;;  %v1221_v35 = vadd.f32 1.0, %v4784_v32 }
  0x6b   :  { %v4788_v36 = vpop.eup %4787  ;;  %2446 = vperm.xlu0 %4673, %v4770_v19   ;;  %4807 = vrcp.f32 %v1218_v33  ;;  %v1220_v37 = vadd.f32 1.0, %v4786_v34  ;;  %v91_v19 = vld [vmem:[#allocation2 + $0x198] sm:$0xff] }
  0x6c   :  { %v4790_v38 = vpop.eup %4789  ;;  %4809 = vrcp.f32 %v1221_v35  ;;  %v1223_v39 = vadd.f32 1.0, %v4788_v36 }
  0x6d   :  { %v4792_v40 = vpop.eup %4791  ;;  %2461 = vperm.xlu1 %4674, %v4772_v22   ;;  %4811 = vrcp.f32 %v1220_v37  ;;  %v1222_v41 = vadd.f32 1.0, %v4790_v38  ;;  %v90_v22 = vld [vmem:[#allocation2 + $0x190] sm:$0xff] }
  0x6e   :  { %v4794_v42 = vpop.eup %4793  ;;  %4813 = vrcp.f32 %v1223_v39  ;;  %v1225_v43 = vadd.f32 1.0, %v4792_v40 }
  0x6f   :  { %v4796_v44 = vpop.eup %4795  ;;  %2456 = vperm.xlu0 %4673, %v4774_v24   ;;  %4815 = vrcp.f32 %v1222_v41  ;;  %v1224_v45 = vadd.f32 1.0, %v4794_v42  ;;  %v4427_v24 = vmul.f32 -1.442695, %v88_v16 }
  0x70   :  { %v4798_v46 = vpop.eup %4797  ;;  %4817 = vrcp.f32 %v1225_v43  ;;  %v1227_v47 = vadd.f32 1.0, %v4796_v44 }
  0x71   :  { %v4800_v49 = vpop.eup %4799  ;;  %2471 = vperm.xlu1 %4674, %v4776_v26   ;;  %4819 = vrcp.f32 %v1224_v45  ;;  %v1226_v50 = vadd.f32 1.0, %v4798_v46  ;;  %v4430_v26 = vmul.f32 -1.442695, %v91_v19 }
  0x72   :  { %v4802_v52 = vpop.eup %4801  ;;  %4821 = vrcp.f32 %v1227_v47  ;;  %v1229_v53 = vadd.f32 1.0, %v4800_v49  ;;  %v93_v49 = vld [vmem:[#allocation2 + $0x1a8] sm:$0xff] }
  0x73   :  { %v4804_v55 = vpop.eup %4803  ;;  %2466 = vperm.xlu0 %4673, %v4778_v28   ;;  %4823 = vrcp.f32 %v1226_v50  ;;  %v1228_v56 = vadd.f32 1.0, %v4802_v52  ;;  %v4429_v28 = vmul.f32 -1.442695, %v90_v22  ;;  %v92_v52 = vld [vmem:[#allocation2 + $0x1a0] sm:$0xff]  ;;  %v4432_v58 = vmul.f32 -1.442695, %v93_v49 }
  0x74   :  { %v4806_v59 = vpop.eup %4805  ;;  %4825 = vrcp.f32 %v1229_v53  ;;  %v1231_v60 = vadd.f32 1.0, %v4804_v55  ;;  %v95_v55 = vld [vmem:[#allocation2 + $0x1b8] sm:$0xff]  ;;  %v4431_v62 = vmul.f32 -1.442695, %v92_v52 }
  0x75   :  { %v4808_v63 = vpop.eup %4807  ;;  %2481 = vperm.xlu1 %4674, %v4806_v59   ;;  %4827 = vrcp.f32 %v1228_v56  ;;  %v94_v59 = vld [vmem:[#allocation2 + $0x1b0] sm:$0xff]  ;;  %v4434_v1 = vmul.f32 -1.442695, %v95_v55 }
  0x76   :  { %v4810_v2 = vpop.eup %4809  ;;  %4829 = vrcp.f32 %v1231_v60  ;;  %v4433_v4 = vmul.f32 -1.442695, %v94_v59 }
  0x77   :  { %v4812_v5 = vpop.eup %4811  ;;  %2476 = vperm.xlu0 %4673, %v4808_v63   ;;  %4831 = vpow2.f32 %v4417_v57  ;;  %v97_v63 = vld [vmem:[#allocation2 + $0x1c8] sm:$0xff] }
  0x78   :  { %v4814_v8 = vpop.eup %4813  ;;  %4833 = vpow2.f32 %v4420_v61  ;;  %v4436_v7 = vmul.f32 -1.442695, %v97_v63 }
  0x79   :  { %v4816_v11 = vpop.eup %4815  ;;  %2491 = vperm.xlu1 %4674, %v4810_v2   ;;  %4835 = vpow2.f32 %v4419_v0  ;;  %v96_v2 = vld [vmem:[#allocation2 + $0x1c0] sm:$0xff] }
  0x7a   :  { %v4818_v14 = vpop.eup %4817  ;;  %4837 = vpow2.f32 %v4422_v3  ;;  %v4435_v10 = vmul.f32 -1.442695, %v96_v2 }
  0x7b   :  { %v4820_v17 = vpop.eup %4819  ;;  %2486 = vperm.xlu0 %4673, %v4812_v5   ;;  %4839 = vpow2.f32 %v4421_v6  ;;  %v99_v5 = vld [vmem:[#allocation2 + $0x1d8] sm:$0xff] }
  0x7c   :  { %v4822_v20 = vpop.eup %4821  ;;  %4841 = vpow2.f32 %v4424_v9  ;;  %v4438_v13 = vmul.f32 -1.442695, %v99_v5 }
  0x7d   :  { %v4824_v23 = vpop.eup %4823  ;;  %2501 = vperm.xlu1 %4674, %v4814_v8   ;;  %4843 = vpow2.f32 %v4423_v12  ;;  %v98_v8 = vld [vmem:[#allocation2 + $0x1d0] sm:$0xff] }
  0x7e   :  { %v4826_v25 = vpop.eup %4825  ;;  %4845 = vpow2.f32 %v4426_v15  ;;  %v4437_v16 = vmul.f32 -1.442695, %v98_v8 }
  0x7f   :  { %v4828_v27 = vpop.eup %4827  ;;  %2496 = vperm.xlu0 %4673, %v4816_v11   ;;  %4847 = vpow2.f32 %v4425_v18  ;;  %v101_v11 = vld [vmem:[#allocation2 + $0x1e8] sm:$0xff] }
  0x80   :  { %v4830_v29 = vpop.eup %4829  ;;  %4849 = vpow2.f32 %v4428_v21  ;;  %v4440_v19 = vmul.f32 -1.442695, %v101_v11 }
  0x81   :  { %v4832_v30 = vpop.eup %4831  ;;  %2511 = vperm.xlu1 %4674, %v4818_v14   ;;  %4851 = vpow2.f32 %v4427_v24  ;;  %v100_v14 = vld [vmem:[#allocation2 + $0x1e0] sm:$0xff] }
  0x82   :  { %v4834_v31 = vpop.eup %4833  ;;  %v1230_v32 = vadd.f32 1.0, %v4832_v30  ;;  %4853 = vpow2.f32 %v4430_v26  ;;  %v4439_v22 = vmul.f32 -1.442695, %v100_v14 }
  0x83   :  { %v4836_v33 = vpop.eup %4835  ;;  %2506 = vperm.xlu0 %4673, %v4820_v17   ;;  %v1233_v34 = vadd.f32 1.0, %v4834_v31  ;;  %4855 = vpow2.f32 %v4429_v28  ;;  %v103_v17 = vld [vmem:[#allocation2 + $0x1f8] sm:$0xff] }
  0x84   :  { %v4838_v35 = vpop.eup %4837  ;;  %4857 = vrcp.f32 %v1230_v32  ;;  %v1232_v36 = vadd.f32 1.0, %v4836_v33 }
  0x85   :  { %v4840_v37 = vpop.eup %4839  ;;  %2521 = vperm.xlu1 %4674, %v4822_v20   ;;  %4859 = vrcp.f32 %v1233_v34  ;;  %v1235_v38 = vadd.f32 1.0, %v4838_v35  ;;  %v102_v20 = vld [vmem:[#allocation2 + $0x1f0] sm:$0xff] }
  0x86   :  { %v4842_v39 = vpop.eup %4841  ;;  %4861 = vrcp.f32 %v1232_v36  ;;  %v1234_v40 = vadd.f32 1.0, %v4840_v37 }
  0x87   :  { %v4844_v41 = vpop.eup %4843  ;;  %2516 = vperm.xlu0 %4673, %v4824_v23   ;;  %4863 = vrcp.f32 %v1235_v38  ;;  %v1237_v42 = vadd.f32 1.0, %v4842_v39  ;;  %v105_v23 = vld [vmem:[#allocation2 + $0x208] sm:$0xff] }
  0x88   :  { %v4846_v43 = vpop.eup %4845  ;;  %4865 = vrcp.f32 %v1234_v40  ;;  %v1236_v44 = vadd.f32 1.0, %v4844_v41 }
  0x89   :  { %v4848_v45 = vpop.eup %4847  ;;  %2531 = vperm.xlu1 %4674, %v4826_v25   ;;  %4867 = vrcp.f32 %v1237_v42  ;;  %v1239_v46 = vadd.f32 1.0, %v4846_v43  ;;  %v4442_v25 = vmul.f32 -1.442695, %v103_v17 }
  0x8a   :  { %v4850_v47 = vpop.eup %4849  ;;  %4869 = vrcp.f32 %v1236_v44  ;;  %v1238_v48 = vadd.f32 1.0, %v4848_v45 }
  0x8b   :  { %v4852_v50 = vpop.eup %4851  ;;  %2526 = vperm.xlu0 %4673, %v4828_v27   ;;  %4871 = vrcp.f32 %v1239_v46  ;;  %v1241_v51 = vadd.f32 1.0, %v4850_v47  ;;  %v4441_v27 = vmul.f32 -1.442695, %v102_v20 }
  0x8c   :  { %v4854_v53 = vpop.eup %4853  ;;  %4873 = vrcp.f32 %v1238_v48  ;;  %v1240_v54 = vadd.f32 1.0, %v4852_v50  ;;  %v104_v50 = vld [vmem:[#allocation2 + $0x200] sm:$0xff] }
  0x8d   :  { %v4856_v56 = vpop.eup %4855  ;;  %2541 = vperm.xlu1 %4674, %v4830_v29   ;;  %4875 = vrcp.f32 %v1241_v51  ;;  %v1243_v57 = vadd.f32 1.0, %v4854_v53  ;;  %v4444_v29 = vmul.f32 -1.442695, %v105_v23  ;;  %v107_v53 = vld [vmem:[#allocation2 + $0x218] sm:$0xff]  ;;  %v4443_v59 = vmul.f32 -1.442695, %v104_v50 }
  0x8e   :  { %v4858_v60 = vpop.eup %4857  ;;  %4877 = vrcp.f32 %v1240_v54  ;;  %v1242_v61 = vadd.f32 1.0, %v4856_v56  ;;  %v106_v56 = vld [vmem:[#allocation2 + $0x210] sm:$0xff]  ;;  %v4446_v63 = vmul.f32 -1.442695, %v107_v53 }
  0x8f   :  { %v4860_v0 = vpop.eup %4859  ;;  %2536 = vperm.xlu0 %4673, %v4858_v60   ;;  %4879 = vrcp.f32 %v1243_v57  ;;  %v109_v60 = vld [vmem:[#allocation2 + $0x228] sm:$0xff]  ;;  %v4445_v2 = vmul.f32 -1.442695, %v106_v56  ;;  %v2058_v50 = vld [vmem:[#allocation5 + $0x10] sm:$0xff] }
  0x90   :  { %v4862_v3 = vpop.eup %4861  ;;  %4881 = vrcp.f32 %v1242_v61  ;;  %v4448_v5 = vmul.f32 -1.442695, %v109_v60  ;;  %v118_v56 = vld [vmem:[#allocation2 + $0x270] sm:$0xff]  ;;  %v121_v60 = vld [vmem:[#allocation2 + $0x288] sm:$0xff] }
  0x91   :  { %v4864_v6 = vpop.eup %4863  ;;  %2551 = vperm.xlu1 %4674, %v4860_v0   ;;  %4883 = vpow2.f32 %v4432_v58  ;;  %v108_v0 = vld [vmem:[#allocation2 + $0x220] sm:$0xff] }
  0x92   :  { %v4866_v9 = vpop.eup %4865  ;;  %4885 = vpow2.f32 %v4431_v62  ;;  %v4447_v8 = vmul.f32 -1.442695, %v108_v0 }
  0x93   :  { %v4868_v12 = vpop.eup %4867  ;;  %2546 = vperm.xlu0 %4673, %v4862_v3   ;;  %4887 = vpow2.f32 %v4434_v1  ;;  %v111_v3 = vld [vmem:[#allocation2 + $0x238] sm:$0xff] }
  0x94   :  { %v4870_v15 = vpop.eup %4869  ;;  %4889 = vpow2.f32 %v4433_v4  ;;  %v4450_v11 = vmul.f32 -1.442695, %v111_v3 }
  0x95   :  { %v4872_v18 = vpop.eup %4871  ;;  %2561 = vperm.xlu1 %4674, %v4864_v6   ;;  %4891 = vpow2.f32 %v4436_v7  ;;  %v110_v6 = vld [vmem:[#allocation2 + $0x230] sm:$0xff] }
  0x96   :  { %v4874_v21 = vpop.eup %4873  ;;  %4893 = vpow2.f32 %v4435_v10  ;;  %v4449_v14 = vmul.f32 -1.442695, %v110_v6 }
  0x97   :  { %v4876_v24 = vpop.eup %4875  ;;  %2556 = vperm.xlu0 %4673, %v4866_v9   ;;  %4895 = vpow2.f32 %v4438_v13  ;;  %v113_v9 = vld [vmem:[#allocation2 + $0x248] sm:$0xff] }
  0x98   :  { %v4878_v26 = vpop.eup %4877  ;;  %4897 = vpow2.f32 %v4437_v16  ;;  %v4452_v17 = vmul.f32 -1.442695, %v113_v9 }
  0x99   :  { %v4880_v28 = vpop.eup %4879  ;;  %2571 = vperm.xlu1 %4674, %v4868_v12   ;;  %4899 = vpow2.f32 %v4440_v19  ;;  %v112_v12 = vld [vmem:[#allocation2 + $0x240] sm:$0xff] }
  0x9a   :  { %v4882_v30 = vpop.eup %4881  ;;  %4901 = vpow2.f32 %v4439_v22  ;;  %v4451_v20 = vmul.f32 -1.442695, %v112_v12  ;;  %v122_v12 = vld [vmem:[#allocation2 + $0x290] sm:$0xff] }
  0x9b   :  { %v4884_v31 = vpop.eup %4883  ;;  %2566 = vperm.xlu0 %4673, %v4870_v15   ;;  %4903 = vpow2.f32 %v4442_v25  ;;  %v115_v15 = vld [vmem:[#allocation2 + $0x258] sm:$0xff] }
  0x9c   :  { %v4886_v32 = vpop.eup %4885  ;;  %v1245_v33 = vadd.f32 1.0, %v4884_v31  ;;  %4905 = vpow2.f32 %v4441_v27  ;;  %v4454_v23 = vmul.f32 -1.442695, %v115_v15 }
  0x9d   :  { %v4888_v34 = vpop.eup %4887  ;;  %2581 = vperm.xlu1 %4674, %v4872_v18   ;;  %v1244_v35 = vadd.f32 1.0, %v4886_v32  ;;  %4907 = vpow2.f32 %v4444_v29  ;;  %v114_v18 = vld [vmem:[#allocation2 + $0x250] sm:$0xff] }
  0x9e   :  { %v4890_v36 = vpop.eup %4889  ;;  %4909 = vrcp.f32 %v1245_v33  ;;  %v1247_v37 = vadd.f32 1.0, %v4888_v34 }
  0x9f   :  { %v4892_v38 = vpop.eup %4891  ;;  %2576 = vperm.xlu0 %4673, %v4874_v21   ;;  %4911 = vrcp.f32 %v1244_v35  ;;  %v1246_v39 = vadd.f32 1.0, %v4890_v36  ;;  %v117_v21 = vld [vmem:[#allocation2 + $0x268] sm:$0xff] }
  0xa0   :  { %v4894_v40 = vpop.eup %4893  ;;  %4913 = vrcp.f32 %v1247_v37  ;;  %v1249_v41 = vadd.f32 1.0, %v4892_v38 }
  0xa1   :  { %v4896_v42 = vpop.eup %4895  ;;  %2591 = vperm.xlu1 %4674, %v4876_v24   ;;  %4915 = vrcp.f32 %v1246_v39  ;;  %v1248_v43 = vadd.f32 1.0, %v4894_v40  ;;  %v116_v24 = vld [vmem:[#allocation2 + $0x260] sm:$0xff] }
  0xa2   :  { %v4898_v44 = vpop.eup %4897  ;;  %4917 = vrcp.f32 %v1249_v41  ;;  %v1251_v45 = vadd.f32 1.0, %v4896_v42 }
  0xa3   :  { %v4900_v46 = vpop.eup %4899  ;;  %2586 = vperm.xlu0 %4673, %v4878_v26   ;;  %4919 = vrcp.f32 %v1248_v43  ;;  %v1250_v47 = vadd.f32 1.0, %v4898_v44  ;;  %v4453_v26 = vmul.f32 -1.442695, %v114_v18 }
  0xa4   :  { %v4902_v48 = vpop.eup %4901  ;;  %4921 = vrcp.f32 %v1251_v45  ;;  %v1253_v49 = vadd.f32 1.0, %v4900_v46 }
  0xa5   :  { %v4904_v51 = vpop.eup %4903  ;;  %2601 = vperm.xlu1 %4674, %v4880_v28   ;;  %4923 = vrcp.f32 %v1250_v47  ;;  %v1252_v52 = vadd.f32 1.0, %v4902_v48  ;;  %v4456_v28 = vmul.f32 -1.442695, %v117_v21  ;;  %v124_v21 = vld [vmem:[#allocation2 + $0x2a0] sm:$0xff] }
  0xa6   :  { %v4906_v54 = vpop.eup %4905  ;;  %4925 = vrcp.f32 %v1253_v49  ;;  %v1255_v55 = vadd.f32 1.0, %v4904_v51 }
  0xa7   :  { %v4908_v57 = vpop.eup %4907  ;;  %2596 = vperm.xlu0 %4673, %v4882_v30   ;;  %4927 = vrcp.f32 %v1252_v52  ;;  %v1254_v58 = vadd.f32 1.0, %v4906_v54  ;;  %v4455_v30 = vmul.f32 -1.442695, %v116_v24  ;;  %v119_v52 = vld [vmem:[#allocation2 + $0x278] sm:$0xff]  ;;  %v2056_v54 = vld [vmem:[#allocation5] sm:$0xff]  ;;  %v2061_v24 = vld [vmem:[#allocation5 + $0x28] sm:$0xff] }
  0xa8   :  { %v4910_v61 = vpop.eup %4909  ;;  %4929 = vrcp.f32 %v1255_v55  ;;  %v1257_v62 = vadd.f32 1.0, %v4908_v57 }
  0xa9   :  { %v4912_v1 = vpop.eup %4911  ;;  %2611 = vperm.xlu1 %4674, %v4910_v61   ;;  %4931 = vrcp.f32 %v1254_v58 }
  0xaa   :  { %v4914_v4 = vpop.eup %4913  ;;  %4933 = vrcp.f32 %v1257_v62 }
  0xab   :  { %v4916_v7 = vpop.eup %4915  ;;  %2606 = vperm.xlu0 %4673, %v4912_v1   ;;  %4935 = vpow2.f32 %v4443_v59  ;;  %v4458_v1 = vmul.f32 -1.442695, %v119_v52 }
  0xac   :  { %v4918_v10 = vpop.eup %4917  ;;  %4937 = vpow2.f32 %v4446_v63 }
  0xad   :  { %v4920_v13 = vpop.eup %4919  ;;  %2621 = vperm.xlu1 %4674, %v4914_v4   ;;  %4939 = vpow2.f32 %v4445_v2  ;;  %v120_v2 = vld [vmem:[#allocation2 + $0x280] sm:$0xff] }
  0xae   :  { %v4922_v16 = vpop.eup %4921  ;;  %4941 = vpow2.f32 %v4448_v5  ;;  %v2059_v5 = vld [vmem:[#allocation5 + $0x18] sm:$0xff]  ;;  %v4459_v15 = vmul.f32 -1.442695, %v120_v2 }
  0xaf   :  { %v4924_v19 = vpop.eup %4923  ;;  %2616 = vperm.xlu0 %4673, %v4916_v7   ;;  %4943 = vpow2.f32 %v4447_v8  ;;  %v4457_v7 = vmul.f32 -1.442695, %v118_v56  ;;  %v123_v8 = vld [vmem:[#allocation2 + $0x298] sm:$0xff] }
  0xb0   :  { %v4926_v22 = vpop.eup %4925  ;;  %4945 = vpow2.f32 %v4450_v11  ;;  %v4460_v11 = vmul.f32 -1.442695, %v121_v60 }
  0xb1   :  { %v4928_v25 = vpop.eup %4927  ;;  %2631 = vperm.xlu1 %4674, %v4918_v10   ;;  %4947 = vpow2.f32 %v4449_v14  ;;  %v2057_v10 = vld [vmem:[#allocation5 + $0x8] sm:$0xff] }
  0xb2   :  { %v4930_v27 = vpop.eup %4929  ;;  %4949 = vpow2.f32 %v4452_v17 }
  0xb3   :  { %v4932_v29 = vpop.eup %4931  ;;  %2626 = vperm.xlu0 %4673, %v4920_v13   ;;  %4951 = vpow2.f32 %v4451_v20  ;;  %v4462_v20 = vmul.f32 -1.442695, %v123_v8  ;;  %v2066_v8 = vld [vmem:[#allocation5 + $0x50] sm:$0xff] }
  0xb4   :  { %v4934_v31 = vpop.eup %4933  ;;  %4953 = vpow2.f32 %v4454_v23 }
  0xb5   :  { %v4936_v32 = vpop.eup %4935  ;;  %2641 = vperm.xlu1 %4674, %v4922_v16   ;;  %4955 = vpow2.f32 %v4453_v26  ;;  %v125_v16 = vld [vmem:[#allocation2 + $0x2a8] sm:$0xff]  ;;  %v127_v26 = vld [vmem:[#allocation2 + $0x2b8] sm:$0xff] }
  0xb6   :  { %v4938_v33 = vpop.eup %4937  ;;  %v1256_v34 = vadd.f32 1.0, %v4936_v32  ;;  %4957 = vpow2.f32 %v4456_v28  ;;  %v2060_v28 = vld [vmem:[#allocation5 + $0x20] sm:$0xff] }
  0xb7   :  { %v4940_v35 = vpop.eup %4939  ;;  %2636 = vperm.xlu0 %4673, %v4924_v19   ;;  %v1259_v36 = vadd.f32 1.0, %v4938_v33  ;;  %4959 = vpow2.f32 %v4455_v30  ;;  %v126_v30 = vld [vmem:[#allocation2 + $0x2b0] sm:$0xff]  ;;  %v4463_v33 = vmul.f32 -1.442695, %v124_v21 }
  0xb8   :  { %v4942_v37 = vpop.eup %4941  ;;  %4961 = vrcp.f32 %v1256_v34  ;;  %v1258_v38 = vadd.f32 1.0, %v4940_v35  ;;  %v129_v34 = vld [vmem:[#allocation2 + $0x2c8] sm:$0xff] }
  0xb9   :  { %v4944_v39 = vpop.eup %4943  ;;  %2651 = vperm.xlu1 %4674, %v4926_v22   ;;  %4963 = vrcp.f32 %v1259_v36  ;;  %v1261_v40 = vadd.f32 1.0, %v4942_v37 }
  0xba   :  { %v4946_v41 = vpop.eup %4945  ;;  %4965 = vrcp.f32 %v1258_v38  ;;  %v1260_v42 = vadd.f32 1.0, %v4944_v39  ;;  %v4466_v38 = vmul.f32 -1.442695, %v127_v26  ;;  %v128_v39 = vld [vmem:[#allocation2 + $0x2c0] sm:$0xff] }
  0xbb   :  { %v4948_v43 = vpop.eup %4947  ;;  %2646 = vperm.xlu0 %4673, %v4928_v25   ;;  %4967 = vrcp.f32 %v1261_v40  ;;  %v1263_v44 = vadd.f32 1.0, %v4946_v41  ;;  %v4461_v25 = vmul.f32 -1.442695, %v122_v12 }
  0xbc   :  { %v4950_v45 = vpop.eup %4949  ;;  %4969 = vrcp.f32 %v1260_v42  ;;  %v1262_v46 = vadd.f32 1.0, %v4948_v43  ;;  %v2063_v42 = vld [vmem:[#allocation5 + $0x38] sm:$0xff]  ;;  %v4465_v43 = vmul.f32 -1.442695, %v126_v30 }
  0xbd   :  { %v4952_v47 = vpop.eup %4951  ;;  %2661 = vperm.xlu1 %4674, %v4930_v27   ;;  %4971 = vrcp.f32 %v1263_v44  ;;  %v1265_v48 = vadd.f32 1.0, %v4950_v45  ;;  %v131_v44 = vld [vmem:[#allocation2 + $0x2d8] sm:$0xff] }
  0xbe   :  { %v4954_v49 = vpop.eup %4953  ;;  %4973 = vrcp.f32 %v1262_v46  ;;  %v1264_v51 = vadd.f32 1.0, %v4952_v47  ;;  %v2062_v46 = vld [vmem:[#allocation5 + $0x30] sm:$0xff]  ;;  %v4468_v47 = vmul.f32 -1.442695, %v129_v34  ;;  %v2071_v34 = vld [vmem:[#allocation5 + $0x78] sm:$0xff] }
  0xbf   :  { %v4956_v53 = vpop.eup %4955  ;;  %2656 = vperm.xlu0 %4673, %v4932_v29   ;;  %4975 = vrcp.f32 %v1265_v48  ;;  %v1267_v55 = vadd.f32 1.0, %v4954_v49  ;;  %v4464_v29 = vmul.f32 -1.442695, %v125_v16 }
  0xc0   :  { %v4958_v57 = vpop.eup %4957  ;;  %v2357_v58 = vpop.permute.xlu1 %2356  ;;  %4977 = vrcp.f32 %v1264_v51  ;;  %v1266_v59 = vadd.f32 1.0, %v4956_v53 }
  0xc1   :  { %v4960_v61 = vpop.eup %4959  ;;  %v3786_v62 = vmul.f32 %v2357_v58, %v2058_v50  ;;  %v2347_v63 = vpop.permute.xlu0 %2346  ;;  %2671 = vperm.xlu1 %4674, %v4934_v31   ;;  %4979 = vrcp.f32 %v1267_v55  ;;  %v1269_v0 = vadd.f32 1.0, %v4958_v57  ;;  %v4467_v50 = vmul.f32 -1.442695, %v128_v39  ;;  %v2065_v57 = vld [vmem:[#allocation5 + $0x48] sm:$0xff] }
  0xc2   :  { %v4962_v3 = vpop.eup %4961  ;;  %v3784_v4 = vmul.f32 %v2347_v63, %v2056_v54  ;;  %4981 = vrcp.f32 %v1266_v59  ;;  %v1268_v6 = vadd.f32 1.0, %v4960_v61  ;;  %v4470_v54 = vmul.f32 -1.442695, %v131_v44  ;;  %v2064_v59 = vld [vmem:[#allocation5 + $0x40] sm:$0xff]  ;;  %v2070_v44 = vld [vmem:[#allocation5 + $0x70] sm:$0xff] }
  0xc3   :  { %v4964_v9 = vpop.eup %4963  ;;  %4075 = vst.msk [vmem:[#allocation7 + $0x10] sm:$0xff] %vm4072_vm0, %v3786_v62  ;;  %2666 = vperm.xlu0 %4673, %v4962_v3   ;;  %4983 = vrcp.f32 %v1269_v0 }
  0xc4   :  { %v4966_v13 = vpop.eup %4965  ;;  %4073 = vst.msk [vmem:[#allocation7] sm:$0xff] %vm4072_vm0, %v3784_v4  ;;  %v2362_v14 = vpop.permute.xlu1 %2361  ;;  %4985 = vrcp.f32 %v1268_v6 }
  0xc5   :  { %v4968_v17 = vpop.eup %4967  ;;  %v3787_v18 = vmul.f32 %v2362_v14, %v2059_v5  ;;  %v2352_v19 = vpop.permute.xlu0 %2351  ;;  %2681 = vperm.xlu1 %4674, %v4964_v9   ;;  %4987 = vpow2.f32 %v4458_v1  ;;  %v2067_v5 = vld [vmem:[#allocation5 + $0x58] sm:$0xff] }
  0xc6   :  { %v4970_v22 = vpop.eup %4969  ;;  %v3785_v23 = vmul.f32 %v2352_v19, %v2057_v10  ;;  %4989 = vpow2.f32 %v4457_v7  ;;  %v2069_v19 = vld [vmem:[#allocation5 + $0x68] sm:$0xff] }
  0xc7   :  { %v4972_v27 = vpop.eup %4971  ;;  %4076 = vst.msk [vmem:[#allocation7 + $0x18] sm:$0xff] %vm4072_vm0, %v3787_v18  ;;  %2676 = vperm.xlu0 %4673, %v4966_v13   ;;  %4991 = vpow2.f32 %v4460_v11 }
  0xc8   :  { %v4974_v31 = vpop.eup %4973  ;;  %4074 = vst.msk [vmem:[#allocation7 + $0x8] sm:$0xff] %vm4072_vm0, %v3785_v23  ;;  %v2372_v32 = vpop.permute.xlu1 %2371  ;;  %4993 = vpow2.f32 %v4459_v15 }
  0xc9   :  { %v4976_v35 = vpop.eup %4975  ;;  %v3789_v36 = vmul.f32 %v2372_v32, %v2061_v24  ;;  %v2367_v37 = vpop.permute.xlu0 %2366  ;;  %2691 = vperm.xlu1 %4674, %v4968_v17   ;;  %4995 = vpow2.f32 %v4462_v20 }
  0xca   :  { %v4978_v40 = vpop.eup %4977  ;;  %v3788_v41 = vmul.f32 %v2367_v37, %v2060_v28  ;;  %4997 = vpow2.f32 %v4461_v25  ;;  %v2068_v25 = vld [vmem:[#allocation5 + $0x60] sm:$0xff] }
  0xcb   :  { %v4980_v45 = vpop.eup %4979  ;;  %4078 = vst.msk [vmem:[#allocation7 + $0x28] sm:$0xff] %vm4072_vm0, %v3789_v36  ;;  %2686 = vperm.xlu0 %4673, %v4970_v22   ;;  %4999 = vpow2.f32 %v4464_v29  ;;  %v132_v36 = vld [vmem:[#allocation2 + $0x2e0] sm:$0xff] }
  0xcc   :  { %v4982_v48 = vpop.eup %4981  ;;  %4077 = vst.msk [vmem:[#allocation7 + $0x20] sm:$0xff] %vm4072_vm0, %v3788_v41  ;;  %v2382_v49 = vpop.permute.xlu1 %2381  ;;  %5001 = vpow2.f32 %v4463_v33  ;;  %v135_v41 = vld [vmem:[#allocation2 + $0x2f8] sm:$0xff] }
  0xcd   :  { %v5956_v51 = vpop.eup %4983  ;;  %v3791_v52 = vmul.f32 %v2382_v49, %v2063_v42  ;;  %v2377_v53 = vpop.permute.xlu0 %2376  ;;  %2701 = vperm.xlu1 %4674, %v4972_v27   ;;  %5003 = vpow2.f32 %v4466_v38  ;;  %v130_v27 = vld [vmem:[#allocation2 + $0x2d0] sm:$0xff] }
  0xce   :  { %v5958_v55 = vpop.eup %4985  ;;  %v3790_v56 = vmul.f32 %v2377_v53, %v2062_v46  ;;  %5005 = vpow2.f32 %v4465_v43 }
  0xcf   :  { %v4988_v58 = vpop.eup %4987  ;;  %4080 = vst.msk [vmem:[#allocation7 + $0x38] sm:$0xff] %vm4072_vm0, %v3791_v52  ;;  %2696 = vperm.xlu0 %4673, %v4974_v31   ;;  %5007 = vpow2.f32 %v4468_v47  ;;  %v133_v31 = vld [vmem:[#allocation2 + $0x2e8] sm:$0xff]  ;;  %v134_v47 = vld [vmem:[#allocation2 + $0x2f0] sm:$0xff] }
  0xd0   :  { %v4990_v60 = vpop.eup %4989  ;;  %4079 = vst.msk [vmem:[#allocation7 + $0x30] sm:$0xff] %vm4072_vm0, %v3790_v56  ;;  %v2392_v61 = vpop.permute.xlu1 %2391  ;;  %v1271_v62 = vadd.f32 1.0, %v4988_v58  ;;  %5009 = vpow2.f32 %v4467_v50  ;;  %v4472_v46 = vmul.f32 -1.442695, %v133_v31  ;;  %v4471_v50 = vmul.f32 -1.442695, %v132_v36 }
  0xd1   :  { %v4992_v63 = vpop.eup %4991  ;;  %v3793_v0 = vmul.f32 %v2392_v61, %v2065_v57  ;;  %v2387_v1 = vpop.permute.xlu0 %2386  ;;  %2711 = vperm.xlu1 %4674, %v4976_v35   ;;  %v1270_v2 = vadd.f32 1.0, %v4990_v60  ;;  %5011 = vpow2.f32 %v4470_v54  ;;  %v2073_v54 = vld [vmem:[#allocation5 + $0x88] sm:$0xff]  ;;  %v136_v56 = vld [vmem:[#allocation2 + $0x300] sm:$0xff]  ;;  %v139_v60 = vld [vmem:[#allocation2 + $0x318] sm:$0xff] }
  0xd2   :  { %v4994_v3 = vpop.eup %4993  ;;  %v3792_v4 = vmul.f32 %v2387_v1, %v2064_v59  ;;  %5013 = vrcp.f32 %v1271_v62  ;;  %v1273_v6 = vadd.f32 1.0, %v4992_v63  ;;  %v4473_v59 = vmul.f32 -1.442695, %v134_v47  ;;  %v2072_v63 = vld [vmem:[#allocation5 + $0x80] sm:$0xff]  ;;  %v138_v1 = vld [vmem:[#allocation2 + $0x310] sm:$0xff] }
  0xd3   :  { %v4996_v7 = vpop.eup %4995  ;;  %4082 = vst.msk [vmem:[#allocation7 + $0x48] sm:$0xff] %vm4072_vm0, %v3793_v0  ;;  %2706 = vperm.xlu0 %4673, %v4978_v40   ;;  %5015 = vrcp.f32 %v1270_v2  ;;  %v1272_v9 = vadd.f32 1.0, %v4994_v3  ;;  %v4469_v40 = vmul.f32 -1.442695, %v130_v27 }
  0xd4   :  { %v4998_v10 = vpop.eup %4997  ;;  %4081 = vst.msk [vmem:[#allocation7 + $0x40] sm:$0xff] %vm4072_vm0, %v3792_v4  ;;  %v2402_v11 = vpop.permute.xlu1 %2401  ;;  %5017 = vrcp.f32 %v1273_v6  ;;  %v1275_v12 = vadd.f32 1.0, %v4996_v7  ;;  %v4475_v4 = vmul.f32 -1.442695, %v136_v56 }
  0xd5   :  { %v5000_v13 = vpop.eup %4999  ;;  %v3795_v14 = vmul.f32 %v2402_v11, %v2067_v5  ;;  %v2397_v15 = vpop.permute.xlu0 %2396  ;;  %2721 = vperm.xlu1 %4674, %v4980_v45   ;;  %5019 = vrcp.f32 %v1272_v9  ;;  %v1274_v16 = vadd.f32 1.0, %v4998_v10  ;;  %v141_v5 = vld [vmem:[#allocation2 + $0x328] sm:$0xff]  ;;  %v4478_v9 = vmul.f32 -1.442695, %v139_v60  ;;  %v140_v10 = vld [vmem:[#allocation2 + $0x320] sm:$0xff] }
  0xd6   :  { %v5002_v17 = vpop.eup %5001  ;;  %v3794_v18 = vmul.f32 %v2397_v15, %v2066_v8  ;;  %5021 = vrcp.f32 %v1275_v12  ;;  %v1277_v20 = vadd.f32 1.0, %v5000_v13  ;;  %v2075_v8 = vld [vmem:[#allocation5 + $0x98] sm:$0xff]  ;;  %v4477_v13 = vmul.f32 -1.442695, %v138_v1 }
  0xd7   :  { %v5004_v21 = vpop.eup %5003  ;;  %4084 = vst.msk [vmem:[#allocation7 + $0x58] sm:$0xff] %vm4072_vm0, %v3795_v14  ;;  %2716 = vperm.xlu0 %4673, %v4982_v48   ;;  %5023 = vrcp.f32 %v1274_v16  ;;  %v1276_v22 = vadd.f32 1.0, %v5002_v17  ;;  %v143_v14 = vld [vmem:[#allocation2 + $0x338] sm:$0xff]  ;;  %v2074_v17 = vld [vmem:[#allocation5 + $0x90] sm:$0xff] }
  0xd8   :  { %v5006_v23 = vpop.eup %5005  ;;  %4083 = vst.msk [vmem:[#allocation7 + $0x50] sm:$0xff] %vm4072_vm0, %v3794_v18  ;;  %v2412_v24 = vpop.permute.xlu1 %2411  ;;  %5025 = vrcp.f32 %v1277_v20  ;;  %v1279_v26 = vadd.f32 1.0, %v5004_v21  ;;  %v4480_v18 = vmul.f32 -1.442695, %v141_v5  ;;  %v2083_v1 = vld [vmem:[#allocation5 + $0xd8] sm:$0xff] }
  0xd9   :  { %v5008_v28 = vpop.eup %5007  ;;  %v3797_v29 = vmul.f32 %v2412_v24, %v2069_v19  ;;  %2731 = vperm.xlu1 %4674, %v5956_v51   ;;  %5027 = vrcp.f32 %v1276_v22  ;;  %v1278_v30 = vadd.f32 1.0, %v5006_v23  ;;  %v137_v51 = vld [vmem:[#allocation2 + $0x308] sm:$0xff]  ;;  %v142_v19 = vld [vmem:[#allocation2 + $0x330] sm:$0xff]  ;;  %v4479_v22 = vmul.f32 -1.442695, %v140_v10 }
  0xda   :  { %v5010_v32 = vpop.eup %5009  ;;  %v2407_v33 = vpop.permute.xlu0 %2406  ;;  %5029 = vrcp.f32 %v1279_v26  ;;  %v1281_v35 = vadd.f32 1.0, %v5008_v28  ;;  %v4476_v0 = vmul.f32 -1.442695, %v137_v51  ;;  %v4482_v26 = vmul.f32 -1.442695, %v143_v14  ;;  %v2081_v51 = vld [vmem:[#allocation5 + $0xc8] sm:$0xff] }
  0xdb   :  { %v5012_v37 = vpop.eup %5011  ;;  %4086 = vst.msk [vmem:[#allocation7 + $0x68] sm:$0xff] %vm4072_vm0, %v3797_v29  ;;  %v3796_v38 = vmul.f32 %v2407_v33, %v2068_v25  ;;  %2726 = vperm.xlu0 %4673, %v5958_v55   ;;  %5031 = vrcp.f32 %v1278_v30  ;;  %v1280_v39 = vadd.f32 1.0, %v5010_v32  ;;  %v4474_v55 = vmul.f32 -1.442695, %v135_v41  ;;  %v2077_v25 = vld [vmem:[#allocation5 + $0xa8] sm:$0xff]  ;;  %v2076_v32 = vld [vmem:[#allocation5 + $0xa0] sm:$0xff] }
  0xdc   :  { %v5014_v42 = vpop.eup %5013  ;;  %v2422_v43 = vpop.permute.xlu1 %2421  ;;  %5033 = vrcp.f32 %v1281_v35  ;;  %v1283_v45 = vadd.f32 1.0, %v5012_v37  ;;  %v4481_v29 = vmul.f32 -1.442695, %v142_v19  ;;  %v2079_v37 = vld [vmem:[#allocation5 + $0xb8] sm:$0xff]  ;;  %v2082_v10 = vld [vmem:[#allocation5 + $0xd0] sm:$0xff] }
  0xdd   :  { %v5016_v48 = vpop.eup %5015  ;;  %4085 = vst.msk [vmem:[#allocation7 + $0x60] sm:$0xff] %vm4072_vm0, %v3796_v38  ;;  %v3799_v49 = vmul.f32 %v2422_v43, %v2071_v34  ;;  %2741 = vperm.xlu1 %4674, %v5014_v42   ;;  %5035 = vrcp.f32 %v1280_v39 }
  0xde   :  { %v5018_v52 = vpop.eup %5017  ;;  %v2417_v53 = vpop.permute.xlu0 %2416  ;;  %5037 = vrcp.f32 %v1283_v45 }
  0xdf   :  { %v5020_v57 = vpop.eup %5019  ;;  %4088 = vst.msk [vmem:[#allocation7 + $0x78] sm:$0xff] %vm4072_vm0, %v3799_v49  ;;  %v3798_v58 = vmul.f32 %v2417_v53, %v2070_v44  ;;  %2736 = vperm.xlu0 %4673, %v5016_v48   ;;  %5039 = vpow2.f32 %v4469_v40  ;;  %v2078_v44 = vld [vmem:[#allocation5 + $0xb0] sm:$0xff] }
  0xe0   :  { %v5022_v61 = vpop.eup %5021  ;;  %v2432_v62 = vpop.permute.xlu1 %2431  ;;  %5041 = vpow2.f32 %v4472_v46 }
  0xe1   :  { %v5024_v2 = vpop.eup %5023  ;;  %4087 = vst.msk [vmem:[#allocation7 + $0x70] sm:$0xff] %vm4072_vm0, %v3798_v58  ;;  %v3801_v3 = vmul.f32 %v2432_v62, %v2073_v54  ;;  %2751 = vperm.xlu1 %4674, %v5018_v52   ;;  %5043 = vpow2.f32 %v4471_v50  ;;  %v2080_v58 = vld [vmem:[#allocation5 + $0xc0] sm:$0xff] }
  0xe2   :  { %v5026_v6 = vpop.eup %5025  ;;  %v2427_v7 = vpop.permute.xlu0 %2426  ;;  %5045 = vpow2.f32 %v4474_v55 }
  0xe3   :  { %v5028_v11 = vpop.eup %5027  ;;  %4090 = vst.msk [vmem:[#allocation7 + $0x88] sm:$0xff] %vm4072_vm0, %v3801_v3  ;;  %v3800_v12 = vmul.f32 %v2427_v7, %v2072_v63  ;;  %2746 = vperm.xlu0 %4673, %v5020_v57   ;;  %5047 = vpow2.f32 %v4473_v59  ;;  %v145_v3 = vld [vmem:[#allocation2 + $0x348] sm:$0xff]  ;;  %v144_v7 = vld [vmem:[#allocation2 + $0x340] sm:$0xff] }
  0xe4   :  { %v5030_v15 = vpop.eup %5029  ;;  %v2442_v16 = vpop.permute.xlu1 %2441  ;;  %5049 = vpow2.f32 %v4476_v0 }
  0xe5   :  { %v5032_v20 = vpop.eup %5031  ;;  %4089 = vst.msk [vmem:[#allocation7 + $0x80] sm:$0xff] %vm4072_vm0, %v3800_v12  ;;  %v3803_v21 = vmul.f32 %v2442_v16, %v2075_v8  ;;  %2761 = vperm.xlu1 %4674, %v5022_v61   ;;  %5051 = vpow2.f32 %v4475_v4  ;;  %v147_v12 = vld [vmem:[#allocation2 + $0x358] sm:$0xff]  ;;  %v4484_v16 = vmul.f32 -1.442695, %v145_v3 }
  0xe6   :  { %v5034_v23 = vpop.eup %5033  ;;  %v2437_v24 = vpop.permute.xlu0 %2436  ;;  %5053 = vpow2.f32 %v4478_v9 }
  0xe7   :  { %v5974_v27 = vpop.eup %5035  ;;  %4092 = vst.msk [vmem:[#allocation7 + $0x98] sm:$0xff] %vm4072_vm0, %v3803_v21  ;;  %v3802_v28 = vmul.f32 %v2437_v24, %v2074_v17  ;;  %2756 = vperm.xlu0 %4673, %v5024_v2   ;;  %5055 = vpow2.f32 %v4477_v13  ;;  %v146_v17 = vld [vmem:[#allocation2 + $0x350] sm:$0xff] }
  0xe8   :  { %v5977_v30 = vpop.eup %5037  ;;  %v2452_v31 = vpop.permute.xlu1 %2451  ;;  %5057 = vpow2.f32 %v4480_v18 }
  0xe9   :  { %v5040_v33 = vpop.eup %5039  ;;  %4091 = vst.msk [vmem:[#allocation7 + $0x90] sm:$0xff] %vm4072_vm0, %v3802_v28  ;;  %v3805_v34 = vmul.f32 %v2452_v31, %v2077_v25  ;;  %2771 = vperm.xlu1 %4674, %v5026_v6   ;;  %5059 = vpow2.f32 %v4479_v22  ;;  %v4483_v22 = vmul.f32 -1.442695, %v144_v7  ;;  %v4485_v31 = vmul.f32 -1.442695, %v146_v17 }
  0xea   :  { %v5042_v35 = vpop.eup %5041  ;;  %v2447_v36 = vpop.permute.xlu0 %2446  ;;  %v1282_v38 = vadd.f32 1.0, %v5040_v33  ;;  %5061 = vpow2.f32 %v4482_v26  ;;  %v4486_v26 = vmul.f32 -1.442695, %v147_v12 }
  0xeb   :  { %v5044_v39 = vpop.eup %5043  ;;  %4094 = vst.msk [vmem:[#allocation7 + $0xa8] sm:$0xff] %vm4072_vm0, %v3805_v34  ;;  %v3804_v40 = vmul.f32 %v2447_v36, %v2076_v32  ;;  %2766 = vperm.xlu0 %4673, %v5028_v11   ;;  %v1285_v41 = vadd.f32 1.0, %v5042_v35  ;;  %5063 = vpow2.f32 %v4481_v29  ;;  %v151_v32 = vld [vmem:[#allocation2 + $0x378] sm:$0xff]  ;;  %v150_v36 = vld [vmem:[#allocation2 + $0x370] sm:$0xff] }
  0xec   :  { %v5046_v42 = vpop.eup %5045  ;;  %v2462_v43 = vpop.permute.xlu1 %2461  ;;  %5065 = vrcp.f32 %v1282_v38  ;;  %v1284_v45 = vadd.f32 1.0, %v5044_v39  ;;  %v2087_v39 = vld [vmem:[#allocation5 + $0xf8] sm:$0xff] }
  0xed   :  { %v5048_v46 = vpop.eup %5047  ;;  %4093 = vst.msk [vmem:[#allocation7 + $0xa0] sm:$0xff] %vm4072_vm0, %v3804_v40  ;;  %v3807_v47 = vmul.f32 %v2462_v43, %v2079_v37  ;;  %2781 = vperm.xlu1 %4674, %v5030_v15   ;;  %5067 = vrcp.f32 %v1285_v41  ;;  %v1287_v48 = vadd.f32 1.0, %v5046_v42  ;;  %v153_v41 = vld [vmem:[#allocation2 + $0x388] sm:$0xff] }
  0xee   :  { %v5050_v49 = vpop.eup %5049  ;;  %v2457_v50 = vpop.permute.xlu0 %2456  ;;  %5069 = vrcp.f32 %v1284_v45  ;;  %v1286_v52 = vadd.f32 1.0, %v5048_v46  ;;  %v152_v45 = vld [vmem:[#allocation2 + $0x380] sm:$0xff] }
  0xef   :  { %v5052_v53 = vpop.eup %5051  ;;  %4096 = vst.msk [vmem:[#allocation7 + $0xb8] sm:$0xff] %vm4072_vm0, %v3807_v47  ;;  %v3806_v54 = vmul.f32 %v2457_v50, %v2078_v44  ;;  %2776 = vperm.xlu0 %4673, %v5032_v20   ;;  %5071 = vrcp.f32 %v1287_v48  ;;  %v1289_v55 = vadd.f32 1.0, %v5050_v49  ;;  %v2085_v20 = vld [vmem:[#allocation5 + $0xe8] sm:$0xff]  ;;  %v4490_v44 = vmul.f32 -1.442695, %v151_v32  ;;  %v2086_v48 = vld [vmem:[#allocation5 + $0xf0] sm:$0xff] }
  0xf0   :  { %v5054_v56 = vpop.eup %5053  ;;  %v2472_v57 = vpop.permute.xlu1 %2471  ;;  %5073 = vrcp.f32 %v1286_v52  ;;  %v1288_v59 = vadd.f32 1.0, %v5052_v53  ;;  %v4489_v49 = vmul.f32 -1.442695, %v150_v36  ;;  %v155_v50 = vld [vmem:[#allocation2 + $0x398] sm:$0xff]  ;;  %v4492_v53 = vmul.f32 -1.442695, %v153_v41 }
  0xf1   :  { %v5056_v60 = vpop.eup %5055  ;;  %4095 = vst.msk [vmem:[#allocation7 + $0xb0] sm:$0xff] %vm4072_vm0, %v3806_v54  ;;  %v3809_v61 = vmul.f32 %v2472_v57, %v2081_v51  ;;  %2791 = vperm.xlu1 %4674, %v5034_v23   ;;  %5075 = vrcp.f32 %v1289_v55  ;;  %v1291_v62 = vadd.f32 1.0, %v5054_v56  ;;  %v149_v23 = vld [vmem:[#allocation2 + $0x368] sm:$0xff]  ;;  %v154_v54 = vld [vmem:[#allocation2 + $0x390] sm:$0xff] }
  0xf2   :  { %v5058_v63 = vpop.eup %5057  ;;  %v2467_v0 = vpop.permute.xlu0 %2466  ;;  %5077 = vrcp.f32 %v1288_v59  ;;  %v1290_v2 = vadd.f32 1.0, %v5056_v60  ;;  %v4488_v35 = vmul.f32 -1.442695, %v149_v23  ;;  %v2089_v57 = vld [vmem:[#allocation5 + $0x108] sm:$0xff]  ;;  %v2094_v41 = vld [vmem:[#allocation5 + $0x130] sm:$0xff] }
  0xf3   :  { %v5060_v4 = vpop.eup %5059  ;;  %4098 = vst.msk [vmem:[#allocation7 + $0xc8] sm:$0xff] %vm4072_vm0, %v3809_v61  ;;  %v3808_v5 = vmul.f32 %v2467_v0, %v2080_v58  ;;  %2786 = vperm.xlu0 %4673, %v5974_v27   ;;  %5079 = vrcp.f32 %v1291_v62  ;;  %v1293_v6 = vadd.f32 1.0, %v5058_v63  ;;  %v148_v27 = vld [vmem:[#allocation2 + $0x360] sm:$0xff]  ;;  %v4491_v58 = vmul.f32 -1.442695, %v152_v45  ;;  %v157_v59 = vld [vmem:[#allocation2 + $0x3a8] sm:$0xff] }
  0xf4   :  { %v5062_v8 = vpop.eup %5061  ;;  %v2482_v9 = vpop.permute.xlu1 %2481  ;;  %5081 = vrcp.f32 %v1290_v2  ;;  %v1292_v11 = vadd.f32 1.0, %v5060_v4  ;;  %v4487_v40 = vmul.f32 -1.442695, %v148_v27  ;;  %v4494_v62 = vmul.f32 -1.442695, %v155_v50  ;;  %v2092_v27 = vld [vmem:[#allocation5 + $0x120] sm:$0xff] }
  0xf5   :  { %v5064_v13 = vpop.eup %5063  ;;  %4097 = vst.msk [vmem:[#allocation7 + $0xc0] sm:$0xff] %vm4072_vm0, %v3808_v5  ;;  %v3811_v14 = vmul.f32 %v2482_v9, %v2083_v1  ;;  %2801 = vperm.xlu1 %4674, %v5977_v30   ;;  %5083 = vrcp.f32 %v1293_v6  ;;  %v1295_v15 = vadd.f32 1.0, %v5062_v8  ;;  %v2084_v30 = vld [vmem:[#allocation5 + $0xe0] sm:$0xff]  ;;  %v4493_v2 = vmul.f32 -1.442695, %v154_v54  ;;  %v2091_v8 = vld [vmem:[#allocation5 + $0x118] sm:$0xff] }
  0xf6   :  { %v5066_v18 = vpop.eup %5065  ;;  %v2477_v19 = vpop.permute.xlu0 %2476  ;;  %5085 = vrcp.f32 %v1292_v11  ;;  %v1294_v21 = vadd.f32 1.0, %v5064_v13  ;;  %v2088_v1 = vld [vmem:[#allocation5 + $0x100] sm:$0xff]  ;;  %v4496_v5 = vmul.f32 -1.442695, %v157_v59  ;;  %v2090_v13 = vld [vmem:[#allocation5 + $0x110] sm:$0xff]  ;;  %v2097_v50 = vld [vmem:[#allocation5 + $0x148] sm:$0xff] }
  0xf7   :  { %v5068_v24 = vpop.eup %5067  ;;  %4100 = vst.msk [vmem:[#allocation7 + $0xd8] sm:$0xff] %vm4072_vm0, %v3811_v14  ;;  %v3810_v25 = vmul.f32 %v2477_v19, %v2082_v10  ;;  %2796 = vperm.xlu0 %4673, %v5066_v18   ;;  %5087 = vrcp.f32 %v1295_v15 }
  0xf8   :  { %v5070_v28 = vpop.eup %5069  ;;  %v2492_v29 = vpop.permute.xlu1 %2491  ;;  %5089 = vrcp.f32 %v1294_v21 }
  0xf9   :  { %v5072_v33 = vpop.eup %5071  ;;  %4099 = vst.msk [vmem:[#allocation7 + $0xd0] sm:$0xff] %vm4072_vm0, %v3810_v25  ;;  %v3813_v34 = vmul.f32 %v2492_v29, %v2085_v20  ;;  %2811 = vperm.xlu1 %4674, %v5068_v24   ;;  %5091 = vpow2.f32 %v4484_v16  ;;  %v2093_v20 = vld [vmem:[#allocation5 + $0x128] sm:$0xff] }
  0xfa   :  { %v5074_v37 = vpop.eup %5073  ;;  %v2487_v38 = vpop.permute.xlu0 %2486  ;;  %5093 = vpow2.f32 %v4483_v22 }
  0xfb   :  { %v5076_v42 = vpop.eup %5075  ;;  %4102 = vst.msk [vmem:[#allocation7 + $0xe8] sm:$0xff] %vm4072_vm0, %v3813_v34  ;;  %v3812_v43 = vmul.f32 %v2487_v38, %v2084_v30  ;;  %2806 = vperm.xlu0 %4673, %v5070_v28   ;;  %5095 = vpow2.f32 %v4486_v26  ;;  %v2095_v34 = vld [vmem:[#allocation5 + $0x138] sm:$0xff] }
  0xfc   :  { %v5078_v46 = vpop.eup %5077  ;;  %v2502_v47 = vpop.permute.xlu1 %2501  ;;  %5097 = vpow2.f32 %v4485_v31 }
  0xfd   :  { %v5080_v51 = vpop.eup %5079  ;;  %4101 = vst.msk [vmem:[#allocation7 + $0xe0] sm:$0xff] %vm4072_vm0, %v3812_v43  ;;  %v3815_v52 = vmul.f32 %v2502_v47, %v2087_v39  ;;  %2821 = vperm.xlu1 %4674, %v5072_v33   ;;  %5099 = vpow2.f32 %v4488_v35  ;;  %v156_v43 = vld [vmem:[#allocation2 + $0x3a0] sm:$0xff]  ;;  %v159_v47 = vld [vmem:[#allocation2 + $0x3b8] sm:$0xff] }
  0xfe   :  { %v5082_v55 = vpop.eup %5081  ;;  %v2497_v56 = vpop.permute.xlu0 %2496  ;;  %5101 = vpow2.f32 %v4487_v40 }
  0xff   :  { %v5084_v60 = vpop.eup %5083  ;;  %4104 = vst.msk [vmem:[#allocation7 + $0xf8] sm:$0xff] %vm4072_vm0, %v3815_v52  ;;  %v3814_v61 = vmul.f32 %v2497_v56, %v2086_v48  ;;  %2816 = vperm.xlu0 %4673, %v5074_v37   ;;  %5103 = vpow2.f32 %v4490_v44  ;;  %v158_v52 = vld [vmem:[#allocation2 + $0x3b0] sm:$0xff]  ;;  %v4495_v56 = vmul.f32 -1.442695, %v156_v43 }
 0x100   :  { %v5086_v63 = vpop.eup %5085  ;;  %v2512_v0 = vpop.permute.xlu1 %2511  ;;  %5105 = vpow2.f32 %v4489_v49 }
 0x101   :  { %v5993_v3 = vpop.eup %5087  ;;  %4103 = vst.msk [vmem:[#allocation7 + $0xf0] sm:$0xff] %vm4072_vm0, %v3814_v61  ;;  %v3817_v4 = vmul.f32 %v2512_v0, %v2089_v57  ;;  %2831 = vperm.xlu1 %4674, %v5076_v42   ;;  %5107 = vpow2.f32 %v4492_v53  ;;  %v161_v57 = vld [vmem:[#allocation2 + $0x3c8] sm:$0xff] }
 0x102   :  { %v5996_v6 = vpop.eup %5089  ;;  %v2507_v7 = vpop.permute.xlu0 %2506  ;;  %5109 = vpow2.f32 %v4491_v58 }
 0x103   :  { %v5092_v9 = vpop.eup %5091  ;;  %4106 = vst.msk [vmem:[#allocation7 + $0x108] sm:$0xff] %vm4072_vm0, %v3817_v4  ;;  %v3816_v10 = vmul.f32 %v2507_v7, %v2088_v1  ;;  %2826 = vperm.xlu0 %4673, %v5078_v46   ;;  %5111 = vpow2.f32 %v4494_v62  ;;  %v4498_v62 = vmul.f32 -1.442695, %v159_v47  ;;  %v4500_v7 = vmul.f32 -1.442695, %v161_v57 }
 0x104   :  { %v5094_v11 = vpop.eup %5093  ;;  %v2522_v12 = vpop.permute.xlu1 %2521  ;;  %v1297_v14 = vadd.f32 1.0, %v5092_v9  ;;  %5113 = vpow2.f32 %v4493_v2  ;;  %v4497_v2 = vmul.f32 -1.442695, %v158_v52 }
 0x105   :  { %v5096_v15 = vpop.eup %5095  ;;  %4105 = vst.msk [vmem:[#allocation7 + $0x100] sm:$0xff] %vm4072_vm0, %v3816_v10  ;;  %v3819_v16 = vmul.f32 %v2522_v12, %v2091_v8  ;;  %2841 = vperm.xlu1 %4674, %v5080_v51   ;;  %v1296_v17 = vadd.f32 1.0, %v5094_v11  ;;  %5115 = vpow2.f32 %v4496_v5  ;;  %v162_v8 = vld [vmem:[#allocation2 + $0x3d0] sm:$0xff]  ;;  %v165_v12 = vld [vmem:[#allocation2 + $0x3e8] sm:$0xff] }
 0x106   :  { %v5098_v18 = vpop.eup %5097  ;;  %v2517_v19 = vpop.permute.xlu0 %2516  ;;  %5117 = vrcp.f32 %v1297_v14  ;;  %v1299_v21 = vadd.f32 1.0, %v5096_v15  ;;  %v2098_v15 = vld [vmem:[#allocation5 + $0x150] sm:$0xff] }
 0x107   :  { %v5100_v22 = vpop.eup %5099  ;;  %4108 = vst.msk [vmem:[#allocation7 + $0x118] sm:$0xff] %vm4072_vm0, %v3819_v16  ;;  %v3818_v23 = vmul.f32 %v2517_v19, %v2090_v13  ;;  %2836 = vperm.xlu0 %4673, %v5082_v55   ;;  %5119 = vrcp.f32 %v1296_v17  ;;  %v1298_v24 = vadd.f32 1.0, %v5098_v18  ;;  %v164_v17 = vld [vmem:[#allocation2 + $0x3e0] sm:$0xff] }
 0x108   :  { %v5102_v25 = vpop.eup %5101  ;;  %v2532_v26 = vpop.permute.xlu1 %2531  ;;  %5121 = vrcp.f32 %v1299_v21  ;;  %v1301_v28 = vadd.f32 1.0, %v5100_v22  ;;  %v167_v21 = vld [vmem:[#allocation2 + $0x3f8] sm:$0xff] }
 0x109   :  { %v5104_v29 = vpop.eup %5103  ;;  %4107 = vst.msk [vmem:[#allocation7 + $0x110] sm:$0xff] %vm4072_vm0, %v3818_v23  ;;  %v3821_v30 = vmul.f32 %v2532_v26, %v2093_v20  ;;  %2851 = vperm.xlu1 %4674, %v5084_v60   ;;  %5123 = vrcp.f32 %v1298_v24  ;;  %v1300_v31 = vadd.f32 1.0, %v5102_v25  ;;  %v2096_v60 = vld [vmem:[#allocation5 + $0x140] sm:$0xff]  ;;  %v4501_v20 = vmul.f32 -1.442695, %v162_v8  ;;  %v2101_v24 = vld [vmem:[#allocation5 + $0x168] sm:$0xff] }
 0x10a   :  { %v5106_v32 = vpop.eup %5105  ;;  %v2527_v33 = vpop.permute.xlu0 %2526  ;;  %5125 = vrcp.f32 %v1301_v28  ;;  %v1303_v35 = vadd.f32 1.0, %v5104_v29  ;;  %v4504_v25 = vmul.f32 -1.442695, %v165_v12  ;;  %v166_v26 = vld [vmem:[#allocation2 + $0x3f0] sm:$0xff]  ;;  %v4503_v29 = vmul.f32 -1.442695, %v164_v17 }
 0x10b   :  { %v5108_v36 = vpop.eup %5107  ;;  %4110 = vst.msk [vmem:[#allocation7 + $0x128] sm:$0xff] %vm4072_vm0, %v3821_v30  ;;  %v3820_v37 = vmul.f32 %v2527_v33, %v2092_v27  ;;  %2846 = vperm.xlu0 %4673, %v5086_v63   ;;  %5127 = vrcp.f32 %v1300_v31  ;;  %v1302_v38 = vadd.f32 1.0, %v5106_v32  ;;  %v160_v63 = vld [vmem:[#allocation2 + $0x3c0] sm:$0xff]  ;;  %v169_v30 = vld [vmem:[#allocation2 + $0x408] sm:$0xff] }
 0x10c   :  { %v5110_v39 = vpop.eup %5109  ;;  %v2542_v40 = vpop.permute.xlu1 %2541  ;;  %5129 = vrcp.f32 %v1303_v35  ;;  %v1305_v42 = vadd.f32 1.0, %v5108_v36  ;;  %v4499_v11 = vmul.f32 -1.442695, %v160_v63  ;;  %v2100_v33 = vld [vmem:[#allocation5 + $0x160] sm:$0xff]  ;;  %v2109_v17 = vld [vmem:[#allocation5 + $0x1a8] sm:$0xff] }
 0x10d   :  { %v5112_v44 = vpop.eup %5111  ;;  %4109 = vst.msk [vmem:[#allocation7 + $0x120] sm:$0xff] %vm4072_vm0, %v3820_v37  ;;  %v3823_v45 = vmul.f32 %v2542_v40, %v2095_v34  ;;  %2861 = vperm.xlu1 %4674, %v5993_v3   ;;  %5131 = vrcp.f32 %v1302_v38  ;;  %v1304_v46 = vadd.f32 1.0, %v5110_v39  ;;  %v163_v3 = vld [vmem:[#allocation2 + $0x3d8] sm:$0xff]  ;;  %v4506_v34 = vmul.f32 -1.442695, %v167_v21  ;;  %v168_v35 = vld [vmem:[#allocation2 + $0x400] sm:$0xff] }
 0x10e   :  { %v5114_v48 = vpop.eup %5113  ;;  %v2537_v49 = vpop.permute.xlu0 %2536  ;;  %5133 = vrcp.f32 %v1305_v42  ;;  %v1307_v51 = vadd.f32 1.0, %v5112_v44  ;;  %v4502_v16 = vmul.f32 -1.442695, %v163_v3  ;;  %v4505_v38 = vmul.f32 -1.442695, %v166_v26  ;;  %v2107_v3 = vld [vmem:[#allocation5 + $0x198] sm:$0xff] }
 0x10f   :  { %v5116_v53 = vpop.eup %5115  ;;  %4112 = vst.msk [vmem:[#allocation7 + $0x138] sm:$0xff] %vm4072_vm0, %v3823_v45  ;;  %v3822_v54 = vmul.f32 %v2537_v49, %v2094_v41  ;;  %2856 = vperm.xlu0 %4673, %v5996_v6   ;;  %5135 = vrcp.f32 %v1304_v46  ;;  %v1306_v55 = vadd.f32 1.0, %v5114_v48  ;;  %v2099_v6 = vld [vmem:[#allocation5 + $0x158] sm:$0xff]  ;;  %v4508_v42 = vmul.f32 -1.442695, %v169_v30  ;;  %v2102_v48 = vld [vmem:[#allocation5 + $0x170] sm:$0xff] }
 0x110   :  { %v5118_v58 = vpop.eup %5117  ;;  %v2552_v59 = vpop.permute.xlu1 %2551  ;;  %5137 = vrcp.f32 %v1307_v51  ;;  %v1309_v61 = vadd.f32 1.0, %v5116_v53  ;;  %v2103_v41 = vld [vmem:[#allocation5 + $0x178] sm:$0xff]  ;;  %v4507_v45 = vmul.f32 -1.442695, %v168_v35  ;;  %v2105_v53 = vld [vmem:[#allocation5 + $0x188] sm:$0xff]  ;;  %v2108_v26 = vld [vmem:[#allocation5 + $0x1a0] sm:$0xff] }
 0x111   :  { %v5120_v0 = vpop.eup %5119  ;;  %4111 = vst.msk [vmem:[#allocation7 + $0x130] sm:$0xff] %vm4072_vm0, %v3822_v54  ;;  %v3825_v1 = vmul.f32 %v2552_v59, %v2097_v50  ;;  %2871 = vperm.xlu1 %4674, %v5118_v58   ;;  %5139 = vrcp.f32 %v1306_v55 }
 0x112   :  { %v5122_v4 = vpop.eup %5121  ;;  %v2547_v5 = vpop.permute.xlu0 %2546  ;;  %5141 = vrcp.f32 %v1309_v61 }
 0x113   :  { %v5124_v9 = vpop.eup %5123  ;;  %4114 = vst.msk [vmem:[#allocation7 + $0x148] sm:$0xff] %vm4072_vm0, %v3825_v1  ;;  %v3824_v10 = vmul.f32 %v2547_v5, %v2096_v60  ;;  %2866 = vperm.xlu0 %4673, %v5120_v0   ;;  %5143 = vpow2.f32 %v4495_v56  ;;  %v2104_v60 = vld [vmem:[#allocation5 + $0x180] sm:$0xff] }
 0x114   :  { %v5126_v13 = vpop.eup %5125  ;;  %v2562_v14 = vpop.permute.xlu1 %2561  ;;  %5145 = vpow2.f32 %v4498_v62 }
 0x115   :  { %v5128_v18 = vpop.eup %5127  ;;  %4113 = vst.msk [vmem:[#allocation7 + $0x140] sm:$0xff] %vm4072_vm0, %v3824_v10  ;;  %v3827_v19 = vmul.f32 %v2562_v14, %v2099_v6  ;;  %2881 = vperm.xlu1 %4674, %v5122_v4   ;;  %5147 = vpow2.f32 %v4497_v2  ;;  %v2106_v10 = vld [vmem:[#allocation5 + $0x190] sm:$0xff] }
 0x116   :  { %v5130_v22 = vpop.eup %5129  ;;  %v2557_v23 = vpop.permute.xlu0 %2556  ;;  %5149 = vpow2.f32 %v4500_v7 }
 0x117   :  { %v5132_v27 = vpop.eup %5131  ;;  %4116 = vst.msk [vmem:[#allocation7 + $0x158] sm:$0xff] %vm4072_vm0, %v3827_v19  ;;  %v3826_v28 = vmul.f32 %v2557_v23, %v2098_v15  ;;  %2876 = vperm.xlu0 %4673, %v5124_v9   ;;  %5151 = vpow2.f32 %v4499_v11  ;;  %v171_v19 = vld [vmem:[#allocation2 + $0x418] sm:$0xff]  ;;  %v170_v23 = vld [vmem:[#allocation2 + $0x410] sm:$0xff] }
 0x118   :  { %v5134_v31 = vpop.eup %5133  ;;  %v2572_v32 = vpop.permute.xlu1 %2571  ;;  %5153 = vpow2.f32 %v4502_v16 }
 0x119   :  { %v5136_v36 = vpop.eup %5135  ;;  %4115 = vst.msk [vmem:[#allocation7 + $0x150] sm:$0xff] %vm4072_vm0, %v3826_v28  ;;  %v3829_v37 = vmul.f32 %v2572_v32, %v2101_v24  ;;  %2891 = vperm.xlu1 %4674, %v5126_v13   ;;  %5155 = vpow2.f32 %v4501_v20  ;;  %v173_v28 = vld [vmem:[#allocation2 + $0x428] sm:$0xff]  ;;  %v4510_v32 = vmul.f32 -1.442695, %v171_v19 }
 0x11a   :  { %v5138_v39 = vpop.eup %5137  ;;  %v2567_v40 = vpop.permute.xlu0 %2566  ;;  %5157 = vpow2.f32 %v4504_v25 }
 0x11b   :  { %v6012_v43 = vpop.eup %5139  ;;  %4118 = vst.msk [vmem:[#allocation7 + $0x168] sm:$0xff] %vm4072_vm0, %v3829_v37  ;;  %v3828_v44 = vmul.f32 %v2567_v40, %v2100_v33  ;;  %2886 = vperm.xlu0 %4673, %v5128_v18   ;;  %5159 = vpow2.f32 %v4503_v29  ;;  %v172_v33 = vld [vmem:[#allocation2 + $0x420] sm:$0xff] }
 0x11c   :  { %v6015_v46 = vpop.eup %5141  ;;  %v2582_v47 = vpop.permute.xlu1 %2581  ;;  %5161 = vpow2.f32 %v4506_v34 }
 0x11d   :  { %v5144_v49 = vpop.eup %5143  ;;  %4117 = vst.msk [vmem:[#allocation7 + $0x160] sm:$0xff] %vm4072_vm0, %v3828_v44  ;;  %v3831_v50 = vmul.f32 %v2582_v47, %v2103_v41  ;;  %2901 = vperm.xlu1 %4674, %v5130_v22   ;;  %5163 = vpow2.f32 %v4505_v38  ;;  %v4509_v38 = vmul.f32 -1.442695, %v170_v23  ;;  %v4511_v47 = vmul.f32 -1.442695, %v172_v33 }
 0x11e   :  { %v5146_v51 = vpop.eup %5145  ;;  %v2577_v52 = vpop.permute.xlu0 %2576  ;;  %v1308_v54 = vadd.f32 1.0, %v5144_v49  ;;  %5165 = vpow2.f32 %v4508_v42  ;;  %v4512_v42 = vmul.f32 -1.442695, %v173_v28 }
 0x11f   :  { %v5148_v55 = vpop.eup %5147  ;;  %4120 = vst.msk [vmem:[#allocation7 + $0x178] sm:$0xff] %vm4072_vm0, %v3831_v50  ;;  %v3830_v56 = vmul.f32 %v2577_v52, %v2102_v48  ;;  %2896 = vperm.xlu0 %4673, %v5132_v27   ;;  %v1311_v57 = vadd.f32 1.0, %v5146_v51  ;;  %5167 = vpow2.f32 %v4507_v45  ;;  %v177_v48 = vld [vmem:[#allocation2 + $0x448] sm:$0xff]  ;;  %v176_v52 = vld [vmem:[#allocation2 + $0x440] sm:$0xff] }
 0x120   :  { %v5150_v58 = vpop.eup %5149  ;;  %v2592_v59 = vpop.permute.xlu1 %2591  ;;  %5169 = vrcp.f32 %v1308_v54  ;;  %v1310_v61 = vadd.f32 1.0, %v5148_v55  ;;  %v2113_v55 = vld [vmem:[#allocation5 + $0x1c8] sm:$0xff] }
 0x121   :  { %v5152_v62 = vpop.eup %5151  ;;  %4119 = vst.msk [vmem:[#allocation7 + $0x170] sm:$0xff] %vm4072_vm0, %v3830_v56  ;;  %v3833_v63 = vmul.f32 %v2592_v59, %v2105_v53  ;;  %2911 = vperm.xlu1 %4674, %v5134_v31   ;;  %5171 = vrcp.f32 %v1311_v57  ;;  %v1313_v0 = vadd.f32 1.0, %v5150_v58  ;;  %v179_v57 = vld [vmem:[#allocation2 + $0x458] sm:$0xff] }
 0x122   :  { %v5154_v1 = vpop.eup %5153  ;;  %v2587_v2 = vpop.permute.xlu0 %2586  ;;  %5173 = vrcp.f32 %v1310_v61  ;;  %v1312_v4 = vadd.f32 1.0, %v5152_v62  ;;  %v178_v61 = vld [vmem:[#allocation2 + $0x450] sm:$0xff] }
 0x123   :  { %v5156_v5 = vpop.eup %5155  ;;  %4122 = vst.msk [vmem:[#allocation7 + $0x188] sm:$0xff] %vm4072_vm0, %v3833_v63  ;;  %v3832_v6 = vmul.f32 %v2587_v2, %v2104_v60  ;;  %2906 = vperm.xlu0 %4673, %v5136_v36   ;;  %5175 = vrcp.f32 %v1313_v0  ;;  %v1315_v7 = vadd.f32 1.0, %v5154_v1  ;;  %v2111_v36 = vld [vmem:[#allocation5 + $0x1b8] sm:$0xff]  ;;  %v4516_v60 = vmul.f32 -1.442695, %v177_v48  ;;  %v2112_v0 = vld [vmem:[#allocation5 + $0x1c0] sm:$0xff] }
 0x124   :  { %v5158_v8 = vpop.eup %5157  ;;  %v2602_v9 = vpop.permute.xlu1 %2601  ;;  %5177 = vrcp.f32 %v1312_v4  ;;  %v1314_v11 = vadd.f32 1.0, %v5156_v5  ;;  %v4515_v1 = vmul.f32 -1.442695, %v176_v52  ;;  %v181_v2 = vld [vmem:[#allocation2 + $0x468] sm:$0xff]  ;;  %v4518_v5 = vmul.f32 -1.442695, %v179_v57 }
 0x125   :  { %v5160_v12 = vpop.eup %5159  ;;  %4121 = vst.msk [vmem:[#allocation7 + $0x180] sm:$0xff] %vm4072_vm0, %v3832_v6  ;;  %v3835_v13 = vmul.f32 %v2602_v9, %v2107_v3  ;;  %2921 = vperm.xlu1 %4674, %v5138_v39   ;;  %5179 = vrcp.f32 %v1315_v7  ;;  %v1317_v14 = vadd.f32 1.0, %v5158_v8  ;;  %v175_v39 = vld [vmem:[#allocation2 + $0x438] sm:$0xff]  ;;  %v180_v6 = vld [vmem:[#allocation2 + $0x460] sm:$0xff] }
 0x126   :  { %v5162_v15 = vpop.eup %5161  ;;  %v2597_v16 = vpop.permute.xlu0 %2596  ;;  %5181 = vrcp.f32 %v1314_v11  ;;  %v1316_v18 = vadd.f32 1.0, %v5160_v12  ;;  %v4514_v51 = vmul.f32 -1.442695, %v175_v39  ;;  %v2115_v9 = vld [vmem:[#allocation5 + $0x1d8] sm:$0xff]  ;;  %v2120_v57 = vld [vmem:[#allocation5 + $0x200] sm:$0xff] }
 0x127   :  { %v5164_v20 = vpop.eup %5163  ;;  %4124 = vst.msk [vmem:[#allocation7 + $0x198] sm:$0xff] %vm4072_vm0, %v3835_v13  ;;  %v3834_v21 = vmul.f32 %v2597_v16, %v2106_v10  ;;  %2916 = vperm.xlu0 %4673, %v6012_v43   ;;  %5183 = vrcp.f32 %v1317_v14  ;;  %v1319_v22 = vadd.f32 1.0, %v5162_v15  ;;  %v174_v43 = vld [vmem:[#allocation2 + $0x430] sm:$0xff]  ;;  %v4517_v10 = vmul.f32 -1.442695, %v178_v61  ;;  %v183_v11 = vld [vmem:[#allocation2 + $0x478] sm:$0xff] }
 0x128   :  { %v5166_v24 = vpop.eup %5165  ;;  %v2612_v25 = vpop.permute.xlu1 %2611  ;;  %5185 = vrcp.f32 %v1316_v18  ;;  %v1318_v27 = vadd.f32 1.0, %v5164_v20  ;;  %v4513_v56 = vmul.f32 -1.442695, %v174_v43  ;;  %v4520_v14 = vmul.f32 -1.442695, %v181_v2  ;;  %v2118_v43 = vld [vmem:[#allocation5 + $0x1f0] sm:$0xff] }
 0x129   :  { %v5168_v29 = vpop.eup %5167  ;;  %4123 = vst.msk [vmem:[#allocation7 + $0x190] sm:$0xff] %vm4072_vm0, %v3834_v21  ;;  %v3837_v30 = vmul.f32 %v2612_v25, %v2109_v17  ;;  %2931 = vperm.xlu1 %4674, %v6015_v46   ;;  %5187 = vrcp.f32 %v1319_v22  ;;  %v1321_v31 = vadd.f32 1.0, %v5166_v24  ;;  %v2110_v46 = vld [vmem:[#allocation5 + $0x1b0] sm:$0xff]  ;;  %v4519_v18 = vmul.f32 -1.442695, %v180_v6  ;;  %v2117_v24 = vld [vmem:[#allocation5 + $0x1e8] sm:$0xff] }
 0x12a   :  { %v5170_v34 = vpop.eup %5169  ;;  %v2607_v35 = vpop.permute.xlu0 %2606  ;;  %5189 = vrcp.f32 %v1318_v27  ;;  %v1320_v37 = vadd.f32 1.0, %v5168_v29  ;;  %v2114_v17 = vld [vmem:[#allocation5 + $0x1d0] sm:$0xff]  ;;  %v4522_v21 = vmul.f32 -1.442695, %v183_v11  ;;  %v2116_v29 = vld [vmem:[#allocation5 + $0x1e0] sm:$0xff]  ;;  %v2123_v2 = vld [vmem:[#allocation5 + $0x218] sm:$0xff] }
 0x12b   :  { %v5172_v40 = vpop.eup %5171  ;;  %4126 = vst.msk [vmem:[#allocation7 + $0x1a8] sm:$0xff] %vm4072_vm0, %v3837_v30  ;;  %v3836_v41 = vmul.f32 %v2607_v35, %v2108_v26  ;;  %2926 = vperm.xlu0 %4673, %v5170_v34   ;;  %5191 = vrcp.f32 %v1321_v31 }
 0x12c   :  { %v5174_v44 = vpop.eup %5173  ;;  %v2622_v45 = vpop.permute.xlu1 %2621  ;;  %5193 = vrcp.f32 %v1320_v37 }
 0x12d   :  { %v5176_v49 = vpop.eup %5175  ;;  %4125 = vst.msk [vmem:[#allocation7 + $0x1a0] sm:$0xff] %vm4072_vm0, %v3836_v41  ;;  %v3839_v50 = vmul.f32 %v2622_v45, %v2111_v36  ;;  %2941 = vperm.xlu1 %4674, %v5172_v40   ;;  %5195 = vpow2.f32 %v4510_v32  ;;  %v2119_v36 = vld [vmem:[#allocation5 + $0x1f8] sm:$0xff] }
 0x12e   :  { %v5178_v53 = vpop.eup %5177  ;;  %v2617_v54 = vpop.permute.xlu0 %2616  ;;  %5197 = vpow2.f32 %v4509_v38 }
 0x12f   :  { %v5180_v58 = vpop.eup %5179  ;;  %4128 = vst.msk [vmem:[#allocation7 + $0x1b8] sm:$0xff] %vm4072_vm0, %v3839_v50  ;;  %v3838_v59 = vmul.f32 %v2617_v54, %v2110_v46  ;;  %2936 = vperm.xlu0 %4673, %v5174_v44   ;;  %5199 = vpow2.f32 %v4512_v42  ;;  %v2121_v50 = vld [vmem:[#allocation5 + $0x208] sm:$0xff] }
 0x130   :  { %v5182_v62 = vpop.eup %5181  ;;  %v2632_v63 = vpop.permute.xlu1 %2631  ;;  %5201 = vpow2.f32 %v4511_v47 }
 0x131   :  { %v5184_v3 = vpop.eup %5183  ;;  %4127 = vst.msk [vmem:[#allocation7 + $0x1b0] sm:$0xff] %vm4072_vm0, %v3838_v59  ;;  %v3841_v4 = vmul.f32 %v2632_v63, %v2113_v55  ;;  %2951 = vperm.xlu1 %4674, %v5176_v49   ;;  %5203 = vpow2.f32 %v4514_v51  ;;  %v182_v59 = vld [vmem:[#allocation2 + $0x470] sm:$0xff]  ;;  %v185_v63 = vld [vmem:[#allocation2 + $0x488] sm:$0xff] }
 0x132   :  { %v5186_v7 = vpop.eup %5185  ;;  %v2627_v8 = vpop.permute.xlu0 %2626  ;;  %5205 = vpow2.f32 %v4513_v56 }
 0x133   :  { %v5188_v12 = vpop.eup %5187  ;;  %4130 = vst.msk [vmem:[#allocation7 + $0x1c8] sm:$0xff] %vm4072_vm0, %v3841_v4  ;;  %v3840_v13 = vmul.f32 %v2627_v8, %v2112_v0  ;;  %2946 = vperm.xlu0 %4673, %v5178_v53   ;;  %5207 = vpow2.f32 %v4516_v60  ;;  %v184_v4 = vld [vmem:[#allocation2 + $0x480] sm:$0xff]  ;;  %v4521_v8 = vmul.f32 -1.442695, %v182_v59 }
 0x134   :  { %v5190_v15 = vpop.eup %5189  ;;  %v2642_v16 = vpop.permute.xlu1 %2641  ;;  %5209 = vpow2.f32 %v4515_v1 }
 0x135   :  { %v6031_v19 = vpop.eup %5191  ;;  %4129 = vst.msk [vmem:[#allocation7 + $0x1c0] sm:$0xff] %vm4072_vm0, %v3840_v13  ;;  %v3843_v20 = vmul.f32 %v2642_v16, %v2115_v9  ;;  %2961 = vperm.xlu1 %4674, %v5180_v58   ;;  %5211 = vpow2.f32 %v4518_v5  ;;  %v187_v9 = vld [vmem:[#allocation2 + $0x498] sm:$0xff] }
 0x136   :  { %v6034_v22 = vpop.eup %5193  ;;  %v2637_v23 = vpop.permute.xlu0 %2636  ;;  %5213 = vpow2.f32 %v4517_v10 }
 0x137   :  { %v5196_v25 = vpop.eup %5195  ;;  %4132 = vst.msk [vmem:[#allocation7 + $0x1d8] sm:$0xff] %vm4072_vm0, %v3843_v20  ;;  %v3842_v26 = vmul.f32 %v2637_v23, %v2114_v17  ;;  %2956 = vperm.xlu0 %4673, %v5182_v62   ;;  %5215 = vpow2.f32 %v4520_v14  ;;  %v4524_v14 = vmul.f32 -1.442695, %v185_v63  ;;  %v4526_v23 = vmul.f32 -1.442695, %v187_v9 }
 0x138   :  { %v5198_v27 = vpop.eup %5197  ;;  %v2652_v28 = vpop.permute.xlu1 %2651  ;;  %v1323_v30 = vadd.f32 1.0, %v5196_v25  ;;  %5217 = vpow2.f32 %v4519_v18  ;;  %v4523_v18 = vmul.f32 -1.442695, %v184_v4 }
 0x139   :  { %v5200_v31 = vpop.eup %5199  ;;  %4131 = vst.msk [vmem:[#allocation7 + $0x1d0] sm:$0xff] %vm4072_vm0, %v3842_v26  ;;  %v3845_v32 = vmul.f32 %v2652_v28, %v2117_v24  ;;  %2971 = vperm.xlu1 %4674, %v5184_v3   ;;  %v1322_v33 = vadd.f32 1.0, %v5198_v27  ;;  %5219 = vpow2.f32 %v4522_v21  ;;  %v188_v24 = vld [vmem:[#allocation2 + $0x4a0] sm:$0xff]  ;;  %v191_v28 = vld [vmem:[#allocation2 + $0x4b8] sm:$0xff] }
 0x13a   :  { %v5202_v34 = vpop.eup %5201  ;;  %v2647_v35 = vpop.permute.xlu0 %2646  ;;  %5221 = vrcp.f32 %v1323_v30  ;;  %v1325_v37 = vadd.f32 1.0, %v5200_v31  ;;  %v2124_v31 = vld [vmem:[#allocation5 + $0x220] sm:$0xff] }
 0x13b   :  { %v5204_v38 = vpop.eup %5203  ;;  %4134 = vst.msk [vmem:[#allocation7 + $0x1e8] sm:$0xff] %vm4072_vm0, %v3845_v32  ;;  %v3844_v39 = vmul.f32 %v2647_v35, %v2116_v29  ;;  %2966 = vperm.xlu0 %4673, %v5186_v7   ;;  %5223 = vrcp.f32 %v1322_v33  ;;  %v1324_v40 = vadd.f32 1.0, %v5202_v34  ;;  %v190_v33 = vld [vmem:[#allocation2 + $0x4b0] sm:$0xff] }
 0x13c   :  { %v5206_v41 = vpop.eup %5205  ;;  %v2662_v42 = vpop.permute.xlu1 %2661  ;;  %5225 = vrcp.f32 %v1325_v37  ;;  %v1327_v44 = vadd.f32 1.0, %v5204_v38  ;;  %v193_v37 = vld [vmem:[#allocation2 + $0x4c8] sm:$0xff] }
 0x13d   :  { %v5208_v45 = vpop.eup %5207  ;;  %4133 = vst.msk [vmem:[#allocation7 + $0x1e0] sm:$0xff] %vm4072_vm0, %v3844_v39  ;;  %v3847_v46 = vmul.f32 %v2662_v42, %v2119_v36  ;;  %2981 = vperm.xlu1 %4674, %v5188_v12   ;;  %5227 = vrcp.f32 %v1324_v40  ;;  %v1326_v47 = vadd.f32 1.0, %v5206_v41  ;;  %v2122_v12 = vld [vmem:[#allocation5 + $0x210] sm:$0xff]  ;;  %v4527_v36 = vmul.f32 -1.442695, %v188_v24  ;;  %v2127_v40 = vld [vmem:[#allocation5 + $0x238] sm:$0xff] }
 0x13e   :  { %v5210_v48 = vpop.eup %5209  ;;  %v2657_v49 = vpop.permute.xlu0 %2656  ;;  %5229 = vrcp.f32 %v1327_v44  ;;  %v1329_v51 = vadd.f32 1.0, %v5208_v45  ;;  %v4530_v41 = vmul.f32 -1.442695, %v191_v28  ;;  %v192_v42 = vld [vmem:[#allocation2 + $0x4c0] sm:$0xff]  ;;  %v4529_v45 = vmul.f32 -1.442695, %v190_v33 }
 0x13f   :  { %v5212_v52 = vpop.eup %5211  ;;  %4136 = vst.msk [vmem:[#allocation7 + $0x1f8] sm:$0xff] %vm4072_vm0, %v3847_v46  ;;  %v3846_v53 = vmul.f32 %v2657_v49, %v2118_v43  ;;  %2976 = vperm.xlu0 %4673, %v5190_v15   ;;  %5231 = vrcp.f32 %v1326_v47  ;;  %v1328_v54 = vadd.f32 1.0, %v5210_v48  ;;  %v186_v15 = vld [vmem:[#allocation2 + $0x490] sm:$0xff]  ;;  %v195_v46 = vld [vmem:[#allocation2 + $0x4d8] sm:$0xff] }
 0x140   :  { %v5214_v55 = vpop.eup %5213  ;;  %v2672_v56 = vpop.permute.xlu1 %2671  ;;  %5233 = vrcp.f32 %v1329_v51  ;;  %v1331_v58 = vadd.f32 1.0, %v5212_v52  ;;  %v4525_v27 = vmul.f32 -1.442695, %v186_v15  ;;  %v2126_v49 = vld [vmem:[#allocation5 + $0x230] sm:$0xff]  ;;  %v2135_v33 = vld [vmem:[#allocation5 + $0x278] sm:$0xff] }
 0x141   :  { %v5216_v60 = vpop.eup %5215  ;;  %4135 = vst.msk [vmem:[#allocation7 + $0x1f0] sm:$0xff] %vm4072_vm0, %v3846_v53  ;;  %v3849_v61 = vmul.f32 %v2672_v56, %v2121_v50  ;;  %2991 = vperm.xlu1 %4674, %v6031_v19   ;;  %5235 = vrcp.f32 %v1328_v54  ;;  %v1330_v62 = vadd.f32 1.0, %v5214_v55  ;;  %v189_v19 = vld [vmem:[#allocation2 + $0x4a8] sm:$0xff]  ;;  %v4532_v50 = vmul.f32 -1.442695, %v193_v37  ;;  %v194_v51 = vld [vmem:[#allocation2 + $0x4d0] sm:$0xff] }
 0x142   :  { %v5218_v0 = vpop.eup %5217  ;;  %v2667_v1 = vpop.permute.xlu0 %2666  ;;  %5237 = vrcp.f32 %v1331_v58  ;;  %v1333_v3 = vadd.f32 1.0, %v5216_v60  ;;  %v4528_v32 = vmul.f32 -1.442695, %v189_v19  ;;  %v4531_v54 = vmul.f32 -1.442695, %v192_v42  ;;  %v2133_v19 = vld [vmem:[#allocation5 + $0x268] sm:$0xff] }
 0x143   :  { %v5220_v5 = vpop.eup %5219  ;;  %4138 = vst.msk [vmem:[#allocation7 + $0x208] sm:$0xff] %vm4072_vm0, %v3849_v61  ;;  %v3848_v6 = vmul.f32 %v2667_v1, %v2120_v57  ;;  %2986 = vperm.xlu0 %4673, %v6034_v22   ;;  %5239 = vrcp.f32 %v1330_v62  ;;  %v1332_v7 = vadd.f32 1.0, %v5218_v0  ;;  %v2125_v22 = vld [vmem:[#allocation5 + $0x228] sm:$0xff]  ;;  %v4534_v58 = vmul.f32 -1.442695, %v195_v46  ;;  %v2128_v0 = vld [vmem:[#allocation5 + $0x240] sm:$0xff] }
 0x144   :  { %v5222_v10 = vpop.eup %5221  ;;  %v2682_v11 = vpop.permute.xlu1 %2681  ;;  %5241 = vrcp.f32 %v1333_v3  ;;  %v1335_v13 = vadd.f32 1.0, %v5220_v5  ;;  %v2129_v57 = vld [vmem:[#allocation5 + $0x248] sm:$0xff]  ;;  %v4533_v61 = vmul.f32 -1.442695, %v194_v51  ;;  %v2131_v5 = vld [vmem:[#allocation5 + $0x258] sm:$0xff]  ;;  %v2134_v42 = vld [vmem:[#allocation5 + $0x270] sm:$0xff] }
 0x145   :  { %v5224_v16 = vpop.eup %5223  ;;  %4137 = vst.msk [vmem:[#allocation7 + $0x200] sm:$0xff] %vm4072_vm0, %v3848_v6  ;;  %v3851_v17 = vmul.f32 %v2682_v11, %v2123_v2  ;;  %3001 = vperm.xlu1 %4674, %v5222_v10   ;;  %5243 = vrcp.f32 %v1332_v7 }
 0x146   :  { %v5226_v20 = vpop.eup %5225  ;;  %v2677_v21 = vpop.permute.xlu0 %2676  ;;  %5245 = vrcp.f32 %v1335_v13 }
 0x147   :  { %v5228_v25 = vpop.eup %5227  ;;  %4140 = vst.msk [vmem:[#allocation7 + $0x218] sm:$0xff] %vm4072_vm0, %v3851_v17  ;;  %v3850_v26 = vmul.f32 %v2677_v21, %v2122_v12  ;;  %2996 = vperm.xlu0 %4673, %v5224_v16   ;;  %5247 = vpow2.f32 %v4521_v8  ;;  %v2130_v12 = vld [vmem:[#allocation5 + $0x250] sm:$0xff] }
 0x148   :  { %v5230_v29 = vpop.eup %5229  ;;  %v2692_v30 = vpop.permute.xlu1 %2691  ;;  %5249 = vpow2.f32 %v4524_v14 }
 0x149   :  { %v5232_v34 = vpop.eup %5231  ;;  %4139 = vst.msk [vmem:[#allocation7 + $0x210] sm:$0xff] %vm4072_vm0, %v3850_v26  ;;  %v3853_v35 = vmul.f32 %v2692_v30, %v2125_v22  ;;  %3011 = vperm.xlu1 %4674, %v5226_v20   ;;  %5251 = vpow2.f32 %v4523_v18  ;;  %v2132_v26 = vld [vmem:[#allocation5 + $0x260] sm:$0xff] }
 0x14a   :  { %v5234_v38 = vpop.eup %5233  ;;  %v2687_v39 = vpop.permute.xlu0 %2686  ;;  %5253 = vpow2.f32 %v4526_v23 }
 0x14b   :  { %v5236_v43 = vpop.eup %5235  ;;  %4142 = vst.msk [vmem:[#allocation7 + $0x228] sm:$0xff] %vm4072_vm0, %v3853_v35  ;;  %v3852_v44 = vmul.f32 %v2687_v39, %v2124_v31  ;;  %3006 = vperm.xlu0 %4673, %v5228_v25   ;;  %5255 = vpow2.f32 %v4525_v27  ;;  %v197_v35 = vld [vmem:[#allocation2 + $0x4e8] sm:$0xff]  ;;  %v196_v39 = vld [vmem:[#allocation2 + $0x4e0] sm:$0xff] }
 0x14c   :  { %v5238_v47 = vpop.eup %5237  ;;  %v2702_v48 = vpop.permute.xlu1 %2701  ;;  %5257 = vpow2.f32 %v4528_v32 }
 0x14d   :  { %v5240_v52 = vpop.eup %5239  ;;  %4141 = vst.msk [vmem:[#allocation7 + $0x220] sm:$0xff] %vm4072_vm0, %v3852_v44  ;;  %v3855_v53 = vmul.f32 %v2702_v48, %v2127_v40  ;;  %3021 = vperm.xlu1 %4674, %v5230_v29   ;;  %5259 = vpow2.f32 %v4527_v36  ;;  %v199_v44 = vld [vmem:[#allocation2 + $0x4f8] sm:$0xff]  ;;  %v4536_v48 = vmul.f32 -1.442695, %v197_v35 }
 0x14e   :  { %v5242_v55 = vpop.eup %5241  ;;  %v2697_v56 = vpop.permute.xlu0 %2696  ;;  %5261 = vpow2.f32 %v4530_v41 }
 0x14f   :  { %v6050_v59 = vpop.eup %5243  ;;  %4144 = vst.msk [vmem:[#allocation7 + $0x238] sm:$0xff] %vm4072_vm0, %v3855_v53  ;;  %v3854_v60 = vmul.f32 %v2697_v56, %v2126_v49  ;;  %3016 = vperm.xlu0 %4673, %v5232_v34   ;;  %5263 = vpow2.f32 %v4529_v45  ;;  %v198_v49 = vld [vmem:[#allocation2 + $0x4f0] sm:$0xff] }
 0x150   :  { %v6053_v62 = vpop.eup %5245  ;;  %v2712_v63 = vpop.permute.xlu1 %2711  ;;  %5265 = vpow2.f32 %v4532_v50 }
 0x151   :  { %v5248_v1 = vpop.eup %5247  ;;  %4143 = vst.msk [vmem:[#allocation7 + $0x230] sm:$0xff] %vm4072_vm0, %v3854_v60  ;;  %v3857_v2 = vmul.f32 %v2712_v63, %v2129_v57  ;;  %3031 = vperm.xlu1 %4674, %v5234_v38   ;;  %5267 = vpow2.f32 %v4531_v54  ;;  %v4535_v54 = vmul.f32 -1.442695, %v196_v39  ;;  %v4537_v63 = vmul.f32 -1.442695, %v198_v49 }
 0x152   :  { %v5250_v3 = vpop.eup %5249  ;;  %v2707_v4 = vpop.permute.xlu0 %2706  ;;  %v1334_v6 = vadd.f32 1.0, %v5248_v1  ;;  %5269 = vpow2.f32 %v4534_v58  ;;  %v4538_v58 = vmul.f32 -1.442695, %v199_v44 }
 0x153   :  { %v5252_v7 = vpop.eup %5251  ;;  %4146 = vst.msk [vmem:[#allocation7 + $0x248] sm:$0xff] %vm4072_vm0, %v3857_v2  ;;  %v3856_v8 = vmul.f32 %v2707_v4, %v2128_v0  ;;  %3026 = vperm.xlu0 %4673, %v5236_v43   ;;  %v1337_v9 = vadd.f32 1.0, %v5250_v3  ;;  %5271 = vpow2.f32 %v4533_v61  ;;  %v203_v0 = vld [vmem:[#allocation2 + $0x518] sm:$0xff]  ;;  %v202_v4 = vld [vmem:[#allocation2 + $0x510] sm:$0xff] }
 0x154   :  { %v5254_v10 = vpop.eup %5253  ;;  %v2722_v11 = vpop.permute.xlu1 %2721  ;;  %5273 = vrcp.f32 %v1334_v6  ;;  %v1336_v13 = vadd.f32 1.0, %v5252_v7  ;;  %v2139_v7 = vld [vmem:[#allocation5 + $0x298] sm:$0xff] }
 0x155   :  { %v5256_v14 = vpop.eup %5255  ;;  %4145 = vst.msk [vmem:[#allocation7 + $0x240] sm:$0xff] %vm4072_vm0, %v3856_v8  ;;  %v3859_v15 = vmul.f32 %v2722_v11, %v2131_v5  ;;  %3041 = vperm.xlu1 %4674, %v5238_v47   ;;  %5275 = vrcp.f32 %v1337_v9  ;;  %v1339_v16 = vadd.f32 1.0, %v5254_v10  ;;  %v205_v9 = vld [vmem:[#allocation2 + $0x528] sm:$0xff] }
 0x156   :  { %v5258_v17 = vpop.eup %5257  ;;  %v2717_v18 = vpop.permute.xlu0 %2716  ;;  %5277 = vrcp.f32 %v1336_v13  ;;  %v1338_v20 = vadd.f32 1.0, %v5256_v14  ;;  %v204_v13 = vld [vmem:[#allocation2 + $0x520] sm:$0xff] }
 0x157   :  { %v5260_v21 = vpop.eup %5259  ;;  %4148 = vst.msk [vmem:[#allocation7 + $0x258] sm:$0xff] %vm4072_vm0, %v3859_v15  ;;  %v3858_v22 = vmul.f32 %v2717_v18, %v2130_v12  ;;  %3036 = vperm.xlu0 %4673, %v5240_v52   ;;  %5279 = vrcp.f32 %v1339_v16  ;;  %v1341_v23 = vadd.f32 1.0, %v5258_v17  ;;  %v2137_v52 = vld [vmem:[#allocation5 + $0x288] sm:$0xff]  ;;  %v4542_v12 = vmul.f32 -1.442695, %v203_v0  ;;  %v2138_v16 = vld [vmem:[#allocation5 + $0x290] sm:$0xff] }
 0x158   :  { %v5262_v24 = vpop.eup %5261  ;;  %v2732_v25 = vpop.permute.xlu1 %2731  ;;  %5281 = vrcp.f32 %v1338_v20  ;;  %v1340_v27 = vadd.f32 1.0, %v5260_v21  ;;  %v4541_v17 = vmul.f32 -1.442695, %v202_v4  ;;  %v207_v18 = vld [vmem:[#allocation2 + $0x538] sm:$0xff]  ;;  %v4544_v21 = vmul.f32 -1.442695, %v205_v9 }
 0x159   :  { %v5264_v28 = vpop.eup %5263  ;;  %4147 = vst.msk [vmem:[#allocation7 + $0x250] sm:$0xff] %vm4072_vm0, %v3858_v22  ;;  %v3861_v29 = vmul.f32 %v2732_v25, %v2133_v19  ;;  %3051 = vperm.xlu1 %4674, %v5242_v55   ;;  %5283 = vrcp.f32 %v1341_v23  ;;  %v1343_v30 = vadd.f32 1.0, %v5262_v24  ;;  %v201_v55 = vld [vmem:[#allocation2 + $0x508] sm:$0xff]  ;;  %v206_v22 = vld [vmem:[#allocation2 + $0x530] sm:$0xff] }
 0x15a   :  { %v5266_v31 = vpop.eup %5265  ;;  %v2727_v32 = vpop.permute.xlu0 %2726  ;;  %5285 = vrcp.f32 %v1340_v27  ;;  %v1342_v34 = vadd.f32 1.0, %v5264_v28  ;;  %v4540_v3 = vmul.f32 -1.442695, %v201_v55  ;;  %v2141_v25 = vld [vmem:[#allocation5 + $0x2a8] sm:$0xff]  ;;  %v2146_v9 = vld [vmem:[#allocation5 + $0x2d0] sm:$0xff] }
 0x15b   :  { %v5268_v36 = vpop.eup %5267  ;;  %4150 = vst.msk [vmem:[#allocation7 + $0x268] sm:$0xff] %vm4072_vm0, %v3861_v29  ;;  %v3860_v37 = vmul.f32 %v2727_v32, %v2132_v26  ;;  %3046 = vperm.xlu0 %4673, %v6050_v59   ;;  %5287 = vrcp.f32 %v1343_v30  ;;  %v1345_v38 = vadd.f32 1.0, %v5266_v31  ;;  %v200_v59 = vld [vmem:[#allocation2 + $0x500] sm:$0xff]  ;;  %v4543_v26 = vmul.f32 -1.442695, %v204_v13  ;;  %v209_v27 = vld [vmem:[#allocation2 + $0x548] sm:$0xff] }
 0x15c   :  { %v5270_v40 = vpop.eup %5269  ;;  %v2742_v41 = vpop.permute.xlu1 %2741  ;;  %5289 = vrcp.f32 %v1342_v34  ;;  %v1344_v43 = vadd.f32 1.0, %v5268_v36  ;;  %v4539_v8 = vmul.f32 -1.442695, %v200_v59  ;;  %v4546_v30 = vmul.f32 -1.442695, %v207_v18  ;;  %v2144_v59 = vld [vmem:[#allocation5 + $0x2c0] sm:$0xff] }
 0x15d   :  { %v5272_v45 = vpop.eup %5271  ;;  %4149 = vst.msk [vmem:[#allocation7 + $0x260] sm:$0xff] %vm4072_vm0, %v3860_v37  ;;  %v3863_v46 = vmul.f32 %v2742_v41, %v2135_v33  ;;  %3061 = vperm.xlu1 %4674, %v6053_v62   ;;  %5291 = vrcp.f32 %v1345_v38  ;;  %v1347_v47 = vadd.f32 1.0, %v5270_v40  ;;  %v2136_v62 = vld [vmem:[#allocation5 + $0x280] sm:$0xff]  ;;  %v4545_v34 = vmul.f32 -1.442695, %v206_v22  ;;  %v2143_v40 = vld [vmem:[#allocation5 + $0x2b8] sm:$0xff] }
 0x15e   :  { %v5274_v50 = vpop.eup %5273  ;;  %v2737_v51 = vpop.permute.xlu0 %2736  ;;  %5293 = vrcp.f32 %v1344_v43  ;;  %v1346_v53 = vadd.f32 1.0, %v5272_v45  ;;  %v2140_v33 = vld [vmem:[#allocation5 + $0x2a0] sm:$0xff]  ;;  %v4548_v37 = vmul.f32 -1.442695, %v209_v27  ;;  %v2142_v45 = vld [vmem:[#allocation5 + $0x2b0] sm:$0xff]  ;;  %v2149_v18 = vld [vmem:[#allocation5 + $0x2e8] sm:$0xff] }
 0x15f   :  { %v5276_v56 = vpop.eup %5275  ;;  %4152 = vst.msk [vmem:[#allocation7 + $0x278] sm:$0xff] %vm4072_vm0, %v3863_v46  ;;  %v3862_v57 = vmul.f32 %v2737_v51, %v2134_v42  ;;  %3056 = vperm.xlu0 %4673, %v5274_v50   ;;  %5295 = vrcp.f32 %v1347_v47 }
 0x160   :  { %v5278_v60 = vpop.eup %5277  ;;  %v2752_v61 = vpop.permute.xlu1 %2751  ;;  %5297 = vrcp.f32 %v1346_v53 }
 0x161   :  { %v5280_v1 = vpop.eup %5279  ;;  %4151 = vst.msk [vmem:[#allocation7 + $0x270] sm:$0xff] %vm4072_vm0, %v3862_v57  ;;  %v3865_v2 = vmul.f32 %v2752_v61, %v2137_v52  ;;  %3071 = vperm.xlu1 %4674, %v5276_v56   ;;  %5299 = vpow2.f32 %v4536_v48  ;;  %v2145_v52 = vld [vmem:[#allocation5 + $0x2c8] sm:$0xff] }
 0x162   :  { %v5282_v5 = vpop.eup %5281  ;;  %v2747_v6 = vpop.permute.xlu0 %2746  ;;  %5301 = vpow2.f32 %v4535_v54 }
 0x163   :  { %v5284_v10 = vpop.eup %5283  ;;  %4154 = vst.msk [vmem:[#allocation7 + $0x288] sm:$0xff] %vm4072_vm0, %v3865_v2  ;;  %v3864_v11 = vmul.f32 %v2747_v6, %v2136_v62  ;;  %3066 = vperm.xlu0 %4673, %v5278_v60   ;;  %5303 = vpow2.f32 %v4538_v58  ;;  %v2147_v2 = vld [vmem:[#allocation5 + $0x2d8] sm:$0xff] }
 0x164   :  { %v5286_v14 = vpop.eup %5285  ;;  %v2762_v15 = vpop.permute.xlu1 %2761  ;;  %5305 = vpow2.f32 %v4537_v63 }
 0x165   :  { %v5288_v19 = vpop.eup %5287  ;;  %4153 = vst.msk [vmem:[#allocation7 + $0x280] sm:$0xff] %vm4072_vm0, %v3864_v11  ;;  %v3867_v20 = vmul.f32 %v2762_v15, %v2139_v7  ;;  %3081 = vperm.xlu1 %4674, %v5280_v1   ;;  %5307 = vpow2.f32 %v4540_v3  ;;  %v208_v11 = vld [vmem:[#allocation2 + $0x540] sm:$0xff]  ;;  %v211_v15 = vld [vmem:[#allocation2 + $0x558] sm:$0xff] }
 0x166   :  { %v5290_v23 = vpop.eup %5289  ;;  %v2757_v24 = vpop.permute.xlu0 %2756  ;;  %5309 = vpow2.f32 %v4539_v8 }
 0x167   :  { %v5292_v28 = vpop.eup %5291  ;;  %4156 = vst.msk [vmem:[#allocation7 + $0x298] sm:$0xff] %vm4072_vm0, %v3867_v20  ;;  %v3866_v29 = vmul.f32 %v2757_v24, %v2138_v16  ;;  %3076 = vperm.xlu0 %4673, %v5282_v5   ;;  %5311 = vpow2.f32 %v4542_v12  ;;  %v210_v20 = vld [vmem:[#allocation2 + $0x550] sm:$0xff]  ;;  %v4547_v24 = vmul.f32 -1.442695, %v208_v11 }
 0x168   :  { %v5294_v31 = vpop.eup %5293  ;;  %v2772_v32 = vpop.permute.xlu1 %2771  ;;  %5313 = vpow2.f32 %v4541_v17 }
 0x169   :  { %v6069_v35 = vpop.eup %5295  ;;  %4155 = vst.msk [vmem:[#allocation7 + $0x290] sm:$0xff] %vm4072_vm0, %v3866_v29  ;;  %v3869_v36 = vmul.f32 %v2772_v32, %v2141_v25  ;;  %3091 = vperm.xlu1 %4674, %v5284_v10   ;;  %5315 = vpow2.f32 %v4544_v21  ;;  %v213_v25 = vld [vmem:[#allocation2 + $0x568] sm:$0xff] }
 0x16a   :  { %v6072_v38 = vpop.eup %5297  ;;  %v2767_v39 = vpop.permute.xlu0 %2766  ;;  %5317 = vpow2.f32 %v4543_v26 }
 0x16b   :  { %v5300_v41 = vpop.eup %5299  ;;  %4158 = vst.msk [vmem:[#allocation7 + $0x2a8] sm:$0xff] %vm4072_vm0, %v3869_v36  ;;  %v3868_v42 = vmul.f32 %v2767_v39, %v2140_v33  ;;  %3086 = vperm.xlu0 %4673, %v5286_v14   ;;  %5319 = vpow2.f32 %v4546_v30  ;;  %v4550_v30 = vmul.f32 -1.442695, %v211_v15  ;;  %v4552_v39 = vmul.f32 -1.442695, %v213_v25 }
 0x16c   :  { %v5302_v43 = vpop.eup %5301  ;;  %v2782_v44 = vpop.permute.xlu1 %2781  ;;  %v1349_v46 = vadd.f32 1.0, %v5300_v41  ;;  %5321 = vpow2.f32 %v4545_v34  ;;  %v4549_v34 = vmul.f32 -1.442695, %v210_v20 }
 0x16d   :  { %v5304_v47 = vpop.eup %5303  ;;  %4157 = vst.msk [vmem:[#allocation7 + $0x2a0] sm:$0xff] %vm4072_vm0, %v3868_v42  ;;  %v3871_v48 = vmul.f32 %v2782_v44, %v2143_v40  ;;  %3101 = vperm.xlu1 %4674, %v5288_v19   ;;  %v1348_v49 = vadd.f32 1.0, %v5302_v43  ;;  %5323 = vpow2.f32 %v4548_v37  ;;  %v214_v40 = vld [vmem:[#allocation2 + $0x570] sm:$0xff]  ;;  %v217_v44 = vld [vmem:[#allocation2 + $0x588] sm:$0xff] }
 0x16e   :  { %v5306_v50 = vpop.eup %5305  ;;  %v2777_v51 = vpop.permute.xlu0 %2776  ;;  %5325 = vrcp.f32 %v1349_v46  ;;  %v1351_v53 = vadd.f32 1.0, %v5304_v47  ;;  %v2150_v47 = vld [vmem:[#allocation5 + $0x2f0] sm:$0xff] }
 0x16f   :  { %v5308_v54 = vpop.eup %5307  ;;  %4160 = vst.msk [vmem:[#allocation7 + $0x2b8] sm:$0xff] %vm4072_vm0, %v3871_v48  ;;  %v3870_v55 = vmul.f32 %v2777_v51, %v2142_v45  ;;  %3096 = vperm.xlu0 %4673, %v5290_v23   ;;  %5327 = vrcp.f32 %v1348_v49  ;;  %v1350_v56 = vadd.f32 1.0, %v5306_v50  ;;  %v216_v49 = vld [vmem:[#allocation2 + $0x580] sm:$0xff] }
 0x170   :  { %v5310_v57 = vpop.eup %5309  ;;  %v2792_v58 = vpop.permute.xlu1 %2791  ;;  %5329 = vrcp.f32 %v1351_v53  ;;  %v1353_v60 = vadd.f32 1.0, %v5308_v54  ;;  %v219_v53 = vld [vmem:[#allocation2 + $0x598] sm:$0xff] }
 0x171   :  { %v5312_v61 = vpop.eup %5311  ;;  %4159 = vst.msk [vmem:[#allocation7 + $0x2b0] sm:$0xff] %vm4072_vm0, %v3870_v55  ;;  %v3873_v62 = vmul.f32 %v2792_v58, %v2145_v52  ;;  %3111 = vperm.xlu1 %4674, %v5292_v28   ;;  %5331 = vrcp.f32 %v1350_v56  ;;  %v1352_v63 = vadd.f32 1.0, %v5310_v57  ;;  %v2148_v28 = vld [vmem:[#allocation5 + $0x2e0] sm:$0xff]  ;;  %v4553_v52 = vmul.f32 -1.442695, %v214_v40  ;;  %v2153_v56 = vld [vmem:[#allocation5 + $0x308] sm:$0xff] }
 0x172   :  { %v5314_v0 = vpop.eup %5313  ;;  %v2787_v1 = vpop.permute.xlu0 %2786  ;;  %5333 = vrcp.f32 %v1353_v60  ;;  %v1355_v3 = vadd.f32 1.0, %v5312_v61  ;;  %v4556_v57 = vmul.f32 -1.442695, %v217_v44  ;;  %v218_v58 = vld [vmem:[#allocation2 + $0x590] sm:$0xff]  ;;  %v4555_v61 = vmul.f32 -1.442695, %v216_v49 }
 0x173   :  { %v5316_v4 = vpop.eup %5315  ;;  %4162 = vst.msk [vmem:[#allocation7 + $0x2c8] sm:$0xff] %vm4072_vm0, %v3873_v62  ;;  %v3872_v5 = vmul.f32 %v2787_v1, %v2144_v59  ;;  %3106 = vperm.xlu0 %4673, %v5294_v31   ;;  %5335 = vrcp.f32 %v1352_v63  ;;  %v1354_v6 = vadd.f32 1.0, %v5314_v0  ;;  %v212_v31 = vld [vmem:[#allocation2 + $0x560] sm:$0xff]  ;;  %v221_v62 = vld [vmem:[#allocation2 + $0x5a8] sm:$0xff] }
 0x174   :  { %v5318_v7 = vpop.eup %5317  ;;  %v2802_v8 = vpop.permute.xlu1 %2801  ;;  %5337 = vrcp.f32 %v1355_v3  ;;  %v1357_v10 = vadd.f32 1.0, %v5316_v4  ;;  %v4551_v43 = vmul.f32 -1.442695, %v212_v31  ;;  %v2152_v1 = vld [vmem:[#allocation5 + $0x300] sm:$0xff]  ;;  %v2161_v49 = vld [vmem:[#allocation5 + $0x348] sm:$0xff] }
 0x175   :  { %v5320_v12 = vpop.eup %5319  ;;  %4161 = vst.msk [vmem:[#allocation7 + $0x2c0] sm:$0xff] %vm4072_vm0, %v3872_v5  ;;  %v3875_v13 = vmul.f32 %v2802_v8, %v2147_v2  ;;  %3121 = vperm.xlu1 %4674, %v6069_v35   ;;  %5339 = vrcp.f32 %v1354_v6  ;;  %v1356_v14 = vadd.f32 1.0, %v5318_v7  ;;  %v215_v35 = vld [vmem:[#allocation2 + $0x578] sm:$0xff]  ;;  %v4558_v2 = vmul.f32 -1.442695, %v219_v53  ;;  %v220_v3 = vld [vmem:[#allocation2 + $0x5a0] sm:$0xff] }
 0x176   :  { %v5322_v16 = vpop.eup %5321  ;;  %v2797_v17 = vpop.permute.xlu0 %2796  ;;  %5341 = vrcp.f32 %v1357_v10  ;;  %v1359_v19 = vadd.f32 1.0, %v5320_v12  ;;  %v4554_v48 = vmul.f32 -1.442695, %v215_v35  ;;  %v4557_v6 = vmul.f32 -1.442695, %v218_v58  ;;  %v2159_v35 = vld [vmem:[#allocation5 + $0x338] sm:$0xff] }
 0x177   :  { %v5324_v21 = vpop.eup %5323  ;;  %4164 = vst.msk [vmem:[#allocation7 + $0x2d8] sm:$0xff] %vm4072_vm0, %v3875_v13  ;;  %v3874_v22 = vmul.f32 %v2797_v17, %v2146_v9  ;;  %3116 = vperm.xlu0 %4673, %v6072_v38   ;;  %5343 = vrcp.f32 %v1356_v14  ;;  %v1358_v23 = vadd.f32 1.0, %v5322_v16  ;;  %v2151_v38 = vld [vmem:[#allocation5 + $0x2f8] sm:$0xff]  ;;  %v4560_v10 = vmul.f32 -1.442695, %v221_v62  ;;  %v2154_v16 = vld [vmem:[#allocation5 + $0x310] sm:$0xff] }
 0x178   :  { %v5326_v26 = vpop.eup %5325  ;;  %v2812_v27 = vpop.permute.xlu1 %2811  ;;  %5345 = vrcp.f32 %v1359_v19  ;;  %v1361_v29 = vadd.f32 1.0, %v5324_v21  ;;  %v2155_v9 = vld [vmem:[#allocation5 + $0x318] sm:$0xff]  ;;  %v4559_v13 = vmul.f32 -1.442695, %v220_v3  ;;  %v2157_v21 = vld [vmem:[#allocation5 + $0x328] sm:$0xff]  ;;  %v2160_v58 = vld [vmem:[#allocation5 + $0x340] sm:$0xff] }
 0x179   :  { %v5328_v32 = vpop.eup %5327  ;;  %4163 = vst.msk [vmem:[#allocation7 + $0x2d0] sm:$0xff] %vm4072_vm0, %v3874_v22  ;;  %v3877_v33 = vmul.f32 %v2812_v27, %v2149_v18  ;;  %3131 = vperm.xlu1 %4674, %v5326_v26   ;;  %5347 = vrcp.f32 %v1358_v23 }
 0x17a   :  { %v5330_v36 = vpop.eup %5329  ;;  %v2807_v37 = vpop.permute.xlu0 %2806  ;;  %5349 = vrcp.f32 %v1361_v29 }
 0x17b   :  { %v5332_v41 = vpop.eup %5331  ;;  %4166 = vst.msk [vmem:[#allocation7 + $0x2e8] sm:$0xff] %vm4072_vm0, %v3877_v33  ;;  %v3876_v42 = vmul.f32 %v2807_v37, %v2148_v28  ;;  %3126 = vperm.xlu0 %4673, %v5328_v32   ;;  %5351 = vpow2.f32 %v4547_v24  ;;  %v2156_v28 = vld [vmem:[#allocation5 + $0x320] sm:$0xff] }
 0x17c   :  { %v5334_v45 = vpop.eup %5333  ;;  %v2822_v46 = vpop.permute.xlu1 %2821  ;;  %5353 = vpow2.f32 %v4550_v30 }
 0x17d   :  { %v5336_v50 = vpop.eup %5335  ;;  %4165 = vst.msk [vmem:[#allocation7 + $0x2e0] sm:$0xff] %vm4072_vm0, %v3876_v42  ;;  %v3879_v51 = vmul.f32 %v2822_v46, %v2151_v38  ;;  %3141 = vperm.xlu1 %4674, %v5330_v36   ;;  %5355 = vpow2.f32 %v4549_v34  ;;  %v2158_v42 = vld [vmem:[#allocation5 + $0x330] sm:$0xff] }
 0x17e   :  { %v5338_v54 = vpop.eup %5337  ;;  %v2817_v55 = vpop.permute.xlu0 %2816  ;;  %5357 = vpow2.f32 %v4552_v39 }
 0x17f   :  { %v5340_v59 = vpop.eup %5339  ;;  %4168 = vst.msk [vmem:[#allocation7 + $0x2f8] sm:$0xff] %vm4072_vm0, %v3879_v51  ;;  %v3878_v60 = vmul.f32 %v2817_v55, %v2150_v47  ;;  %3136 = vperm.xlu0 %4673, %v5332_v41   ;;  %5359 = vpow2.f32 %v4551_v43  ;;  %v223_v51 = vld [vmem:[#allocation2 + $0x5b8] sm:$0xff]  ;;  %v222_v55 = vld [vmem:[#allocation2 + $0x5b0] sm:$0xff] }
 0x180   :  { %v5342_v63 = vpop.eup %5341  ;;  %v2832_v0 = vpop.permute.xlu1 %2831  ;;  %5361 = vpow2.f32 %v4554_v48 }
 0x181   :  { %v5344_v4 = vpop.eup %5343  ;;  %4167 = vst.msk [vmem:[#allocation7 + $0x2f0] sm:$0xff] %vm4072_vm0, %v3878_v60  ;;  %v3881_v5 = vmul.f32 %v2832_v0, %v2153_v56  ;;  %3151 = vperm.xlu1 %4674, %v5334_v45   ;;  %5363 = vpow2.f32 %v4553_v52  ;;  %v225_v60 = vld [vmem:[#allocation2 + $0x5c8] sm:$0xff]  ;;  %v4562_v0 = vmul.f32 -1.442695, %v223_v51 }
 0x182   :  { %v5346_v7 = vpop.eup %5345  ;;  %v2827_v8 = vpop.permute.xlu0 %2826  ;;  %5365 = vpow2.f32 %v4556_v57 }
 0x183   :  { %v6088_v11 = vpop.eup %5347  ;;  %4170 = vst.msk [vmem:[#allocation7 + $0x308] sm:$0xff] %vm4072_vm0, %v3881_v5  ;;  %v3880_v12 = vmul.f32 %v2827_v8, %v2152_v1  ;;  %3146 = vperm.xlu0 %4673, %v5336_v50   ;;  %5367 = vpow2.f32 %v4555_v61  ;;  %v224_v1 = vld [vmem:[#allocation2 + $0x5c0] sm:$0xff] }
 0x184   :  { %v6091_v14 = vpop.eup %5349  ;;  %v2842_v15 = vpop.permute.xlu1 %2841  ;;  %5369 = vpow2.f32 %v4558_v2 }
 0x185   :  { %v5352_v17 = vpop.eup %5351  ;;  %4169 = vst.msk [vmem:[#allocation7 + $0x300] sm:$0xff] %vm4072_vm0, %v3880_v12  ;;  %v3883_v18 = vmul.f32 %v2842_v15, %v2155_v9  ;;  %3161 = vperm.xlu1 %4674, %v5338_v54   ;;  %5371 = vpow2.f32 %v4557_v6  ;;  %v4561_v6 = vmul.f32 -1.442695, %v222_v55  ;;  %v4563_v15 = vmul.f32 -1.442695, %v224_v1 }
 0x186   :  { %v5354_v19 = vpop.eup %5353  ;;  %v2837_v20 = vpop.permute.xlu0 %2836  ;;  %v1360_v22 = vadd.f32 1.0, %v5352_v17  ;;  %5373 = vpow2.f32 %v4560_v10  ;;  %v4564_v10 = vmul.f32 -1.442695, %v225_v60 }
 0x187   :  { %v5356_v23 = vpop.eup %5355  ;;  %4172 = vst.msk [vmem:[#allocation7 + $0x318] sm:$0xff] %vm4072_vm0, %v3883_v18  ;;  %v3882_v24 = vmul.f32 %v2837_v20, %v2154_v16  ;;  %3156 = vperm.xlu0 %4673, %v5340_v59   ;;  %v1363_v25 = vadd.f32 1.0, %v5354_v19  ;;  %5375 = vpow2.f32 %v4559_v13  ;;  %v229_v16 = vld [vmem:[#allocation2 + $0x5e8] sm:$0xff]  ;;  %v228_v20 = vld [vmem:[#allocation2 + $0x5e0] sm:$0xff] }
 0x188   :  { %v5358_v26 = vpop.eup %5357  ;;  %v2852_v27 = vpop.permute.xlu1 %2851  ;;  %5377 = vrcp.f32 %v1360_v22  ;;  %v1362_v29 = vadd.f32 1.0, %v5356_v23  ;;  %v2165_v23 = vld [vmem:[#allocation5 + $0x368] sm:$0xff] }
 0x189   :  { %v5360_v30 = vpop.eup %5359  ;;  %4171 = vst.msk [vmem:[#allocation7 + $0x310] sm:$0xff] %vm4072_vm0, %v3882_v24  ;;  %v3885_v31 = vmul.f32 %v2852_v27, %v2157_v21  ;;  %3171 = vperm.xlu1 %4674, %v5342_v63   ;;  %5379 = vrcp.f32 %v1363_v25  ;;  %v1365_v32 = vadd.f32 1.0, %v5358_v26  ;;  %v231_v25 = vld [vmem:[#allocation2 + $0x5f8] sm:$0xff] }
 0x18a   :  { %v5362_v33 = vpop.eup %5361  ;;  %v2847_v34 = vpop.permute.xlu0 %2846  ;;  %5381 = vrcp.f32 %v1362_v29  ;;  %v1364_v36 = vadd.f32 1.0, %v5360_v30  ;;  %v230_v29 = vld [vmem:[#allocation2 + $0x5f0] sm:$0xff] }
 0x18b   :  { %v5364_v37 = vpop.eup %5363  ;;  %4174 = vst.msk [vmem:[#allocation7 + $0x328] sm:$0xff] %vm4072_vm0, %v3885_v31  ;;  %v3884_v38 = vmul.f32 %v2847_v34, %v2156_v28  ;;  %3166 = vperm.xlu0 %4673, %v5344_v4   ;;  %5383 = vrcp.f32 %v1365_v32  ;;  %v1367_v39 = vadd.f32 1.0, %v5362_v33  ;;  %v2163_v4 = vld [vmem:[#allocation5 + $0x358] sm:$0xff]  ;;  %v4568_v28 = vmul.f32 -1.442695, %v229_v16  ;;  %v2164_v32 = vld [vmem:[#allocation5 + $0x360] sm:$0xff] }
 0x18c   :  { %v5366_v40 = vpop.eup %5365  ;;  %v2862_v41 = vpop.permute.xlu1 %2861  ;;  %5385 = vrcp.f32 %v1364_v36  ;;  %v1366_v43 = vadd.f32 1.0, %v5364_v37  ;;  %v4567_v33 = vmul.f32 -1.442695, %v228_v20  ;;  %v233_v34 = vld [vmem:[#allocation2 + $0x608] sm:$0xff]  ;;  %v4570_v37 = vmul.f32 -1.442695, %v231_v25 }
 0x18d   :  { %v5368_v44 = vpop.eup %5367  ;;  %4173 = vst.msk [vmem:[#allocation7 + $0x320] sm:$0xff] %vm4072_vm0, %v3884_v38  ;;  %v3887_v45 = vmul.f32 %v2862_v41, %v2159_v35  ;;  %3181 = vperm.xlu1 %4674, %v5346_v7   ;;  %5387 = vrcp.f32 %v1367_v39  ;;  %v1369_v46 = vadd.f32 1.0, %v5366_v40  ;;  %v227_v7 = vld [vmem:[#allocation2 + $0x5d8] sm:$0xff]  ;;  %v232_v38 = vld [vmem:[#allocation2 + $0x600] sm:$0xff] }
 0x18e   :  { %v5370_v47 = vpop.eup %5369  ;;  %v2857_v48 = vpop.permute.xlu0 %2856  ;;  %5389 = vrcp.f32 %v1366_v43  ;;  %v1368_v50 = vadd.f32 1.0, %v5368_v44  ;;  %v4566_v19 = vmul.f32 -1.442695, %v227_v7  ;;  %v2167_v41 = vld [vmem:[#allocation5 + $0x378] sm:$0xff]  ;;  %v2172_v25 = vld [vmem:[#allocation5 + $0x3a0] sm:$0xff] }
 0x18f   :  { %v5372_v52 = vpop.eup %5371  ;;  %4176 = vst.msk [vmem:[#allocation7 + $0x338] sm:$0xff] %vm4072_vm0, %v3887_v45  ;;  %v3886_v53 = vmul.f32 %v2857_v48, %v2158_v42  ;;  %3176 = vperm.xlu0 %4673, %v6088_v11   ;;  %5391 = vrcp.f32 %v1369_v46  ;;  %v1371_v54 = vadd.f32 1.0, %v5370_v47  ;;  %v226_v11 = vld [vmem:[#allocation2 + $0x5d0] sm:$0xff]  ;;  %v4569_v42 = vmul.f32 -1.442695, %v230_v29  ;;  %v235_v43 = vld [vmem:[#allocation2 + $0x618] sm:$0xff] }
 0x190   :  { %v5374_v56 = vpop.eup %5373  ;;  %v2872_v57 = vpop.permute.xlu1 %2871  ;;  %5393 = vrcp.f32 %v1368_v50  ;;  %v1370_v59 = vadd.f32 1.0, %v5372_v52  ;;  %v4565_v24 = vmul.f32 -1.442695, %v226_v11  ;;  %v4572_v46 = vmul.f32 -1.442695, %v233_v34  ;;  %v2170_v11 = vld [vmem:[#allocation5 + $0x390] sm:$0xff] }
 0x191   :  { %v5376_v61 = vpop.eup %5375  ;;  %4175 = vst.msk [vmem:[#allocation7 + $0x330] sm:$0xff] %vm4072_vm0, %v3886_v53  ;;  %v3889_v62 = vmul.f32 %v2872_v57, %v2161_v49  ;;  %3191 = vperm.xlu1 %4674, %v6091_v14   ;;  %5395 = vrcp.f32 %v1371_v54  ;;  %v1373_v63 = vadd.f32 1.0, %v5374_v56  ;;  %v2162_v14 = vld [vmem:[#allocation5 + $0x350] sm:$0xff]  ;;  %v4571_v50 = vmul.f32 -1.442695, %v232_v38  ;;  %v2169_v56 = vld [vmem:[#allocation5 + $0x388] sm:$0xff] }
 0x192   :  { %v5378_v2 = vpop.eup %5377  ;;  %v2867_v3 = vpop.permute.xlu0 %2866  ;;  %5397 = vrcp.f32 %v1370_v59  ;;  %v1372_v5 = vadd.f32 1.0, %v5376_v61  ;;  %v2166_v49 = vld [vmem:[#allocation5 + $0x370] sm:$0xff]  ;;  %v4574_v53 = vmul.f32 -1.442695, %v235_v43  ;;  %v2168_v61 = vld [vmem:[#allocation5 + $0x380] sm:$0xff]  ;;  %v2175_v34 = vld [vmem:[#allocation5 + $0x3b8] sm:$0xff] }
 0x193   :  { %v5380_v8 = vpop.eup %5379  ;;  %4178 = vst.msk [vmem:[#allocation7 + $0x348] sm:$0xff] %vm4072_vm0, %v3889_v62  ;;  %v3888_v9 = vmul.f32 %v2867_v3, %v2160_v58  ;;  %3186 = vperm.xlu0 %4673, %v5378_v2   ;;  %5399 = vrcp.f32 %v1373_v63 }
 0x194   :  { %v5382_v12 = vpop.eup %5381  ;;  %v2882_v13 = vpop.permute.xlu1 %2881  ;;  %5401 = vrcp.f32 %v1372_v5 }
 0x195   :  { %v5384_v17 = vpop.eup %5383  ;;  %4177 = vst.msk [vmem:[#allocation7 + $0x340] sm:$0xff] %vm4072_vm0, %v3888_v9  ;;  %v3891_v18 = vmul.f32 %v2882_v13, %v2163_v4  ;;  %3201 = vperm.xlu1 %4674, %v5380_v8   ;;  %5403 = vpow2.f32 %v4562_v0  ;;  %v2171_v4 = vld [vmem:[#allocation5 + $0x398] sm:$0xff] }
 0x196   :  { %v5386_v21 = vpop.eup %5385  ;;  %v2877_v22 = vpop.permute.xlu0 %2876  ;;  %5405 = vpow2.f32 %v4561_v6 }
 0x197   :  { %v5388_v26 = vpop.eup %5387  ;;  %4180 = vst.msk [vmem:[#allocation7 + $0x358] sm:$0xff] %vm4072_vm0, %v3891_v18  ;;  %v3890_v27 = vmul.f32 %v2877_v22, %v2162_v14  ;;  %3196 = vperm.xlu0 %4673, %v5382_v12   ;;  %5407 = vpow2.f32 %v4564_v10  ;;  %v2173_v18 = vld [vmem:[#allocation5 + $0x3a8] sm:$0xff] }
 0x198   :  { %v5390_v30 = vpop.eup %5389  ;;  %v2892_v31 = vpop.permute.xlu1 %2891  ;;  %5409 = vpow2.f32 %v4563_v15 }
 0x199   :  { %v5392_v35 = vpop.eup %5391  ;;  %4179 = vst.msk [vmem:[#allocation7 + $0x350] sm:$0xff] %vm4072_vm0, %v3890_v27  ;;  %v3893_v36 = vmul.f32 %v2892_v31, %v2165_v23  ;;  %3211 = vperm.xlu1 %4674, %v5384_v17   ;;  %5411 = vpow2.f32 %v4566_v19  ;;  %v234_v27 = vld [vmem:[#allocation2 + $0x610] sm:$0xff]  ;;  %v237_v31 = vld [vmem:[#allocation2 + $0x628] sm:$0xff] }
 0x19a   :  { %v5394_v39 = vpop.eup %5393  ;;  %v2887_v40 = vpop.permute.xlu0 %2886  ;;  %5413 = vpow2.f32 %v4565_v24 }
 0x19b   :  { %v5396_v44 = vpop.eup %5395  ;;  %4182 = vst.msk [vmem:[#allocation7 + $0x368] sm:$0xff] %vm4072_vm0, %v3893_v36  ;;  %v3892_v45 = vmul.f32 %v2887_v40, %v2164_v32  ;;  %3206 = vperm.xlu0 %4673, %v5386_v21   ;;  %5415 = vpow2.f32 %v4568_v28  ;;  %v236_v36 = vld [vmem:[#allocation2 + $0x620] sm:$0xff]  ;;  %v4573_v40 = vmul.f32 -1.442695, %v234_v27 }
 0x19c   :  { %v5398_v47 = vpop.eup %5397  ;;  %v2902_v48 = vpop.permute.xlu1 %2901  ;;  %5417 = vpow2.f32 %v4567_v33 }
 0x19d   :  { %v6107_v51 = vpop.eup %5399  ;;  %4181 = vst.msk [vmem:[#allocation7 + $0x360] sm:$0xff] %vm4072_vm0, %v3892_v45  ;;  %v3895_v52 = vmul.f32 %v2902_v48, %v2167_v41  ;;  %3221 = vperm.xlu1 %4674, %v5388_v26   ;;  %5419 = vpow2.f32 %v4570_v37  ;;  %v239_v41 = vld [vmem:[#allocation2 + $0x638] sm:$0xff] }
 0x19e   :  { %v6110_v54 = vpop.eup %5401  ;;  %v2897_v55 = vpop.permute.xlu0 %2896  ;;  %5421 = vpow2.f32 %v4569_v42 }
 0x19f   :  { %v5404_v57 = vpop.eup %5403  ;;  %4184 = vst.msk [vmem:[#allocation7 + $0x378] sm:$0xff] %vm4072_vm0, %v3895_v52  ;;  %v3894_v58 = vmul.f32 %v2897_v55, %v2166_v49  ;;  %3216 = vperm.xlu0 %4673, %v5390_v30   ;;  %5423 = vpow2.f32 %v4572_v46  ;;  %v4576_v46 = vmul.f32 -1.442695, %v237_v31  ;;  %v4578_v55 = vmul.f32 -1.442695, %v239_v41 }
 0x1a0   :  { %v5406_v59 = vpop.eup %5405  ;;  %v2912_v60 = vpop.permute.xlu1 %2911  ;;  %v1375_v62 = vadd.f32 1.0, %v5404_v57  ;;  %5425 = vpow2.f32 %v4571_v50  ;;  %v4575_v50 = vmul.f32 -1.442695, %v236_v36 }
 0x1a1   :  { %v5408_v63 = vpop.eup %5407  ;;  %4183 = vst.msk [vmem:[#allocation7 + $0x370] sm:$0xff] %vm4072_vm0, %v3894_v58  ;;  %v3897_v0 = vmul.f32 %v2912_v60, %v2169_v56  ;;  %3231 = vperm.xlu1 %4674, %v5392_v35   ;;  %v1374_v1 = vadd.f32 1.0, %v5406_v59  ;;  %5427 = vpow2.f32 %v4574_v53  ;;  %v240_v56 = vld [vmem:[#allocation2 + $0x640] sm:$0xff]  ;;  %v243_v60 = vld [vmem:[#allocation2 + $0x658] sm:$0xff] }
 0x1a2   :  { %v5410_v2 = vpop.eup %5409  ;;  %v2907_v3 = vpop.permute.xlu0 %2906  ;;  %5429 = vrcp.f32 %v1375_v62  ;;  %v1377_v5 = vadd.f32 1.0, %v5408_v63  ;;  %v2176_v63 = vld [vmem:[#allocation5 + $0x3c0] sm:$0xff] }
 0x1a3   :  { %v5412_v6 = vpop.eup %5411  ;;  %4186 = vst.msk [vmem:[#allocation7 + $0x388] sm:$0xff] %vm4072_vm0, %v3897_v0  ;;  %v3896_v7 = vmul.f32 %v2907_v3, %v2168_v61  ;;  %3226 = vperm.xlu0 %4673, %v5394_v39   ;;  %5431 = vrcp.f32 %v1374_v1  ;;  %v1376_v8 = vadd.f32 1.0, %v5410_v2  ;;  %v242_v1 = vld [vmem:[#allocation2 + $0x650] sm:$0xff] }
 0x1a4   :  { %v5414_v9 = vpop.eup %5413  ;;  %v2922_v10 = vpop.permute.xlu1 %2921  ;;  %5433 = vrcp.f32 %v1377_v5  ;;  %v1379_v12 = vadd.f32 1.0, %v5412_v6  ;;  %v245_v5 = vld [vmem:[#allocation2 + $0x668] sm:$0xff] }
 0x1a5   :  { %v5416_v13 = vpop.eup %5415  ;;  %4185 = vst.msk [vmem:[#allocation7 + $0x380] sm:$0xff] %vm4072_vm0, %v3896_v7  ;;  %v3899_v14 = vmul.f32 %v2922_v10, %v2171_v4  ;;  %3241 = vperm.xlu1 %4674, %v5396_v44   ;;  %5435 = vrcp.f32 %v1376_v8  ;;  %v1378_v15 = vadd.f32 1.0, %v5414_v9  ;;  %v2174_v44 = vld [vmem:[#allocation5 + $0x3b0] sm:$0xff]  ;;  %v4579_v4 = vmul.f32 -1.442695, %v240_v56  ;;  %v2179_v8 = vld [vmem:[#allocation5 + $0x3d8] sm:$0xff] }
 0x1a6   :  { %v5418_v16 = vpop.eup %5417  ;;  %v2917_v17 = vpop.permute.xlu0 %2916  ;;  %5437 = vrcp.f32 %v1379_v12  ;;  %v1381_v19 = vadd.f32 1.0, %v5416_v13  ;;  %v4582_v9 = vmul.f32 -1.442695, %v243_v60  ;;  %v244_v10 = vld [vmem:[#allocation2 + $0x660] sm:$0xff]  ;;  %v4581_v13 = vmul.f32 -1.442695, %v242_v1 }
 0x1a7   :  { %v5420_v20 = vpop.eup %5419  ;;  %4188 = vst.msk [vmem:[#allocation7 + $0x398] sm:$0xff] %vm4072_vm0, %v3899_v14  ;;  %v3898_v21 = vmul.f32 %v2917_v17, %v2170_v11  ;;  %3236 = vperm.xlu0 %4673, %v5398_v47   ;;  %5439 = vrcp.f32 %v1378_v15  ;;  %v1380_v22 = vadd.f32 1.0, %v5418_v16  ;;  %v238_v47 = vld [vmem:[#allocation2 + $0x630] sm:$0xff]  ;;  %v247_v14 = vld [vmem:[#allocation2 + $0x678] sm:$0xff] }
 0x1a8   :  { %v5422_v23 = vpop.eup %5421  ;;  %v2932_v24 = vpop.permute.xlu1 %2931  ;;  %5441 = vrcp.f32 %v1381_v19  ;;  %v1383_v26 = vadd.f32 1.0, %v5420_v20  ;;  %v4577_v59 = vmul.f32 -1.442695, %v238_v47  ;;  %v2178_v17 = vld [vmem:[#allocation5 + $0x3d0] sm:$0xff]  ;;  %v2187_v1 = vld [vmem:[#allocation5 + $0x418] sm:$0xff] }
 0x1a9   :  { %v5424_v28 = vpop.eup %5423  ;;  %4187 = vst.msk [vmem:[#allocation7 + $0x390] sm:$0xff] %vm4072_vm0, %v3898_v21  ;;  %v3901_v29 = vmul.f32 %v2932_v24, %v2173_v18  ;;  %3251 = vperm.xlu1 %4674, %v6107_v51   ;;  %5443 = vrcp.f32 %v1380_v22  ;;  %v1382_v30 = vadd.f32 1.0, %v5422_v23  ;;  %v241_v51 = vld [vmem:[#allocation2 + $0x648] sm:$0xff]  ;;  %v4584_v18 = vmul.f32 -1.442695, %v245_v5  ;;  %v246_v19 = vld [vmem:[#allocation2 + $0x670] sm:$0xff] }
 0x1aa   :  { %v5426_v32 = vpop.eup %5425  ;;  %v2927_v33 = vpop.permute.xlu0 %2926  ;;  %5445 = vrcp.f32 %v1383_v26  ;;  %v1385_v35 = vadd.f32 1.0, %v5424_v28  ;;  %v4580_v0 = vmul.f32 -1.442695, %v241_v51  ;;  %v4583_v22 = vmul.f32 -1.442695, %v244_v10  ;;  %v2185_v51 = vld [vmem:[#allocation5 + $0x408] sm:$0xff] }
 0x1ab   :  { %v5428_v37 = vpop.eup %5427  ;;  %4190 = vst.msk [vmem:[#allocation7 + $0x3a8] sm:$0xff] %vm4072_vm0, %v3901_v29  ;;  %v3900_v38 = vmul.f32 %v2927_v33, %v2172_v25  ;;  %3246 = vperm.xlu0 %4673, %v6110_v54   ;;  %5447 = vrcp.f32 %v1382_v30  ;;  %v1384_v39 = vadd.f32 1.0, %v5426_v32  ;;  %v2177_v54 = vld [vmem:[#allocation5 + $0x3c8] sm:$0xff]  ;;  %v4586_v26 = vmul.f32 -1.442695, %v247_v14  ;;  %v2180_v32 = vld [vmem:[#allocation5 + $0x3e0] sm:$0xff] }
 0x1ac   :  { %v5430_v42 = vpop.eup %5429  ;;  %v2942_v43 = vpop.permute.xlu1 %2941  ;;  %5449 = vrcp.f32 %v1385_v35  ;;  %v1387_v45 = vadd.f32 1.0, %v5428_v37  ;;  %v2181_v25 = vld [vmem:[#allocation5 + $0x3e8] sm:$0xff]  ;;  %v4585_v29 = vmul.f32 -1.442695, %v246_v19  ;;  %v2183_v37 = vld [vmem:[#allocation5 + $0x3f8] sm:$0xff]  ;;  %v2186_v10 = vld [vmem:[#allocation5 + $0x410] sm:$0xff] }
 0x1ad   :  { %v5432_v48 = vpop.eup %5431  ;;  %4189 = vst.msk [vmem:[#allocation7 + $0x3a0] sm:$0xff] %vm4072_vm0, %v3900_v38  ;;  %v3903_v49 = vmul.f32 %v2942_v43, %v2175_v34  ;;  %3261 = vperm.xlu1 %4674, %v5430_v42   ;;  %5451 = vrcp.f32 %v1384_v39 }
 0x1ae   :  { %v5434_v52 = vpop.eup %5433  ;;  %v2937_v53 = vpop.permute.xlu0 %2936  ;;  %5453 = vrcp.f32 %v1387_v45 }
 0x1af   :  { %v5436_v57 = vpop.eup %5435  ;;  %4192 = vst.msk [vmem:[#allocation7 + $0x3b8] sm:$0xff] %vm4072_vm0, %v3903_v49  ;;  %v3902_v58 = vmul.f32 %v2937_v53, %v2174_v44  ;;  %3256 = vperm.xlu0 %4673, %v5432_v48   ;;  %5455 = vpow2.f32 %v4573_v40  ;;  %v2182_v44 = vld [vmem:[#allocation5 + $0x3f0] sm:$0xff] }
 0x1b0   :  { %v5438_v61 = vpop.eup %5437  ;;  %v2952_v62 = vpop.permute.xlu1 %2951  ;;  %5457 = vpow2.f32 %v4576_v46 }
 0x1b1   :  { %v5440_v2 = vpop.eup %5439  ;;  %4191 = vst.msk [vmem:[#allocation7 + $0x3b0] sm:$0xff] %vm4072_vm0, %v3902_v58  ;;  %v3905_v3 = vmul.f32 %v2952_v62, %v2177_v54  ;;  %3271 = vperm.xlu1 %4674, %v5434_v52   ;;  %5459 = vpow2.f32 %v4575_v50  ;;  %v2184_v58 = vld [vmem:[#allocation5 + $0x400] sm:$0xff] }
 0x1b2   :  { %v5442_v6 = vpop.eup %5441  ;;  %v2947_v7 = vpop.permute.xlu0 %2946  ;;  %5461 = vpow2.f32 %v4578_v55 }
 0x1b3   :  { %v5444_v11 = vpop.eup %5443  ;;  %4194 = vst.msk [vmem:[#allocation7 + $0x3c8] sm:$0xff] %vm4072_vm0, %v3905_v3  ;;  %v3904_v12 = vmul.f32 %v2947_v7, %v2176_v63  ;;  %3266 = vperm.xlu0 %4673, %v5436_v57   ;;  %5463 = vpow2.f32 %v4577_v59  ;;  %v249_v3 = vld [vmem:[#allocation2 + $0x688] sm:$0xff]  ;;  %v248_v7 = vld [vmem:[#allocation2 + $0x680] sm:$0xff] }
 0x1b4   :  { %v5446_v15 = vpop.eup %5445  ;;  %v2962_v16 = vpop.permute.xlu1 %2961  ;;  %5465 = vpow2.f32 %v4580_v0 }
 0x1b5   :  { %v5448_v20 = vpop.eup %5447  ;;  %4193 = vst.msk [vmem:[#allocation7 + $0x3c0] sm:$0xff] %vm4072_vm0, %v3904_v12  ;;  %v3907_v21 = vmul.f32 %v2962_v16, %v2179_v8  ;;  %3281 = vperm.xlu1 %4674, %v5438_v61   ;;  %5467 = vpow2.f32 %v4579_v4  ;;  %v251_v12 = vld [vmem:[#allocation2 + $0x698] sm:$0xff]  ;;  %v4588_v16 = vmul.f32 -1.442695, %v249_v3 }
 0x1b6   :  { %v5450_v23 = vpop.eup %5449  ;;  %v2957_v24 = vpop.permute.xlu0 %2956  ;;  %5469 = vpow2.f32 %v4582_v9 }
 0x1b7   :  { %v6126_v27 = vpop.eup %5451  ;;  %4196 = vst.msk [vmem:[#allocation7 + $0x3d8] sm:$0xff] %vm4072_vm0, %v3907_v21  ;;  %v3906_v28 = vmul.f32 %v2957_v24, %v2178_v17  ;;  %3276 = vperm.xlu0 %4673, %v5440_v2   ;;  %5471 = vpow2.f32 %v4581_v13  ;;  %v250_v17 = vld [vmem:[#allocation2 + $0x690] sm:$0xff] }
 0x1b8   :  { %v6129_v30 = vpop.eup %5453  ;;  %v2972_v31 = vpop.permute.xlu1 %2971  ;;  %5473 = vpow2.f32 %v4584_v18 }
 0x1b9   :  { %v5456_v33 = vpop.eup %5455  ;;  %4195 = vst.msk [vmem:[#allocation7 + $0x3d0] sm:$0xff] %vm4072_vm0, %v3906_v28  ;;  %v3909_v34 = vmul.f32 %v2972_v31, %v2181_v25  ;;  %3291 = vperm.xlu1 %4674, %v5442_v6   ;;  %5475 = vpow2.f32 %v4583_v22  ;;  %v4587_v22 = vmul.f32 -1.442695, %v248_v7  ;;  %v4589_v31 = vmul.f32 -1.442695, %v250_v17 }
 0x1ba   :  { %v5458_v35 = vpop.eup %5457  ;;  %v2967_v36 = vpop.permute.xlu0 %2966  ;;  %v1386_v38 = vadd.f32 1.0, %v5456_v33  ;;  %5477 = vpow2.f32 %v4586_v26  ;;  %v4590_v26 = vmul.f32 -1.442695, %v251_v12 }
 0x1bb   :  { %v5460_v39 = vpop.eup %5459  ;;  %4198 = vst.msk [vmem:[#allocation7 + $0x3e8] sm:$0xff] %vm4072_vm0, %v3909_v34  ;;  %v3908_v40 = vmul.f32 %v2967_v36, %v2180_v32  ;;  %3286 = vperm.xlu0 %4673, %v5444_v11   ;;  %v1389_v41 = vadd.f32 1.0, %v5458_v35  ;;  %5479 = vpow2.f32 %v4585_v29  ;;  %v255_v32 = vld [vmem:[#allocation2 + $0x6b8] sm:$0xff]  ;;  %v254_v36 = vld [vmem:[#allocation2 + $0x6b0] sm:$0xff] }
 0x1bc   :  { %v5462_v42 = vpop.eup %5461  ;;  %v2982_v43 = vpop.permute.xlu1 %2981  ;;  %5481 = vrcp.f32 %v1386_v38  ;;  %v1388_v45 = vadd.f32 1.0, %v5460_v39  ;;  %v2191_v39 = vld [vmem:[#allocation5 + $0x438] sm:$0xff] }
 0x1bd   :  { %v5464_v46 = vpop.eup %5463  ;;  %4197 = vst.msk [vmem:[#allocation7 + $0x3e0] sm:$0xff] %vm4072_vm0, %v3908_v40  ;;  %v3911_v47 = vmul.f32 %v2982_v43, %v2183_v37  ;;  %3301 = vperm.xlu1 %4674, %v5446_v15   ;;  %5483 = vrcp.f32 %v1389_v41  ;;  %v1391_v48 = vadd.f32 1.0, %v5462_v42  ;;  %v257_v41 = vld [vmem:[#allocation2 + $0x6c8] sm:$0xff] }
 0x1be   :  { %v5466_v49 = vpop.eup %5465  ;;  %v2977_v50 = vpop.permute.xlu0 %2976  ;;  %5485 = vrcp.f32 %v1388_v45  ;;  %v1390_v52 = vadd.f32 1.0, %v5464_v46  ;;  %v256_v45 = vld [vmem:[#allocation2 + $0x6c0] sm:$0xff] }
 0x1bf   :  { %v5468_v53 = vpop.eup %5467  ;;  %4200 = vst.msk [vmem:[#allocation7 + $0x3f8] sm:$0xff] %vm4072_vm0, %v3911_v47  ;;  %v3910_v54 = vmul.f32 %v2977_v50, %v2182_v44  ;;  %3296 = vperm.xlu0 %4673, %v5448_v20   ;;  %5487 = vrcp.f32 %v1391_v48  ;;  %v1393_v55 = vadd.f32 1.0, %v5466_v49  ;;  %v2189_v20 = vld [vmem:[#allocation5 + $0x428] sm:$0xff]  ;;  %v4594_v44 = vmul.f32 -1.442695, %v255_v32  ;;  %v2190_v48 = vld [vmem:[#allocation5 + $0x430] sm:$0xff] }
 0x1c0   :  { %v5470_v56 = vpop.eup %5469  ;;  %v2992_v57 = vpop.permute.xlu1 %2991  ;;  %5489 = vrcp.f32 %v1390_v52  ;;  %v1392_v59 = vadd.f32 1.0, %v5468_v53  ;;  %v4593_v49 = vmul.f32 -1.442695, %v254_v36  ;;  %v259_v50 = vld [vmem:[#allocation2 + $0x6d8] sm:$0xff]  ;;  %v4596_v53 = vmul.f32 -1.442695, %v257_v41 }
 0x1c1   :  { %v5472_v60 = vpop.eup %5471  ;;  %4199 = vst.msk [vmem:[#allocation7 + $0x3f0] sm:$0xff] %vm4072_vm0, %v3910_v54  ;;  %v3913_v61 = vmul.f32 %v2992_v57, %v2185_v51  ;;  %3311 = vperm.xlu1 %4674, %v5450_v23   ;;  %5491 = vrcp.f32 %v1393_v55  ;;  %v1395_v62 = vadd.f32 1.0, %v5470_v56  ;;  %v253_v23 = vld [vmem:[#allocation2 + $0x6a8] sm:$0xff]  ;;  %v258_v54 = vld [vmem:[#allocation2 + $0x6d0] sm:$0xff] }
 0x1c2   :  { %v5474_v63 = vpop.eup %5473  ;;  %v2987_v0 = vpop.permute.xlu0 %2986  ;;  %5493 = vrcp.f32 %v1392_v59  ;;  %v1394_v2 = vadd.f32 1.0, %v5472_v60  ;;  %v4592_v35 = vmul.f32 -1.442695, %v253_v23  ;;  %v2193_v57 = vld [vmem:[#allocation5 + $0x448] sm:$0xff]  ;;  %v2198_v41 = vld [vmem:[#allocation5 + $0x470] sm:$0xff] }
 0x1c3   :  { %v5476_v4 = vpop.eup %5475  ;;  %4202 = vst.msk [vmem:[#allocation7 + $0x408] sm:$0xff] %vm4072_vm0, %v3913_v61  ;;  %v3912_v5 = vmul.f32 %v2987_v0, %v2184_v58  ;;  %3306 = vperm.xlu0 %4673, %v6126_v27   ;;  %5495 = vrcp.f32 %v1395_v62  ;;  %v1397_v6 = vadd.f32 1.0, %v5474_v63  ;;  %v252_v27 = vld [vmem:[#allocation2 + $0x6a0] sm:$0xff]  ;;  %v4595_v58 = vmul.f32 -1.442695, %v256_v45  ;;  %v261_v59 = vld [vmem:[#allocation2 + $0x6e8] sm:$0xff] }
 0x1c4   :  { %v5478_v8 = vpop.eup %5477  ;;  %v3002_v9 = vpop.permute.xlu1 %3001  ;;  %5497 = vrcp.f32 %v1394_v2  ;;  %v1396_v11 = vadd.f32 1.0, %v5476_v4  ;;  %v4591_v40 = vmul.f32 -1.442695, %v252_v27  ;;  %v4598_v62 = vmul.f32 -1.442695, %v259_v50  ;;  %v2196_v27 = vld [vmem:[#allocation5 + $0x460] sm:$0xff] }
 0x1c5   :  { %v5480_v13 = vpop.eup %5479  ;;  %4201 = vst.msk [vmem:[#allocation7 + $0x400] sm:$0xff] %vm4072_vm0, %v3912_v5  ;;  %v3915_v14 = vmul.f32 %v3002_v9, %v2187_v1  ;;  %3321 = vperm.xlu1 %4674, %v6129_v30   ;;  %5499 = vrcp.f32 %v1397_v6  ;;  %v1399_v15 = vadd.f32 1.0, %v5478_v8  ;;  %v2188_v30 = vld [vmem:[#allocation5 + $0x420] sm:$0xff]  ;;  %v4597_v2 = vmul.f32 -1.442695, %v258_v54  ;;  %v2195_v8 = vld [vmem:[#allocation5 + $0x458] sm:$0xff] }
 0x1c6   :  { %v5482_v18 = vpop.eup %5481  ;;  %v2997_v19 = vpop.permute.xlu0 %2996  ;;  %5501 = vrcp.f32 %v1396_v11  ;;  %v1398_v21 = vadd.f32 1.0, %v5480_v13  ;;  %v2192_v1 = vld [vmem:[#allocation5 + $0x440] sm:$0xff]  ;;  %v4600_v5 = vmul.f32 -1.442695, %v261_v59  ;;  %v2194_v13 = vld [vmem:[#allocation5 + $0x450] sm:$0xff]  ;;  %v2201_v50 = vld [vmem:[#allocation5 + $0x488] sm:$0xff] }
 0x1c7   :  { %v5484_v24 = vpop.eup %5483  ;;  %4204 = vst.msk [vmem:[#allocation7 + $0x418] sm:$0xff] %vm4072_vm0, %v3915_v14  ;;  %v3914_v25 = vmul.f32 %v2997_v19, %v2186_v10  ;;  %3316 = vperm.xlu0 %4673, %v5482_v18   ;;  %5503 = vrcp.f32 %v1399_v15 }
 0x1c8   :  { %v5486_v28 = vpop.eup %5485  ;;  %v3012_v29 = vpop.permute.xlu1 %3011  ;;  %5505 = vrcp.f32 %v1398_v21 }
 0x1c9   :  { %v5488_v33 = vpop.eup %5487  ;;  %4203 = vst.msk [vmem:[#allocation7 + $0x410] sm:$0xff] %vm4072_vm0, %v3914_v25  ;;  %v3917_v34 = vmul.f32 %v3012_v29, %v2189_v20  ;;  %3331 = vperm.xlu1 %4674, %v5484_v24   ;;  %5507 = vpow2.f32 %v4588_v16  ;;  %v2197_v20 = vld [vmem:[#allocation5 + $0x468] sm:$0xff] }
 0x1ca   :  { %v5490_v37 = vpop.eup %5489  ;;  %v3007_v38 = vpop.permute.xlu0 %3006  ;;  %5509 = vpow2.f32 %v4587_v22 }
 0x1cb   :  { %v5492_v42 = vpop.eup %5491  ;;  %4206 = vst.msk [vmem:[#allocation7 + $0x428] sm:$0xff] %vm4072_vm0, %v3917_v34  ;;  %v3916_v43 = vmul.f32 %v3007_v38, %v2188_v30  ;;  %3326 = vperm.xlu0 %4673, %v5486_v28   ;;  %5511 = vpow2.f32 %v4590_v26  ;;  %v2199_v34 = vld [vmem:[#allocation5 + $0x478] sm:$0xff] }
 0x1cc   :  { %v5494_v46 = vpop.eup %5493  ;;  %v3022_v47 = vpop.permute.xlu1 %3021  ;;  %5513 = vpow2.f32 %v4589_v31 }
 0x1cd   :  { %v5496_v51 = vpop.eup %5495  ;;  %4205 = vst.msk [vmem:[#allocation7 + $0x420] sm:$0xff] %vm4072_vm0, %v3916_v43  ;;  %v3919_v52 = vmul.f32 %v3022_v47, %v2191_v39  ;;  %3341 = vperm.xlu1 %4674, %v5488_v33   ;;  %5515 = vpow2.f32 %v4592_v35  ;;  %v260_v43 = vld [vmem:[#allocation2 + $0x6e0] sm:$0xff]  ;;  %v263_v47 = vld [vmem:[#allocation2 + $0x6f8] sm:$0xff] }
 0x1ce   :  { %v5498_v55 = vpop.eup %5497  ;;  %v3017_v56 = vpop.permute.xlu0 %3016  ;;  %5517 = vpow2.f32 %v4591_v40 }
 0x1cf   :  { %v5500_v60 = vpop.eup %5499  ;;  %4208 = vst.msk [vmem:[#allocation7 + $0x438] sm:$0xff] %vm4072_vm0, %v3919_v52  ;;  %v3918_v61 = vmul.f32 %v3017_v56, %v2190_v48  ;;  %3336 = vperm.xlu0 %4673, %v5490_v37   ;;  %5519 = vpow2.f32 %v4594_v44  ;;  %v262_v52 = vld [vmem:[#allocation2 + $0x6f0] sm:$0xff]  ;;  %v4599_v56 = vmul.f32 -1.442695, %v260_v43 }
 0x1d0   :  { %v5502_v63 = vpop.eup %5501  ;;  %v3032_v0 = vpop.permute.xlu1 %3031  ;;  %5521 = vpow2.f32 %v4593_v49 }
 0x1d1   :  { %v6145_v3 = vpop.eup %5503  ;;  %4207 = vst.msk [vmem:[#allocation7 + $0x430] sm:$0xff] %vm4072_vm0, %v3918_v61  ;;  %v3921_v4 = vmul.f32 %v3032_v0, %v2193_v57  ;;  %3351 = vperm.xlu1 %4674, %v5492_v42   ;;  %5523 = vpow2.f32 %v4596_v53  ;;  %v265_v57 = vld [vmem:[#allocation2 + $0x708] sm:$0xff] }
 0x1d2   :  { %v6148_v6 = vpop.eup %5505  ;;  %v3027_v7 = vpop.permute.xlu0 %3026  ;;  %5525 = vpow2.f32 %v4595_v58 }
 0x1d3   :  { %v5508_v9 = vpop.eup %5507  ;;  %4210 = vst.msk [vmem:[#allocation7 + $0x448] sm:$0xff] %vm4072_vm0, %v3921_v4  ;;  %v3920_v10 = vmul.f32 %v3027_v7, %v2192_v1  ;;  %3346 = vperm.xlu0 %4673, %v5494_v46   ;;  %5527 = vpow2.f32 %v4598_v62  ;;  %v4602_v62 = vmul.f32 -1.442695, %v263_v47  ;;  %v4604_v7 = vmul.f32 -1.442695, %v265_v57 }
 0x1d4   :  { %v5510_v11 = vpop.eup %5509  ;;  %v3042_v12 = vpop.permute.xlu1 %3041  ;;  %v1401_v14 = vadd.f32 1.0, %v5508_v9  ;;  %5529 = vpow2.f32 %v4597_v2  ;;  %v4601_v2 = vmul.f32 -1.442695, %v262_v52 }
 0x1d5   :  { %v5512_v15 = vpop.eup %5511  ;;  %4209 = vst.msk [vmem:[#allocation7 + $0x440] sm:$0xff] %vm4072_vm0, %v3920_v10  ;;  %v3923_v16 = vmul.f32 %v3042_v12, %v2195_v8  ;;  %3361 = vperm.xlu1 %4674, %v5496_v51   ;;  %v1400_v17 = vadd.f32 1.0, %v5510_v11  ;;  %5531 = vpow2.f32 %v4600_v5  ;;  %v266_v8 = vld [vmem:[#allocation2 + $0x710] sm:$0xff]  ;;  %v269_v12 = vld [vmem:[#allocation2 + $0x728] sm:$0xff] }
 0x1d6   :  { %v5514_v18 = vpop.eup %5513  ;;  %v3037_v19 = vpop.permute.xlu0 %3036  ;;  %5533 = vrcp.f32 %v1401_v14  ;;  %v1403_v21 = vadd.f32 1.0, %v5512_v15  ;;  %v2202_v15 = vld [vmem:[#allocation5 + $0x490] sm:$0xff] }
 0x1d7   :  { %v5516_v22 = vpop.eup %5515  ;;  %4212 = vst.msk [vmem:[#allocation7 + $0x458] sm:$0xff] %vm4072_vm0, %v3923_v16  ;;  %v3922_v23 = vmul.f32 %v3037_v19, %v2194_v13  ;;  %3356 = vperm.xlu0 %4673, %v5498_v55   ;;  %5535 = vrcp.f32 %v1400_v17  ;;  %v1402_v24 = vadd.f32 1.0, %v5514_v18  ;;  %v268_v17 = vld [vmem:[#allocation2 + $0x720] sm:$0xff] }
 0x1d8   :  { %v5518_v25 = vpop.eup %5517  ;;  %v3052_v26 = vpop.permute.xlu1 %3051  ;;  %5537 = vrcp.f32 %v1403_v21  ;;  %v1405_v28 = vadd.f32 1.0, %v5516_v22  ;;  %v271_v21 = vld [vmem:[#allocation2 + $0x738] sm:$0xff] }
 0x1d9   :  { %v5520_v29 = vpop.eup %5519  ;;  %4211 = vst.msk [vmem:[#allocation7 + $0x450] sm:$0xff] %vm4072_vm0, %v3922_v23  ;;  %v3925_v30 = vmul.f32 %v3052_v26, %v2197_v20  ;;  %3371 = vperm.xlu1 %4674, %v5500_v60   ;;  %5539 = vrcp.f32 %v1402_v24  ;;  %v1404_v31 = vadd.f32 1.0, %v5518_v25  ;;  %v2200_v60 = vld [vmem:[#allocation5 + $0x480] sm:$0xff]  ;;  %v4605_v20 = vmul.f32 -1.442695, %v266_v8  ;;  %v2205_v24 = vld [vmem:[#allocation5 + $0x4a8] sm:$0xff] }
 0x1da   :  { %v5522_v32 = vpop.eup %5521  ;;  %v3047_v33 = vpop.permute.xlu0 %3046  ;;  %5541 = vrcp.f32 %v1405_v28  ;;  %v1407_v35 = vadd.f32 1.0, %v5520_v29  ;;  %v4608_v25 = vmul.f32 -1.442695, %v269_v12  ;;  %v270_v26 = vld [vmem:[#allocation2 + $0x730] sm:$0xff]  ;;  %v4607_v29 = vmul.f32 -1.442695, %v268_v17 }
 0x1db   :  { %v5524_v36 = vpop.eup %5523  ;;  %4214 = vst.msk [vmem:[#allocation7 + $0x468] sm:$0xff] %vm4072_vm0, %v3925_v30  ;;  %v3924_v37 = vmul.f32 %v3047_v33, %v2196_v27  ;;  %3366 = vperm.xlu0 %4673, %v5502_v63   ;;  %5543 = vrcp.f32 %v1404_v31  ;;  %v1406_v38 = vadd.f32 1.0, %v5522_v32  ;;  %v264_v63 = vld [vmem:[#allocation2 + $0x700] sm:$0xff]  ;;  %v273_v30 = vld [vmem:[#allocation2 + $0x748] sm:$0xff] }
 0x1dc   :  { %v5526_v39 = vpop.eup %5525  ;;  %v3062_v40 = vpop.permute.xlu1 %3061  ;;  %5545 = vrcp.f32 %v1407_v35  ;;  %v1409_v42 = vadd.f32 1.0, %v5524_v36  ;;  %v4603_v11 = vmul.f32 -1.442695, %v264_v63  ;;  %v2204_v33 = vld [vmem:[#allocation5 + $0x4a0] sm:$0xff]  ;;  %v2213_v17 = vld [vmem:[#allocation5 + $0x4e8] sm:$0xff] }
 0x1dd   :  { %v5528_v44 = vpop.eup %5527  ;;  %4213 = vst.msk [vmem:[#allocation7 + $0x460] sm:$0xff] %vm4072_vm0, %v3924_v37  ;;  %v3927_v45 = vmul.f32 %v3062_v40, %v2199_v34  ;;  %3381 = vperm.xlu1 %4674, %v6145_v3   ;;  %5547 = vrcp.f32 %v1406_v38  ;;  %v1408_v46 = vadd.f32 1.0, %v5526_v39  ;;  %v267_v3 = vld [vmem:[#allocation2 + $0x718] sm:$0xff]  ;;  %v4610_v34 = vmul.f32 -1.442695, %v271_v21  ;;  %v272_v35 = vld [vmem:[#allocation2 + $0x740] sm:$0xff] }
 0x1de   :  { %v5530_v48 = vpop.eup %5529  ;;  %v3057_v49 = vpop.permute.xlu0 %3056  ;;  %5549 = vrcp.f32 %v1409_v42  ;;  %v1411_v51 = vadd.f32 1.0, %v5528_v44  ;;  %v4606_v16 = vmul.f32 -1.442695, %v267_v3  ;;  %v4609_v38 = vmul.f32 -1.442695, %v270_v26  ;;  %v2211_v3 = vld [vmem:[#allocation5 + $0x4d8] sm:$0xff] }
 0x1df   :  { %v5532_v53 = vpop.eup %5531  ;;  %4216 = vst.msk [vmem:[#allocation7 + $0x478] sm:$0xff] %vm4072_vm0, %v3927_v45  ;;  %v3926_v54 = vmul.f32 %v3057_v49, %v2198_v41  ;;  %3376 = vperm.xlu0 %4673, %v6148_v6   ;;  %5551 = vrcp.f32 %v1408_v46  ;;  %v1410_v55 = vadd.f32 1.0, %v5530_v48  ;;  %v2203_v6 = vld [vmem:[#allocation5 + $0x498] sm:$0xff]  ;;  %v4612_v42 = vmul.f32 -1.442695, %v273_v30  ;;  %v2206_v48 = vld [vmem:[#allocation5 + $0x4b0] sm:$0xff] }
 0x1e0   :  { %v5534_v58 = vpop.eup %5533  ;;  %v3072_v59 = vpop.permute.xlu1 %3071  ;;  %5553 = vrcp.f32 %v1411_v51  ;;  %v1413_v61 = vadd.f32 1.0, %v5532_v53  ;;  %v2207_v41 = vld [vmem:[#allocation5 + $0x4b8] sm:$0xff]  ;;  %v4611_v45 = vmul.f32 -1.442695, %v272_v35  ;;  %v2209_v53 = vld [vmem:[#allocation5 + $0x4c8] sm:$0xff]  ;;  %v2212_v26 = vld [vmem:[#allocation5 + $0x4e0] sm:$0xff] }
 0x1e1   :  { %v5536_v0 = vpop.eup %5535  ;;  %4215 = vst.msk [vmem:[#allocation7 + $0x470] sm:$0xff] %vm4072_vm0, %v3926_v54  ;;  %v3929_v1 = vmul.f32 %v3072_v59, %v2201_v50  ;;  %3391 = vperm.xlu1 %4674, %v5534_v58   ;;  %5555 = vrcp.f32 %v1410_v55 }
 0x1e2   :  { %v5538_v4 = vpop.eup %5537  ;;  %v3067_v5 = vpop.permute.xlu0 %3066  ;;  %5557 = vrcp.f32 %v1413_v61 }
 0x1e3   :  { %v5540_v9 = vpop.eup %5539  ;;  %4218 = vst.msk [vmem:[#allocation7 + $0x488] sm:$0xff] %vm4072_vm0, %v3929_v1  ;;  %v3928_v10 = vmul.f32 %v3067_v5, %v2200_v60  ;;  %3386 = vperm.xlu0 %4673, %v5536_v0   ;;  %5559 = vpow2.f32 %v4599_v56  ;;  %v2208_v60 = vld [vmem:[#allocation5 + $0x4c0] sm:$0xff] }
 0x1e4   :  { %v5542_v13 = vpop.eup %5541  ;;  %v3082_v14 = vpop.permute.xlu1 %3081  ;;  %5561 = vpow2.f32 %v4602_v62 }
 0x1e5   :  { %v5544_v18 = vpop.eup %5543  ;;  %4217 = vst.msk [vmem:[#allocation7 + $0x480] sm:$0xff] %vm4072_vm0, %v3928_v10  ;;  %v3931_v19 = vmul.f32 %v3082_v14, %v2203_v6  ;;  %3401 = vperm.xlu1 %4674, %v5538_v4   ;;  %5563 = vpow2.f32 %v4601_v2  ;;  %v2210_v10 = vld [vmem:[#allocation5 + $0x4d0] sm:$0xff] }
 0x1e6   :  { %v5546_v22 = vpop.eup %5545  ;;  %v3077_v23 = vpop.permute.xlu0 %3076  ;;  %5565 = vpow2.f32 %v4604_v7 }
 0x1e7   :  { %v5548_v27 = vpop.eup %5547  ;;  %4220 = vst.msk [vmem:[#allocation7 + $0x498] sm:$0xff] %vm4072_vm0, %v3931_v19  ;;  %v3930_v28 = vmul.f32 %v3077_v23, %v2202_v15  ;;  %3396 = vperm.xlu0 %4673, %v5540_v9   ;;  %5567 = vpow2.f32 %v4603_v11  ;;  %v275_v19 = vld [vmem:[#allocation2 + $0x758] sm:$0xff]  ;;  %v274_v23 = vld [vmem:[#allocation2 + $0x750] sm:$0xff] }
 0x1e8   :  { %v5550_v31 = vpop.eup %5549  ;;  %v3092_v32 = vpop.permute.xlu1 %3091  ;;  %5569 = vpow2.f32 %v4606_v16 }
 0x1e9   :  { %v5552_v36 = vpop.eup %5551  ;;  %4219 = vst.msk [vmem:[#allocation7 + $0x490] sm:$0xff] %vm4072_vm0, %v3930_v28  ;;  %v3933_v37 = vmul.f32 %v3092_v32, %v2205_v24  ;;  %3411 = vperm.xlu1 %4674, %v5542_v13   ;;  %5571 = vpow2.f32 %v4605_v20  ;;  %v277_v28 = vld [vmem:[#allocation2 + $0x768] sm:$0xff]  ;;  %v4614_v32 = vmul.f32 -1.442695, %v275_v19 }
 0x1ea   :  { %v5554_v39 = vpop.eup %5553  ;;  %v3087_v40 = vpop.permute.xlu0 %3086  ;;  %5573 = vpow2.f32 %v4608_v25 }
 0x1eb   :  { %v6164_v43 = vpop.eup %5555  ;;  %4222 = vst.msk [vmem:[#allocation7 + $0x4a8] sm:$0xff] %vm4072_vm0, %v3933_v37  ;;  %v3932_v44 = vmul.f32 %v3087_v40, %v2204_v33  ;;  %3406 = vperm.xlu0 %4673, %v5544_v18   ;;  %5575 = vpow2.f32 %v4607_v29  ;;  %v276_v33 = vld [vmem:[#allocation2 + $0x760] sm:$0xff] }
 0x1ec   :  { %v6167_v46 = vpop.eup %5557  ;;  %v3102_v47 = vpop.permute.xlu1 %3101  ;;  %5577 = vpow2.f32 %v4610_v34 }
 0x1ed   :  { %v5560_v49 = vpop.eup %5559  ;;  %4221 = vst.msk [vmem:[#allocation7 + $0x4a0] sm:$0xff] %vm4072_vm0, %v3932_v44  ;;  %v3935_v50 = vmul.f32 %v3102_v47, %v2207_v41  ;;  %3421 = vperm.xlu1 %4674, %v5546_v22   ;;  %5579 = vpow2.f32 %v4609_v38  ;;  %v4613_v38 = vmul.f32 -1.442695, %v274_v23  ;;  %v4615_v47 = vmul.f32 -1.442695, %v276_v33 }
 0x1ee   :  { %v5562_v51 = vpop.eup %5561  ;;  %v3097_v52 = vpop.permute.xlu0 %3096  ;;  %v1412_v54 = vadd.f32 1.0, %v5560_v49  ;;  %5581 = vpow2.f32 %v4612_v42  ;;  %v4616_v42 = vmul.f32 -1.442695, %v277_v28 }
 0x1ef   :  { %v5564_v55 = vpop.eup %5563  ;;  %4224 = vst.msk [vmem:[#allocation7 + $0x4b8] sm:$0xff] %vm4072_vm0, %v3935_v50  ;;  %v3934_v56 = vmul.f32 %v3097_v52, %v2206_v48  ;;  %3416 = vperm.xlu0 %4673, %v5548_v27   ;;  %v1415_v57 = vadd.f32 1.0, %v5562_v51  ;;  %5583 = vpow2.f32 %v4611_v45  ;;  %v281_v48 = vld [vmem:[#allocation2 + $0x788] sm:$0xff]  ;;  %v280_v52 = vld [vmem:[#allocation2 + $0x780] sm:$0xff] }
 0x1f0   :  { %v5566_v58 = vpop.eup %5565  ;;  %v3112_v59 = vpop.permute.xlu1 %3111  ;;  %5585 = vrcp.f32 %v1412_v54  ;;  %v1414_v61 = vadd.f32 1.0, %v5564_v55  ;;  %v2217_v55 = vld [vmem:[#allocation5 + $0x508] sm:$0xff] }
 0x1f1   :  { %v5568_v62 = vpop.eup %5567  ;;  %4223 = vst.msk [vmem:[#allocation7 + $0x4b0] sm:$0xff] %vm4072_vm0, %v3934_v56  ;;  %v3937_v63 = vmul.f32 %v3112_v59, %v2209_v53  ;;  %3431 = vperm.xlu1 %4674, %v5550_v31   ;;  %5587 = vrcp.f32 %v1415_v57  ;;  %v1417_v0 = vadd.f32 1.0, %v5566_v58  ;;  %v283_v57 = vld [vmem:[#allocation2 + $0x798] sm:$0xff] }
 0x1f2   :  { %v5570_v1 = vpop.eup %5569  ;;  %v3107_v2 = vpop.permute.xlu0 %3106  ;;  %5589 = vrcp.f32 %v1414_v61  ;;  %v1416_v4 = vadd.f32 1.0, %v5568_v62  ;;  %v282_v61 = vld [vmem:[#allocation2 + $0x790] sm:$0xff] }
 0x1f3   :  { %v5572_v5 = vpop.eup %5571  ;;  %4226 = vst.msk [vmem:[#allocation7 + $0x4c8] sm:$0xff] %vm4072_vm0, %v3937_v63  ;;  %v3936_v6 = vmul.f32 %v3107_v2, %v2208_v60  ;;  %3426 = vperm.xlu0 %4673, %v5552_v36   ;;  %5591 = vrcp.f32 %v1417_v0  ;;  %v1419_v7 = vadd.f32 1.0, %v5570_v1  ;;  %v2215_v36 = vld [vmem:[#allocation5 + $0x4f8] sm:$0xff]  ;;  %v4620_v60 = vmul.f32 -1.442695, %v281_v48  ;;  %v2216_v0 = vld [vmem:[#allocation5 + $0x500] sm:$0xff] }
 0x1f4   :  { %v5574_v8 = vpop.eup %5573  ;;  %v3122_v9 = vpop.permute.xlu1 %3121  ;;  %5593 = vrcp.f32 %v1416_v4  ;;  %v1418_v11 = vadd.f32 1.0, %v5572_v5  ;;  %v4619_v1 = vmul.f32 -1.442695, %v280_v52  ;;  %v285_v2 = vld [vmem:[#allocation2 + $0x7a8] sm:$0xff]  ;;  %v4622_v5 = vmul.f32 -1.442695, %v283_v57 }
 0x1f5   :  { %v5576_v12 = vpop.eup %5575  ;;  %4225 = vst.msk [vmem:[#allocation7 + $0x4c0] sm:$0xff] %vm4072_vm0, %v3936_v6  ;;  %v3939_v13 = vmul.f32 %v3122_v9, %v2211_v3  ;;  %3441 = vperm.xlu1 %4674, %v5554_v39   ;;  %5595 = vrcp.f32 %v1419_v7  ;;  %v1421_v14 = vadd.f32 1.0, %v5574_v8  ;;  %v279_v39 = vld [vmem:[#allocation2 + $0x778] sm:$0xff]  ;;  %v284_v6 = vld [vmem:[#allocation2 + $0x7a0] sm:$0xff] }
 0x1f6   :  { %v5578_v15 = vpop.eup %5577  ;;  %v3117_v16 = vpop.permute.xlu0 %3116  ;;  %5597 = vrcp.f32 %v1418_v11  ;;  %v1420_v18 = vadd.f32 1.0, %v5576_v12  ;;  %v4618_v51 = vmul.f32 -1.442695, %v279_v39  ;;  %v2219_v9 = vld [vmem:[#allocation5 + $0x518] sm:$0xff]  ;;  %v2224_v57 = vld [vmem:[#allocation5 + $0x540] sm:$0xff] }
 0x1f7   :  { %v5580_v20 = vpop.eup %5579  ;;  %4228 = vst.msk [vmem:[#allocation7 + $0x4d8] sm:$0xff] %vm4072_vm0, %v3939_v13  ;;  %v3938_v21 = vmul.f32 %v3117_v16, %v2210_v10  ;;  %3436 = vperm.xlu0 %4673, %v6164_v43   ;;  %5599 = vrcp.f32 %v1421_v14  ;;  %v1423_v22 = vadd.f32 1.0, %v5578_v15  ;;  %v278_v43 = vld [vmem:[#allocation2 + $0x770] sm:$0xff]  ;;  %v4621_v10 = vmul.f32 -1.442695, %v282_v61  ;;  %v287_v11 = vld [vmem:[#allocation2 + $0x7b8] sm:$0xff] }
 0x1f8   :  { %v5582_v24 = vpop.eup %5581  ;;  %v3132_v25 = vpop.permute.xlu1 %3131  ;;  %5601 = vrcp.f32 %v1420_v18  ;;  %v1422_v27 = vadd.f32 1.0, %v5580_v20  ;;  %v4617_v56 = vmul.f32 -1.442695, %v278_v43  ;;  %v4624_v14 = vmul.f32 -1.442695, %v285_v2  ;;  %v2222_v43 = vld [vmem:[#allocation5 + $0x530] sm:$0xff] }
 0x1f9   :  { %v5584_v29 = vpop.eup %5583  ;;  %4227 = vst.msk [vmem:[#allocation7 + $0x4d0] sm:$0xff] %vm4072_vm0, %v3938_v21  ;;  %v3941_v30 = vmul.f32 %v3132_v25, %v2213_v17  ;;  %3451 = vperm.xlu1 %4674, %v6167_v46   ;;  %5603 = vrcp.f32 %v1423_v22  ;;  %v1425_v31 = vadd.f32 1.0, %v5582_v24  ;;  %v2214_v46 = vld [vmem:[#allocation5 + $0x4f0] sm:$0xff]  ;;  %v4623_v18 = vmul.f32 -1.442695, %v284_v6  ;;  %v2221_v24 = vld [vmem:[#allocation5 + $0x528] sm:$0xff] }
 0x1fa   :  { %v5586_v34 = vpop.eup %5585  ;;  %v3127_v35 = vpop.permute.xlu0 %3126  ;;  %5605 = vrcp.f32 %v1422_v27  ;;  %v1424_v37 = vadd.f32 1.0, %v5584_v29  ;;  %v2218_v17 = vld [vmem:[#allocation5 + $0x510] sm:$0xff]  ;;  %v4626_v21 = vmul.f32 -1.442695, %v287_v11  ;;  %v2220_v29 = vld [vmem:[#allocation5 + $0x520] sm:$0xff]  ;;  %v2227_v2 = vld [vmem:[#allocation5 + $0x558] sm:$0xff] }
 0x1fb   :  { %v5588_v40 = vpop.eup %5587  ;;  %4230 = vst.msk [vmem:[#allocation7 + $0x4e8] sm:$0xff] %vm4072_vm0, %v3941_v30  ;;  %v3940_v41 = vmul.f32 %v3127_v35, %v2212_v26  ;;  %3446 = vperm.xlu0 %4673, %v5586_v34   ;;  %5607 = vrcp.f32 %v1425_v31 }
 0x1fc   :  { %v5590_v44 = vpop.eup %5589  ;;  %v3142_v45 = vpop.permute.xlu1 %3141  ;;  %5609 = vrcp.f32 %v1424_v37 }
 0x1fd   :  { %v5592_v49 = vpop.eup %5591  ;;  %4229 = vst.msk [vmem:[#allocation7 + $0x4e0] sm:$0xff] %vm4072_vm0, %v3940_v41  ;;  %v3943_v50 = vmul.f32 %v3142_v45, %v2215_v36  ;;  %3461 = vperm.xlu1 %4674, %v5588_v40   ;;  %5611 = vpow2.f32 %v4614_v32  ;;  %v2223_v36 = vld [vmem:[#allocation5 + $0x538] sm:$0xff] }
 0x1fe   :  { %v5594_v53 = vpop.eup %5593  ;;  %v3137_v54 = vpop.permute.xlu0 %3136  ;;  %5613 = vpow2.f32 %v4613_v38 }
 0x1ff   :  { %v5596_v58 = vpop.eup %5595  ;;  %4232 = vst.msk [vmem:[#allocation7 + $0x4f8] sm:$0xff] %vm4072_vm0, %v3943_v50  ;;  %v3942_v59 = vmul.f32 %v3137_v54, %v2214_v46  ;;  %3456 = vperm.xlu0 %4673, %v5590_v44   ;;  %5615 = vpow2.f32 %v4616_v42  ;;  %v2225_v50 = vld [vmem:[#allocation5 + $0x548] sm:$0xff] }
 0x200   :  { %v5598_v62 = vpop.eup %5597  ;;  %v3152_v63 = vpop.permute.xlu1 %3151  ;;  %5617 = vpow2.f32 %v4615_v47 }
 0x201   :  { %v5600_v3 = vpop.eup %5599  ;;  %4231 = vst.msk [vmem:[#allocation7 + $0x4f0] sm:$0xff] %vm4072_vm0, %v3942_v59  ;;  %v3945_v4 = vmul.f32 %v3152_v63, %v2217_v55  ;;  %3471 = vperm.xlu1 %4674, %v5592_v49   ;;  %5619 = vpow2.f32 %v4618_v51  ;;  %v286_v59 = vld [vmem:[#allocation2 + $0x7b0] sm:$0xff]  ;;  %v289_v63 = vld [vmem:[#allocation2 + $0x7c8] sm:$0xff] }
 0x202   :  { %v5602_v7 = vpop.eup %5601  ;;  %v3147_v8 = vpop.permute.xlu0 %3146  ;;  %5621 = vpow2.f32 %v4617_v56 }
 0x203   :  { %v5604_v12 = vpop.eup %5603  ;;  %4234 = vst.msk [vmem:[#allocation7 + $0x508] sm:$0xff] %vm4072_vm0, %v3945_v4  ;;  %v3944_v13 = vmul.f32 %v3147_v8, %v2216_v0  ;;  %3466 = vperm.xlu0 %4673, %v5594_v53   ;;  %5623 = vpow2.f32 %v4620_v60  ;;  %v288_v4 = vld [vmem:[#allocation2 + $0x7c0] sm:$0xff]  ;;  %v4625_v8 = vmul.f32 -1.442695, %v286_v59 }
 0x204   :  { %v5606_v15 = vpop.eup %5605  ;;  %v3162_v16 = vpop.permute.xlu1 %3161  ;;  %5625 = vpow2.f32 %v4619_v1 }
 0x205   :  { %v6183_v19 = vpop.eup %5607  ;;  %4233 = vst.msk [vmem:[#allocation7 + $0x500] sm:$0xff] %vm4072_vm0, %v3944_v13  ;;  %v3947_v20 = vmul.f32 %v3162_v16, %v2219_v9  ;;  %3481 = vperm.xlu1 %4674, %v5596_v58   ;;  %5627 = vpow2.f32 %v4622_v5  ;;  %v291_v9 = vld [vmem:[#allocation2 + $0x7d8] sm:$0xff] }
 0x206   :  { %v6186_v22 = vpop.eup %5609  ;;  %v3157_v23 = vpop.permute.xlu0 %3156  ;;  %5629 = vpow2.f32 %v4621_v10 }
 0x207   :  { %v5612_v25 = vpop.eup %5611  ;;  %4236 = vst.msk [vmem:[#allocation7 + $0x518] sm:$0xff] %vm4072_vm0, %v3947_v20  ;;  %v3946_v26 = vmul.f32 %v3157_v23, %v2218_v17  ;;  %3476 = vperm.xlu0 %4673, %v5598_v62   ;;  %5631 = vpow2.f32 %v4624_v14  ;;  %v4628_v14 = vmul.f32 -1.442695, %v289_v63  ;;  %v4630_v23 = vmul.f32 -1.442695, %v291_v9 }
 0x208   :  { %v5614_v27 = vpop.eup %5613  ;;  %v3172_v28 = vpop.permute.xlu1 %3171  ;;  %v1427_v30 = vadd.f32 1.0, %v5612_v25  ;;  %5633 = vpow2.f32 %v4623_v18  ;;  %v4627_v18 = vmul.f32 -1.442695, %v288_v4 }
 0x209   :  { %v5616_v31 = vpop.eup %5615  ;;  %4235 = vst.msk [vmem:[#allocation7 + $0x510] sm:$0xff] %vm4072_vm0, %v3946_v26  ;;  %v3949_v32 = vmul.f32 %v3172_v28, %v2221_v24  ;;  %3491 = vperm.xlu1 %4674, %v5600_v3   ;;  %v1426_v33 = vadd.f32 1.0, %v5614_v27  ;;  %5635 = vpow2.f32 %v4626_v21  ;;  %v292_v24 = vld [vmem:[#allocation2 + $0x7e0] sm:$0xff]  ;;  %v295_v28 = vld [vmem:[#allocation2 + $0x7f8] sm:$0xff] }
 0x20a   :  { %v5618_v34 = vpop.eup %5617  ;;  %v3167_v35 = vpop.permute.xlu0 %3166  ;;  %5637 = vrcp.f32 %v1427_v30  ;;  %v1429_v37 = vadd.f32 1.0, %v5616_v31  ;;  %v2228_v31 = vld [vmem:[#allocation5 + $0x560] sm:$0xff] }
 0x20b   :  { %v5620_v38 = vpop.eup %5619  ;;  %4238 = vst.msk [vmem:[#allocation7 + $0x528] sm:$0xff] %vm4072_vm0, %v3949_v32  ;;  %v3948_v39 = vmul.f32 %v3167_v35, %v2220_v29  ;;  %3486 = vperm.xlu0 %4673, %v5602_v7   ;;  %5639 = vrcp.f32 %v1426_v33  ;;  %v1428_v40 = vadd.f32 1.0, %v5618_v34  ;;  %v294_v33 = vld [vmem:[#allocation2 + $0x7f0] sm:$0xff] }
 0x20c   :  { %v5622_v41 = vpop.eup %5621  ;;  %v3182_v42 = vpop.permute.xlu1 %3181  ;;  %5641 = vrcp.f32 %v1429_v37  ;;  %v1431_v44 = vadd.f32 1.0, %v5620_v38  ;;  %v297_v37 = vld [vmem:[#allocation2 + $0x808] sm:$0xff] }
 0x20d   :  { %v5624_v45 = vpop.eup %5623  ;;  %4237 = vst.msk [vmem:[#allocation7 + $0x520] sm:$0xff] %vm4072_vm0, %v3948_v39  ;;  %v3951_v46 = vmul.f32 %v3182_v42, %v2223_v36  ;;  %3501 = vperm.xlu1 %4674, %v5604_v12   ;;  %5643 = vrcp.f32 %v1428_v40  ;;  %v1430_v47 = vadd.f32 1.0, %v5622_v41  ;;  %v2226_v12 = vld [vmem:[#allocation5 + $0x550] sm:$0xff]  ;;  %v4631_v36 = vmul.f32 -1.442695, %v292_v24  ;;  %v2231_v40 = vld [vmem:[#allocation5 + $0x578] sm:$0xff] }
 0x20e   :  { %v5626_v48 = vpop.eup %5625  ;;  %v3177_v49 = vpop.permute.xlu0 %3176  ;;  %5645 = vrcp.f32 %v1431_v44  ;;  %v1433_v51 = vadd.f32 1.0, %v5624_v45  ;;  %v4634_v41 = vmul.f32 -1.442695, %v295_v28  ;;  %v296_v42 = vld [vmem:[#allocation2 + $0x800] sm:$0xff]  ;;  %v4633_v45 = vmul.f32 -1.442695, %v294_v33 }
 0x20f   :  { %v5628_v52 = vpop.eup %5627  ;;  %4240 = vst.msk [vmem:[#allocation7 + $0x538] sm:$0xff] %vm4072_vm0, %v3951_v46  ;;  %v3950_v53 = vmul.f32 %v3177_v49, %v2222_v43  ;;  %3496 = vperm.xlu0 %4673, %v5606_v15   ;;  %5647 = vrcp.f32 %v1430_v47  ;;  %v1432_v54 = vadd.f32 1.0, %v5626_v48  ;;  %v290_v15 = vld [vmem:[#allocation2 + $0x7d0] sm:$0xff]  ;;  %v299_v46 = vld [vmem:[#allocation2 + $0x818] sm:$0xff] }
 0x210   :  { %v5630_v55 = vpop.eup %5629  ;;  %v3192_v56 = vpop.permute.xlu1 %3191  ;;  %5649 = vrcp.f32 %v1433_v51  ;;  %v1435_v58 = vadd.f32 1.0, %v5628_v52  ;;  %v4629_v27 = vmul.f32 -1.442695, %v290_v15  ;;  %v2230_v49 = vld [vmem:[#allocation5 + $0x570] sm:$0xff]  ;;  %v2239_v33 = vld [vmem:[#allocation5 + $0x5b8] sm:$0xff] }
 0x211   :  { %v5632_v60 = vpop.eup %5631  ;;  %4239 = vst.msk [vmem:[#allocation7 + $0x530] sm:$0xff] %vm4072_vm0, %v3950_v53  ;;  %v3953_v61 = vmul.f32 %v3192_v56, %v2225_v50  ;;  %3511 = vperm.xlu1 %4674, %v6183_v19   ;;  %5651 = vrcp.f32 %v1432_v54  ;;  %v1434_v62 = vadd.f32 1.0, %v5630_v55  ;;  %v293_v19 = vld [vmem:[#allocation2 + $0x7e8] sm:$0xff]  ;;  %v4636_v50 = vmul.f32 -1.442695, %v297_v37  ;;  %v298_v51 = vld [vmem:[#allocation2 + $0x810] sm:$0xff] }
 0x212   :  { %v5634_v0 = vpop.eup %5633  ;;  %v3187_v1 = vpop.permute.xlu0 %3186  ;;  %5653 = vrcp.f32 %v1435_v58  ;;  %v1437_v3 = vadd.f32 1.0, %v5632_v60  ;;  %v4632_v32 = vmul.f32 -1.442695, %v293_v19  ;;  %v4635_v54 = vmul.f32 -1.442695, %v296_v42  ;;  %v2237_v19 = vld [vmem:[#allocation5 + $0x5a8] sm:$0xff] }
 0x213   :  { %v5636_v5 = vpop.eup %5635  ;;  %4242 = vst.msk [vmem:[#allocation7 + $0x548] sm:$0xff] %vm4072_vm0, %v3953_v61  ;;  %v3952_v6 = vmul.f32 %v3187_v1, %v2224_v57  ;;  %3506 = vperm.xlu0 %4673, %v6186_v22   ;;  %5655 = vrcp.f32 %v1434_v62  ;;  %v1436_v7 = vadd.f32 1.0, %v5634_v0  ;;  %v2229_v22 = vld [vmem:[#allocation5 + $0x568] sm:$0xff]  ;;  %v4638_v58 = vmul.f32 -1.442695, %v299_v46  ;;  %v2232_v0 = vld [vmem:[#allocation5 + $0x580] sm:$0xff] }
 0x214   :  { %v5638_v10 = vpop.eup %5637  ;;  %v3202_v11 = vpop.permute.xlu1 %3201  ;;  %5657 = vrcp.f32 %v1437_v3  ;;  %v1439_v13 = vadd.f32 1.0, %v5636_v5  ;;  %v2233_v57 = vld [vmem:[#allocation5 + $0x588] sm:$0xff]  ;;  %v4637_v61 = vmul.f32 -1.442695, %v298_v51  ;;  %v2235_v5 = vld [vmem:[#allocation5 + $0x598] sm:$0xff]  ;;  %v2238_v42 = vld [vmem:[#allocation5 + $0x5b0] sm:$0xff] }
 0x215   :  { %v5640_v16 = vpop.eup %5639  ;;  %4241 = vst.msk [vmem:[#allocation7 + $0x540] sm:$0xff] %vm4072_vm0, %v3952_v6  ;;  %v3955_v17 = vmul.f32 %v3202_v11, %v2227_v2  ;;  %3521 = vperm.xlu1 %4674, %v5638_v10   ;;  %5659 = vrcp.f32 %v1436_v7 }
 0x216   :  { %v5642_v20 = vpop.eup %5641  ;;  %v3197_v21 = vpop.permute.xlu0 %3196  ;;  %5661 = vrcp.f32 %v1439_v13 }
 0x217   :  { %v5644_v25 = vpop.eup %5643  ;;  %4244 = vst.msk [vmem:[#allocation7 + $0x558] sm:$0xff] %vm4072_vm0, %v3955_v17  ;;  %v3954_v26 = vmul.f32 %v3197_v21, %v2226_v12  ;;  %3516 = vperm.xlu0 %4673, %v5640_v16   ;;  %5663 = vpow2.f32 %v4625_v8  ;;  %v2234_v12 = vld [vmem:[#allocation5 + $0x590] sm:$0xff] }
 0x218   :  { %v5646_v29 = vpop.eup %5645  ;;  %v3212_v30 = vpop.permute.xlu1 %3211  ;;  %5665 = vpow2.f32 %v4628_v14 }
 0x219   :  { %v5648_v34 = vpop.eup %5647  ;;  %4243 = vst.msk [vmem:[#allocation7 + $0x550] sm:$0xff] %vm4072_vm0, %v3954_v26  ;;  %v3957_v35 = vmul.f32 %v3212_v30, %v2229_v22  ;;  %3531 = vperm.xlu1 %4674, %v5642_v20   ;;  %5667 = vpow2.f32 %v4627_v18  ;;  %v2236_v26 = vld [vmem:[#allocation5 + $0x5a0] sm:$0xff] }
 0x21a   :  { %v5650_v38 = vpop.eup %5649  ;;  %v3207_v39 = vpop.permute.xlu0 %3206  ;;  %5669 = vpow2.f32 %v4630_v23 }
 0x21b   :  { %v5652_v43 = vpop.eup %5651  ;;  %4246 = vst.msk [vmem:[#allocation7 + $0x568] sm:$0xff] %vm4072_vm0, %v3957_v35  ;;  %v3956_v44 = vmul.f32 %v3207_v39, %v2228_v31  ;;  %3526 = vperm.xlu0 %4673, %v5644_v25   ;;  %5671 = vpow2.f32 %v4629_v27  ;;  %v301_v35 = vld [vmem:[#allocation2 + $0x828] sm:$0xff]  ;;  %v300_v39 = vld [vmem:[#allocation2 + $0x820] sm:$0xff] }
 0x21c   :  { %v5654_v47 = vpop.eup %5653  ;;  %v3222_v48 = vpop.permute.xlu1 %3221  ;;  %5673 = vpow2.f32 %v4632_v32 }
 0x21d   :  { %v5656_v52 = vpop.eup %5655  ;;  %4245 = vst.msk [vmem:[#allocation7 + $0x560] sm:$0xff] %vm4072_vm0, %v3956_v44  ;;  %v3959_v53 = vmul.f32 %v3222_v48, %v2231_v40  ;;  %3541 = vperm.xlu1 %4674, %v5646_v29   ;;  %5675 = vpow2.f32 %v4631_v36  ;;  %v303_v44 = vld [vmem:[#allocation2 + $0x838] sm:$0xff]  ;;  %v4640_v48 = vmul.f32 -1.442695, %v301_v35 }
 0x21e   :  { %v5658_v55 = vpop.eup %5657  ;;  %v3217_v56 = vpop.permute.xlu0 %3216  ;;  %5677 = vpow2.f32 %v4634_v41 }
 0x21f   :  { %v6202_v59 = vpop.eup %5659  ;;  %4248 = vst.msk [vmem:[#allocation7 + $0x578] sm:$0xff] %vm4072_vm0, %v3959_v53  ;;  %v3958_v60 = vmul.f32 %v3217_v56, %v2230_v49  ;;  %3536 = vperm.xlu0 %4673, %v5648_v34   ;;  %5679 = vpow2.f32 %v4633_v45  ;;  %v302_v49 = vld [vmem:[#allocation2 + $0x830] sm:$0xff] }
 0x220   :  { %v6205_v62 = vpop.eup %5661  ;;  %v3232_v63 = vpop.permute.xlu1 %3231  ;;  %5681 = vpow2.f32 %v4636_v50 }
 0x221   :  { %v5664_v1 = vpop.eup %5663  ;;  %4247 = vst.msk [vmem:[#allocation7 + $0x570] sm:$0xff] %vm4072_vm0, %v3958_v60  ;;  %v3961_v2 = vmul.f32 %v3232_v63, %v2233_v57  ;;  %3551 = vperm.xlu1 %4674, %v5650_v38   ;;  %5683 = vpow2.f32 %v4635_v54  ;;  %v4639_v54 = vmul.f32 -1.442695, %v300_v39  ;;  %v4641_v63 = vmul.f32 -1.442695, %v302_v49  ;;  %v313_v39 = vld [vmem:[#allocation2 + $0x888] sm:$0xff] }
 0x222   :  { %v5666_v3 = vpop.eup %5665  ;;  %v3227_v4 = vpop.permute.xlu0 %3226  ;;  %v1438_v6 = vadd.f32 1.0, %v5664_v1  ;;  %5685 = vpow2.f32 %v4638_v58  ;;  %v4642_v58 = vmul.f32 -1.442695, %v303_v44  ;;  %v2246_v44 = vld [vmem:[#allocation5 + $0x5f0] sm:$0xff]  ;;  %v4652_v49 = vmul.f32 -1.442695, %v313_v39 }
 0x223   :  { %v5668_v7 = vpop.eup %5667  ;;  %4250 = vst.msk [vmem:[#allocation7 + $0x588] sm:$0xff] %vm4072_vm0, %v3961_v2  ;;  %v3960_v8 = vmul.f32 %v3227_v4, %v2232_v0  ;;  %3546 = vperm.xlu0 %4673, %v5652_v43   ;;  %v1441_v9 = vadd.f32 1.0, %v5666_v3  ;;  %5687 = vpow2.f32 %v4637_v61  ;;  %v307_v0 = vld [vmem:[#allocation2 + $0x858] sm:$0xff]  ;;  %v306_v4 = vld [vmem:[#allocation2 + $0x850] sm:$0xff] }
 0x224   :  { %v5670_v10 = vpop.eup %5669  ;;  %v3242_v11 = vpop.permute.xlu1 %3241  ;;  %5689 = vrcp.f32 %v1438_v6  ;;  %v1440_v13 = vadd.f32 1.0, %v5668_v7  ;;  %v2243_v7 = vld [vmem:[#allocation5 + $0x5d8] sm:$0xff] }
 0x225   :  { %v5672_v14 = vpop.eup %5671  ;;  %4249 = vst.msk [vmem:[#allocation7 + $0x580] sm:$0xff] %vm4072_vm0, %v3960_v8  ;;  %v3963_v15 = vmul.f32 %v3242_v11, %v2235_v5  ;;  %3561 = vperm.xlu1 %4674, %v5654_v47   ;;  %5691 = vrcp.f32 %v1441_v9  ;;  %v1443_v16 = vadd.f32 1.0, %v5670_v10  ;;  %v309_v9 = vld [vmem:[#allocation2 + $0x868] sm:$0xff] }
 0x226   :  { %v5674_v17 = vpop.eup %5673  ;;  %v3237_v18 = vpop.permute.xlu0 %3236  ;;  %5693 = vrcp.f32 %v1440_v13  ;;  %v1442_v20 = vadd.f32 1.0, %v5672_v14  ;;  %v308_v13 = vld [vmem:[#allocation2 + $0x860] sm:$0xff] }
 0x227   :  { %v5676_v21 = vpop.eup %5675  ;;  %4252 = vst.msk [vmem:[#allocation7 + $0x598] sm:$0xff] %vm4072_vm0, %v3963_v15  ;;  %v3962_v22 = vmul.f32 %v3237_v18, %v2234_v12  ;;  %3556 = vperm.xlu0 %4673, %v5656_v52   ;;  %5695 = vrcp.f32 %v1443_v16  ;;  %v1445_v23 = vadd.f32 1.0, %v5674_v17  ;;  %v2241_v52 = vld [vmem:[#allocation5 + $0x5c8] sm:$0xff]  ;;  %v4646_v12 = vmul.f32 -1.442695, %v307_v0  ;;  %v2242_v16 = vld [vmem:[#allocation5 + $0x5d0] sm:$0xff] }
 0x228   :  { %v5678_v24 = vpop.eup %5677  ;;  %v3252_v25 = vpop.permute.xlu1 %3251  ;;  %5697 = vrcp.f32 %v1442_v20  ;;  %v1444_v27 = vadd.f32 1.0, %v5676_v21  ;;  %v4645_v17 = vmul.f32 -1.442695, %v306_v4  ;;  %v311_v18 = vld [vmem:[#allocation2 + $0x878] sm:$0xff]  ;;  %v4648_v21 = vmul.f32 -1.442695, %v309_v9 }
 0x229   :  { %v5680_v28 = vpop.eup %5679  ;;  %4251 = vst.msk [vmem:[#allocation7 + $0x590] sm:$0xff] %vm4072_vm0, %v3962_v22  ;;  %v3965_v29 = vmul.f32 %v3252_v25, %v2237_v19  ;;  %3571 = vperm.xlu1 %4674, %v5658_v55   ;;  %5699 = vrcp.f32 %v1445_v23  ;;  %v1447_v30 = vadd.f32 1.0, %v5678_v24  ;;  %v305_v55 = vld [vmem:[#allocation2 + $0x848] sm:$0xff]  ;;  %v310_v22 = vld [vmem:[#allocation2 + $0x870] sm:$0xff] }
 0x22a   :  { %v5682_v31 = vpop.eup %5681  ;;  %v3247_v32 = vpop.permute.xlu0 %3246  ;;  %5701 = vrcp.f32 %v1444_v27  ;;  %v1446_v34 = vadd.f32 1.0, %v5680_v28  ;;  %v4644_v3 = vmul.f32 -1.442695, %v305_v55  ;;  %v2245_v25 = vld [vmem:[#allocation5 + $0x5e8] sm:$0xff]  ;;  %v2250_v9 = vld [vmem:[#allocation5 + $0x610] sm:$0xff] }
 0x22b   :  { %v5684_v36 = vpop.eup %5683  ;;  %4254 = vst.msk [vmem:[#allocation7 + $0x5a8] sm:$0xff] %vm4072_vm0, %v3965_v29  ;;  %v3964_v37 = vmul.f32 %v3247_v32, %v2236_v26  ;;  %3566 = vperm.xlu0 %4673, %v6202_v59   ;;  %5703 = vrcp.f32 %v1447_v30  ;;  %v1449_v38 = vadd.f32 1.0, %v5682_v31  ;;  %v304_v59 = vld [vmem:[#allocation2 + $0x840] sm:$0xff]  ;;  %v4647_v26 = vmul.f32 -1.442695, %v308_v13 }
 0x22c   :  { %v5686_v40 = vpop.eup %5685  ;;  %v3262_v41 = vpop.permute.xlu1 %3261  ;;  %5705 = vrcp.f32 %v1446_v34  ;;  %v1448_v43 = vadd.f32 1.0, %v5684_v36  ;;  %v4643_v8 = vmul.f32 -1.442695, %v304_v59  ;;  %v4650_v29 = vmul.f32 -1.442695, %v311_v18  ;;  %v2244_v32 = vld [vmem:[#allocation5 + $0x5e0] sm:$0xff] }
 0x22d   :  { %v5688_v45 = vpop.eup %5687  ;;  %4253 = vst.msk [vmem:[#allocation7 + $0x5a0] sm:$0xff] %vm4072_vm0, %v3964_v37  ;;  %v3967_v46 = vmul.f32 %v3262_v41, %v2239_v33  ;;  %3581 = vperm.xlu1 %4674, %v6205_v62   ;;  %5707 = vrcp.f32 %v1449_v38  ;;  %v1451_v47 = vadd.f32 1.0, %v5686_v40  ;;  %v2240_v62 = vld [vmem:[#allocation5 + $0x5c0] sm:$0xff]  ;;  %v4649_v33 = vmul.f32 -1.442695, %v310_v22  ;;  %v2247_v38 = vld [vmem:[#allocation5 + $0x5f8] sm:$0xff] }
 0x22e   :  { %v5690_v50 = vpop.eup %5689  ;;  %v3257_v51 = vpop.permute.xlu0 %3256  ;;  %5709 = vrcp.f32 %v1448_v43  ;;  %v1450_v53 = vadd.f32 1.0, %v5688_v45  ;;  %v2248_v59 = vld [vmem:[#allocation5 + $0x600] sm:$0xff]  ;;  %v2253_v18 = vld [vmem:[#allocation5 + $0x628] sm:$0xff] }
 0x22f   :  { %v5692_v56 = vpop.eup %5691  ;;  %4256 = vst.msk [vmem:[#allocation7 + $0x5b8] sm:$0xff] %vm4072_vm0, %v3967_v46  ;;  %v3966_v57 = vmul.f32 %v3257_v51, %v2238_v42  ;;  %3576 = vperm.xlu0 %4673, %v5690_v50   ;;  %5711 = vrcp.f32 %v1451_v47 }
 0x230   :  { %v5694_v60 = vpop.eup %5693  ;;  %v3272_v61 = vpop.permute.xlu1 %3271  ;;  %5713 = vrcp.f32 %v1450_v53 }
 0x231   :  { %v5696_v1 = vpop.eup %5695  ;;  %4255 = vst.msk [vmem:[#allocation7 + $0x5b0] sm:$0xff] %vm4072_vm0, %v3966_v57  ;;  %v3969_v2 = vmul.f32 %v3272_v61, %v2241_v52  ;;  %3591 = vperm.xlu1 %4674, %v5692_v56   ;;  %5715 = vpow2.f32 %v4640_v48  ;;  %v2249_v52 = vld [vmem:[#allocation5 + $0x608] sm:$0xff] }
 0x232   :  { %v5698_v5 = vpop.eup %5697  ;;  %v3267_v6 = vpop.permute.xlu0 %3266  ;;  %5717 = vpow2.f32 %v4639_v54 }
 0x233   :  { %v5700_v10 = vpop.eup %5699  ;;  %4258 = vst.msk [vmem:[#allocation7 + $0x5c8] sm:$0xff] %vm4072_vm0, %v3969_v2  ;;  %v3968_v11 = vmul.f32 %v3267_v6, %v2240_v62  ;;  %3586 = vperm.xlu0 %4673, %v5694_v60   ;;  %5719 = vpow2.f32 %v4642_v58  ;;  %v2251_v2 = vld [vmem:[#allocation5 + $0x618] sm:$0xff] }
 0x234   :  { %v5702_v14 = vpop.eup %5701  ;;  %v3282_v15 = vpop.permute.xlu1 %3281  ;;  %5721 = vpow2.f32 %v4641_v63 }
 0x235   :  { %v5704_v19 = vpop.eup %5703  ;;  %4257 = vst.msk [vmem:[#allocation7 + $0x5c0] sm:$0xff] %vm4072_vm0, %v3968_v11  ;;  %v3971_v20 = vmul.f32 %v3282_v15, %v2243_v7  ;;  %3601 = vperm.xlu1 %4674, %v5696_v1   ;;  %5723 = vpow2.f32 %v4644_v3  ;;  %v312_v11 = vld [vmem:[#allocation2 + $0x880] sm:$0xff]  ;;  %v315_v15 = vld [vmem:[#allocation2 + $0x898] sm:$0xff] }
 0x236   :  { %v5706_v23 = vpop.eup %5705  ;;  %v3277_v24 = vpop.permute.xlu0 %3276  ;;  %5725 = vpow2.f32 %v4643_v8 }
 0x237   :  { %v5708_v27 = vpop.eup %5707  ;;  %4260 = vst.msk [vmem:[#allocation7 + $0x5d8] sm:$0xff] %vm4072_vm0, %v3971_v20  ;;  %v3970_v28 = vmul.f32 %v3277_v24, %v2242_v16  ;;  %3596 = vperm.xlu0 %4673, %v5698_v5   ;;  %5727 = vpow2.f32 %v4646_v12  ;;  %v314_v20 = vld [vmem:[#allocation2 + $0x890] sm:$0xff]  ;;  %v317_v24 = vld [vmem:[#allocation2 + $0x8a8] sm:$0xff] }
 0x238   :  { %v5710_v30 = vpop.eup %5709  ;;  %v3292_v31 = vpop.permute.xlu1 %3291  ;;  %5729 = vpow2.f32 %v4645_v17 }
 0x239   :  { %v6221_v34 = vpop.eup %5711  ;;  %4259 = vst.msk [vmem:[#allocation7 + $0x5d0] sm:$0xff] %vm4072_vm0, %v3970_v28  ;;  %v3973_v35 = vmul.f32 %v3292_v31, %v2245_v25  ;;  %3611 = vperm.xlu1 %4674, %v5700_v10   ;;  %5731 = vpow2.f32 %v4648_v21  ;;  %v4654_v28 = vmul.f32 -1.442695, %v315_v15 }
 0x23a   :  { %v6224_v36 = vpop.eup %5713  ;;  %v3287_v37 = vpop.permute.xlu0 %3286  ;;  %5733 = vpow2.f32 %v4647_v26 }
 0x23b   :  { %v5716_v40 = vpop.eup %5715  ;;  %4262 = vst.msk [vmem:[#allocation7 + $0x5e8] sm:$0xff] %vm4072_vm0, %v3973_v35  ;;  %v3972_v41 = vmul.f32 %v3287_v37, %v2244_v32  ;;  %3606 = vperm.xlu0 %4673, %v5702_v14   ;;  %5735 = vpow2.f32 %v4650_v29  ;;  %v316_v29 = vld [vmem:[#allocation2 + $0x8a0] sm:$0xff]  ;;  %v4653_v32 = vmul.f32 -1.442695, %v314_v20  ;;  %v4656_v37 = vmul.f32 -1.442695, %v317_v24 }
 0x23c   :  { %v5718_v42 = vpop.eup %5717  ;;  %v3302_v43 = vpop.permute.xlu1 %3301  ;;  %v1453_v45 = vadd.f32 1.0, %v5716_v40  ;;  %5737 = vpow2.f32 %v4649_v33  ;;  %v319_v33 = vld [vmem:[#allocation2 + $0x8b8] sm:$0xff] }
 0x23d   :  { %v5720_v46 = vpop.eup %5719  ;;  %4261 = vst.msk [vmem:[#allocation7 + $0x5e0] sm:$0xff] %vm4072_vm0, %v3972_v41  ;;  %v3975_v47 = vmul.f32 %v3302_v43, %v2247_v38  ;;  %3621 = vperm.xlu1 %4674, %v5704_v19   ;;  %v1452_v48 = vadd.f32 1.0, %v5718_v42  ;;  %v318_v38 = vld [vmem:[#allocation2 + $0x8b0] sm:$0xff]  ;;  %v4655_v41 = vmul.f32 -1.442695, %v316_v29  ;;  %v321_v42 = vld [vmem:[#allocation2 + $0x8c8] sm:$0xff] }
 0x23e   :  { %v5722_v50 = vpop.eup %5721  ;;  %v3297_v51 = vpop.permute.xlu0 %3296  ;;  %5739 = vrcp.f32 %v1453_v45  ;;  %v1455_v53 = vadd.f32 1.0, %v5720_v46  ;;  %v2254_v45 = vld [vmem:[#allocation5 + $0x630] sm:$0xff]  ;;  %v4658_v46 = vmul.f32 -1.442695, %v319_v33 }
 0x23f   :  { %v5724_v54 = vpop.eup %5723  ;;  %4264 = vst.msk [vmem:[#allocation7 + $0x5f8] sm:$0xff] %vm4072_vm0, %v3975_v47  ;;  %v3974_v55 = vmul.f32 %v3297_v51, %v2246_v44  ;;  %3616 = vperm.xlu0 %4673, %v5706_v23   ;;  %5741 = vrcp.f32 %v1452_v48  ;;  %v1454_v56 = vadd.f32 1.0, %v5722_v50  ;;  %v4651_v23 = vmul.f32 -1.442695, %v312_v11  ;;  %v320_v47 = vld [vmem:[#allocation2 + $0x8c0] sm:$0xff]  ;;  %v2258_v11 = vld [vmem:[#allocation5 + $0x650] sm:$0xff] }
 0x240   :  { %v5726_v57 = vpop.eup %5725  ;;  %v3312_v58 = vpop.permute.xlu1 %3311  ;;  %5743 = vrcp.f32 %v1455_v53  ;;  %v1457_v60 = vadd.f32 1.0, %v5724_v54  ;;  %v4657_v50 = vmul.f32 -1.442695, %v318_v38  ;;  %v2257_v53 = vld [vmem:[#allocation5 + $0x648] sm:$0xff]  ;;  %v4660_v54 = vmul.f32 -1.442695, %v321_v42 }
 0x241   :  { %v5728_v61 = vpop.eup %5727  ;;  %4263 = vst.msk [vmem:[#allocation7 + $0x5f0] sm:$0xff] %vm4072_vm0, %v3974_v55  ;;  %v3977_v62 = vmul.f32 %v3312_v58, %v2249_v52  ;;  %3631 = vperm.xlu1 %4674, %v5708_v27   ;;  %v1456_v63 = vadd.f32 1.0, %v5726_v57  ;;  %5745 = vpow2.f32 %v4652_v49  ;;  %v2252_v27 = vld [vmem:[#allocation5 + $0x620] sm:$0xff]  ;;  %v4659_v57 = vmul.f32 -1.442695, %v320_v47  ;;  %v323_v58 = vld [vmem:[#allocation2 + $0x8d8] sm:$0xff] }
 0x242   :  { %v5730_v0 = vpop.eup %5729  ;;  %v3307_v1 = vpop.permute.xlu0 %3306  ;;  %5747 = vrcp.f32 %v1454_v56  ;;  %v1459_v3 = vadd.f32 1.0, %v5728_v61  ;;  %v2256_v61 = vld [vmem:[#allocation5 + $0x640] sm:$0xff] }
 0x243   :  { %v5732_v4 = vpop.eup %5731  ;;  %4266 = vst.msk [vmem:[#allocation7 + $0x608] sm:$0xff] %vm4072_vm0, %v3977_v62  ;;  %v3976_v5 = vmul.f32 %v3307_v1, %v2248_v59  ;;  %3626 = vperm.xlu0 %4673, %v5710_v30   ;;  %5749 = vrcp.f32 %v1457_v60  ;;  %v1458_v6 = vadd.f32 1.0, %v5730_v0 }
 0x244   :  { %v5734_v7 = vpop.eup %5733  ;;  %v3322_v8 = vpop.permute.xlu1 %3321  ;;  %5751 = vrcp.f32 %v1456_v63  ;;  %v1461_v10 = vadd.f32 1.0, %v5732_v4  ;;  %v322_v63 = vld [vmem:[#allocation2 + $0x8d0] sm:$0xff]  ;;  %v2259_v4 = vld [vmem:[#allocation5 + $0x658] sm:$0xff] }
 0x245   :  { %v5736_v12 = vpop.eup %5735  ;;  %4265 = vst.msk [vmem:[#allocation7 + $0x600] sm:$0xff] %vm4072_vm0, %v3976_v5  ;;  %v3979_v13 = vmul.f32 %v3322_v8, %v2251_v2  ;;  %3641 = vperm.xlu1 %4674, %v6221_v34   ;;  %5753 = vrcp.f32 %v1459_v3  ;;  %v1460_v14 = vadd.f32 1.0, %v5734_v7  ;;  %v4662_v5 = vmul.f32 -1.442695, %v323_v58 }
 0x246   :  { %v5738_v16 = vpop.eup %5737  ;;  %v3317_v17 = vpop.permute.xlu0 %3316  ;;  %5755 = vrcp.f32 %v1458_v6  ;;  %v1463_v19 = vadd.f32 1.0, %v5736_v12  ;;  %v4661_v8 = vmul.f32 -1.442695, %v322_v63  ;;  %v325_v12 = vld [vmem:[#allocation2 + $0x8e8] sm:$0xff] }
 0x247   :  { %4268 = vst.msk [vmem:[#allocation7 + $0x618] sm:$0xff] %vm4072_vm0, %v3979_v13  ;;  %v3978_v21 = vmul.f32 %v3317_v17, %v2250_v9  ;;  %3636 = vperm.xlu0 %4673, %v6224_v36   ;;  %5757 = vrcp.f32 %v1461_v10  ;;  %v1462_v22 = vadd.f32 1.0, %v5738_v16  ;;  %v2255_v36 = vld [vmem:[#allocation5 + $0x638] sm:$0xff]  ;;  %v2261_v17 = vld [vmem:[#allocation5 + $0x668] sm:$0xff] }
 0x248   :  { %v5740_v25 = vpop.eup %5739  ;;  %v3332_v26 = vpop.permute.xlu1 %3331  ;;  %5759 = vrcp.f32 %v1460_v14 }
 0x249   :  { %v5742_v30 = vpop.eup %5741  ;;  %4267 = vst.msk [vmem:[#allocation7 + $0x610] sm:$0xff] %vm4072_vm0, %v3978_v21  ;;  %v3981_v31 = vmul.f32 %v3332_v26, %v2253_v18  ;;  %3651 = vperm.xlu1 %4674, %v5740_v25   ;;  %5761 = vrcp.f32 %v1463_v19  ;;  %v324_v19 = vld [vmem:[#allocation2 + $0x8e0] sm:$0xff] }
 0x24a   :  { %v5744_v34 = vpop.eup %5743  ;;  %v3327_v35 = vpop.permute.xlu0 %3326  ;;  %5763 = vrcp.f32 %v1462_v22  ;;  %v2260_v26 = vld [vmem:[#allocation5 + $0x660] sm:$0xff] }
 0x24b   :  { %v5746_v39 = vpop.eup %5745  ;;  %4270 = vst.msk [vmem:[#allocation7 + $0x628] sm:$0xff] %vm4072_vm0, %v3981_v31  ;;  %v3980_v40 = vmul.f32 %v3327_v35, %v2252_v27  ;;  %3646 = vperm.xlu0 %4673, %v5742_v30   ;;  %5765 = vpow2.f32 %v4651_v23  ;;  %v4664_v23 = vmul.f32 -1.442695, %v325_v12  ;;  %v4663_v31 = vmul.f32 -1.442695, %v324_v19 }
 0x24c   :  { %v5748_v43 = vpop.eup %5747  ;;  %v3342_v44 = vpop.permute.xlu1 %3341  ;;  %5767 = vpow2.f32 %v4654_v28  ;;  %v1465_v62 = vadd.f32 1.0, %v5746_v39 }
 0x24d   :  { %v5750_v48 = vpop.eup %5749  ;;  %4269 = vst.msk [vmem:[#allocation7 + $0x620] sm:$0xff] %vm4072_vm0, %v3980_v40  ;;  %v3983_v49 = vmul.f32 %v3342_v44, %v2255_v36  ;;  %3661 = vperm.xlu1 %4674, %v5744_v34   ;;  %5769 = vpow2.f32 %v4653_v32  ;;  %v2263_v34 = vld [vmem:[#allocation5 + $0x678] sm:$0xff]  ;;  %v2262_v40 = vld [vmem:[#allocation5 + $0x670] sm:$0xff] }
 0x24e   :  { %v5752_v51 = vpop.eup %5751  ;;  %v3337_v52 = vpop.permute.xlu0 %3336  ;;  %5771 = vpow2.f32 %v4656_v37 }
 0x24f   :  { %v5754_v55 = vpop.eup %5753  ;;  %4272 = vst.msk [vmem:[#allocation7 + $0x638] sm:$0xff] %vm4072_vm0, %v3983_v49  ;;  %v3982_v56 = vmul.f32 %v3337_v52, %v2254_v45  ;;  %3656 = vperm.xlu0 %4673, %v5748_v43   ;;  %5773 = vpow2.f32 %v4655_v41 }
 0x250   :  { %v5756_v59 = vpop.eup %5755  ;;  %v3352_v60 = vpop.permute.xlu1 %3351  ;;  %5775 = vpow2.f32 %v4658_v46  ;;  %v2265_v46 = vld [vmem:[#allocation5 + $0x688] sm:$0xff] }
 0x251   :  { %v5758_v0 = vpop.eup %5757  ;;  %4271 = vst.msk [vmem:[#allocation7 + $0x630] sm:$0xff] %vm4072_vm0, %v3982_v56  ;;  %v3985_v1 = vmul.f32 %v3352_v60, %v2257_v53  ;;  %3671 = vperm.xlu1 %4674, %v5750_v48   ;;  %5777 = vpow2.f32 %v4657_v50  ;;  %v327_v48 = vld [vmem:[#allocation2 + $0x8f8] sm:$0xff] }
 0x252   :  { %v5760_v2 = vpop.eup %5759  ;;  %v3347_v3 = vpop.permute.xlu0 %3346  ;;  %5779 = vpow2.f32 %v4660_v54  ;;  %v2264_v54 = vld [vmem:[#allocation5 + $0x680] sm:$0xff]  ;;  %v4666_v58 = vmul.f32 -1.442695, %v327_v48 }
 0x253   :  { %v5762_v6 = vpop.eup %5761  ;;  %4274 = vst.msk [vmem:[#allocation7 + $0x648] sm:$0xff] %vm4072_vm0, %v3985_v1  ;;  %v3984_v7 = vmul.f32 %v3347_v3, %v2256_v61  ;;  %3666 = vperm.xlu0 %4673, %v5752_v51   ;;  %5781 = vpow2.f32 %v4659_v57  ;;  %v326_v51 = vld [vmem:[#allocation2 + $0x8f0] sm:$0xff]  ;;  %v2267_v61 = vld [vmem:[#allocation5 + $0x698] sm:$0xff] }
 0x254   :  { %v5764_v9 = vpop.eup %5763  ;;  %v3362_v10 = vpop.permute.xlu1 %3361  ;;  %5783 = vrcp.f32 %v1465_v62  ;;  %v4665_v62 = vmul.f32 -1.442695, %v326_v51  ;;  %v2266_v3 = vld [vmem:[#allocation5 + $0x690] sm:$0xff] }
 0x255   :  { %v5766_v13 = vpop.eup %5765  ;;  %4273 = vst.msk [vmem:[#allocation7 + $0x640] sm:$0xff] %vm4072_vm0, %v3984_v7  ;;  %v3987_v14 = vmul.f32 %v3362_v10, %v2259_v4  ;;  %3681 = vperm.xlu1 %4674, %v5754_v55   ;;  %5785 = vpow2.f32 %v4662_v5 }
 0x256   :  { %v5768_v15 = vpop.eup %5767  ;;  %v3357_v16 = vpop.permute.xlu0 %3356  ;;  %v1464_v18 = vadd.f32 1.0, %v5766_v13  ;;  %5787 = vpow2.f32 %v4661_v8 }
 0x257   :  { %v5770_v20 = vpop.eup %5769  ;;  %4276 = vst.msk [vmem:[#allocation7 + $0x658] sm:$0xff] %vm4072_vm0, %v3987_v14  ;;  %v3986_v21 = vmul.f32 %v3357_v16, %v2258_v11  ;;  %3676 = vperm.xlu0 %4673, %v5756_v59   ;;  %v1467_v22 = vadd.f32 1.0, %v5768_v15  ;;  %v2268_v15 = vld [vmem:[#allocation5 + $0x6a0] sm:$0xff] }
 0x258   :  { %v5772_v24 = vpop.eup %5771  ;;  %v3372_v25 = vpop.permute.xlu1 %3371  ;;  %5789 = vrcp.f32 %v1464_v18  ;;  %v1466_v27 = vadd.f32 1.0, %v5770_v20  ;;  %v2271_v20 = vld [vmem:[#allocation5 + $0x6b8] sm:$0xff] }
 0x259   :  { %v5774_v28 = vpop.eup %5773  ;;  %4275 = vst.msk [vmem:[#allocation7 + $0x650] sm:$0xff] %vm4072_vm0, %v3986_v21  ;;  %v3989_v29 = vmul.f32 %v3372_v25, %v2261_v17  ;;  %3691 = vperm.xlu1 %4674, %v5758_v0   ;;  %5791 = vrcp.f32 %v1467_v22  ;;  %v1469_v30 = vadd.f32 1.0, %v5772_v24  ;;  %v2270_v25 = vld [vmem:[#allocation5 + $0x6b0] sm:$0xff] }
 0x25a   :  { %v5776_v32 = vpop.eup %5775  ;;  %v3367_v33 = vpop.permute.xlu0 %3366  ;;  %5793 = vrcp.f32 %v1466_v27  ;;  %v1468_v35 = vadd.f32 1.0, %v5774_v28 }
 0x25b   :  { %v5778_v36 = vpop.eup %5777  ;;  %4278 = vst.msk [vmem:[#allocation7 + $0x668] sm:$0xff] %vm4072_vm0, %v3989_v29  ;;  %v3988_v37 = vmul.f32 %v3367_v33, %v2260_v26  ;;  %3686 = vperm.xlu0 %4673, %v5760_v2   ;;  %5795 = vpow2.f32 %v4664_v23  ;;  %v1471_v41 = vadd.f32 1.0, %v5776_v32 }
 0x25c   :  { %v5780_v38 = vpop.eup %5779  ;;  %v3382_v39 = vpop.permute.xlu1 %3381  ;;  %5797 = vrcp.f32 %v1469_v30  ;;  %v1470_v47 = vadd.f32 1.0, %v5778_v36  ;;  %v2273_v30 = vld [vmem:[#allocation5 + $0x6c8] sm:$0xff] }
 0x25d   :  { %v5782_v42 = vpop.eup %5781  ;;  %4277 = vst.msk [vmem:[#allocation7 + $0x660] sm:$0xff] %vm4072_vm0, %v3988_v37  ;;  %v3991_v43 = vmul.f32 %v3382_v39, %v2263_v34  ;;  %3701 = vperm.xlu1 %4674, %v5762_v6   ;;  %5799 = vpow2.f32 %v4663_v31  ;;  %v1473_v50 = vadd.f32 1.0, %v5780_v38 }
 0x25e   :  { %v5784_v44 = vpop.eup %5783  ;;  %v3377_v45 = vpop.permute.xlu0 %3376  ;;  %5801 = vrcp.f32 %v1468_v35  ;;  %v1472_v55 = vadd.f32 1.0, %v5782_v42  ;;  %v2272_v35 = vld [vmem:[#allocation5 + $0x6c0] sm:$0xff] }
 0x25f   :  { %4280 = vst.msk [vmem:[#allocation7 + $0x678] sm:$0xff] %vm4072_vm0, %v3991_v43  ;;  %v3990_v49 = vmul.f32 %v3377_v45, %v2262_v40  ;;  %3696 = vperm.xlu0 %4673, %v5764_v9   ;;  %v5786_v52 = vpop.eup %5785  ;;  %5803 = vrcp.f32 %v1471_v41  ;;  %v2269_v9 = vld [vmem:[#allocation5 + $0x6a8] sm:$0xff]  ;;  %v2275_v41 = vld [vmem:[#allocation5 + $0x6d8] sm:$0xff]  ;;  %v2274_v45 = vld [vmem:[#allocation5 + $0x6d0] sm:$0xff] }
 0x260   :  { %v3392_v53 = vpop.permute.xlu1 %3391  ;;  %v5788_v56 = vpop.eup %5787  ;;  %5805 = vrcp.f32 %v1470_v47  ;;  %v1475_v4 = vadd.f32 1.0, %v5786_v52 }
 0x261   :  { %4279 = vst.msk [vmem:[#allocation7 + $0x670] sm:$0xff] %vm4072_vm0, %v3990_v49  ;;  %v3993_v57 = vmul.f32 %v3392_v53, %v2265_v46  ;;  %3711 = vperm.xlu1 %4674, %v5784_v44   ;;  %5807 = vrcp.f32 %v1473_v50  ;;  %v1474_v10 = vadd.f32 1.0, %v5788_v56  ;;  %v2277_v49 = vld [vmem:[#allocation5 + $0x6e8] sm:$0xff]  ;;  %v2276_v53 = vld [vmem:[#allocation5 + $0x6e0] sm:$0xff]  ;;  %v2279_v56 = vld [vmem:[#allocation5 + $0x6f8] sm:$0xff] }
 0x262   :  { %v5790_v59 = vpop.eup %5789  ;;  %v3387_v60 = vpop.permute.xlu0 %3386  ;;  %5809 = vrcp.f32 %v1472_v55 }
 0x263   :  { %v5792_v63 = vpop.eup %5791  ;;  %4282 = vst.msk [vmem:[#allocation7 + $0x688] sm:$0xff] %vm4072_vm0, %v3993_v57  ;;  %v3992_v0 = vmul.f32 %v3387_v60, %v2264_v54  ;;  %3706 = vperm.xlu0 %4673, %v5790_v59   ;;  %5811 = vpow2.f32 %v4666_v58  ;;  %v2278_v60 = vld [vmem:[#allocation5 + $0x6f0] sm:$0xff] }
 0x264   :  { %v5794_v1 = vpop.eup %5793  ;;  %v3402_v2 = vpop.permute.xlu1 %3401  ;;  %5813 = vpow2.f32 %v4665_v62 }
 0x265   :  { %v5796_v5 = vpop.eup %5795  ;;  %4281 = vst.msk [vmem:[#allocation7 + $0x680] sm:$0xff] %vm4072_vm0, %v3992_v0  ;;  %v3995_v6 = vmul.f32 %v3402_v2, %v2267_v61  ;;  %3721 = vperm.xlu1 %4674, %v5792_v63   ;;  %5815 = vrcp.f32 %v1475_v4  ;;  %v2281_v0 = vld [vmem:[#allocation5 + $0x708] sm:$0xff] }
 0x266   :  { %v5798_v7 = vpop.eup %5797  ;;  %v3397_v8 = vpop.permute.xlu0 %3396  ;;  %v1477_v16 = vadd.f32 1.0, %v5796_v5  ;;  %5817 = vrcp.f32 %v1474_v10 }
 0x267   :  { %v5800_v11 = vpop.eup %5799  ;;  %4284 = vst.msk [vmem:[#allocation7 + $0x698] sm:$0xff] %vm4072_vm0, %v3995_v6  ;;  %v3994_v12 = vmul.f32 %v3397_v8, %v2266_v3  ;;  %3716 = vperm.xlu0 %4673, %v5794_v1   ;;  %v2280_v3 = vld [vmem:[#allocation5 + $0x700] sm:$0xff]  ;;  %v2283_v6 = vld [vmem:[#allocation5 + $0x718] sm:$0xff] }
 0x268   :  { %v5802_v13 = vpop.eup %5801  ;;  %v3412_v14 = vpop.permute.xlu1 %3411  ;;  %v1476_v21 = vadd.f32 1.0, %v5800_v11  ;;  %5819 = vrcp.f32 %v1477_v16 }
 0x269   :  { %4283 = vst.msk [vmem:[#allocation7 + $0x690] sm:$0xff] %vm4072_vm0, %v3994_v12  ;;  %v3997_v17 = vmul.f32 %v3412_v14, %v2269_v9  ;;  %3731 = vperm.xlu1 %4674, %v5798_v7   ;;  %v5804_v18 = vpop.eup %5803  ;;  %v2282_v9 = vld [vmem:[#allocation5 + $0x710] sm:$0xff]  ;;  %v2285_v12 = vld [vmem:[#allocation5 + $0x728] sm:$0xff] }
 0x26a   :  { %v3407_v19 = vpop.permute.xlu0 %3406  ;;  %v5806_v23 = vpop.eup %5805  ;;  %5821 = vrcp.f32 %v1476_v21  ;;  %v2286_v21 = vld [vmem:[#allocation5 + $0x730] sm:$0xff] }
 0x26b   :  { %4286 = vst.msk [vmem:[#allocation7 + $0x6a8] sm:$0xff] %vm4072_vm0, %v3997_v17  ;;  %v3996_v22 = vmul.f32 %v3407_v19, %v2268_v15  ;;  %3726 = vperm.xlu0 %4673, %v5802_v13   ;;  %v5808_v26 = vpop.eup %5807  ;;  %v2284_v15 = vld [vmem:[#allocation5 + $0x720] sm:$0xff] }
 0x26c   :  { %v3422_v24 = vpop.permute.xlu1 %3421  ;;  %v5810_v28 = vpop.eup %5809 }
 0x26d   :  { %4285 = vst.msk [vmem:[#allocation7 + $0x6a0] sm:$0xff] %vm4072_vm0, %v3996_v22  ;;  %v3999_v27 = vmul.f32 %v3422_v24, %v2271_v20  ;;  %3741 = vperm.xlu1 %4674, %v5804_v18   ;;  %v5812_v31 = vpop.eup %5811  ;;  %v2287_v18 = vld [vmem:[#allocation5 + $0x738] sm:$0xff]  ;;  %v2289_v24 = vld [vmem:[#allocation5 + $0x748] sm:$0xff] }
 0x26e   :  { %v3417_v29 = vpop.permute.xlu0 %3416  ;;  %v5814_v33 = vpop.eup %5813  ;;  %v1479_v36 = vadd.f32 1.0, %v5812_v31 }
 0x26f   :  { %4288 = vst.msk [vmem:[#allocation7 + $0x6b8] sm:$0xff] %vm4072_vm0, %v3999_v27  ;;  %v3998_v32 = vmul.f32 %v3417_v29, %v2270_v25  ;;  %3736 = vperm.xlu0 %4673, %v5806_v23   ;;  %v1478_v38 = vadd.f32 1.0, %v5814_v33  ;;  %v5816_v39 = vpop.eup %5815  ;;  %v2288_v27 = vld [vmem:[#allocation5 + $0x740] sm:$0xff]  ;;  %v2290_v33 = vld [vmem:[#allocation5 + $0x750] sm:$0xff] }
 0x270   :  { %v3432_v34 = vpop.permute.xlu1 %3431  ;;  %5823 = vrcp.f32 %v1479_v36  ;;  %v5818_v43 = vpop.eup %5817  ;;  %v2293_v36 = vld [vmem:[#allocation5 + $0x768] sm:$0xff] }
 0x271   :  { %4287 = vst.msk [vmem:[#allocation7 + $0x6b0] sm:$0xff] %vm4072_vm0, %v3998_v32  ;;  %v4001_v37 = vmul.f32 %v3432_v34, %v2273_v30  ;;  %3751 = vperm.xlu1 %4674, %v5808_v26   ;;  %5825 = vrcp.f32 %v1478_v38  ;;  %v2291_v30 = vld [vmem:[#allocation5 + $0x758] sm:$0xff] }
 0x272   :  { %v3427_v40 = vpop.permute.xlu0 %3426  ;;  %v5820_v47 = vpop.eup %5819 }
 0x273   :  { %4290 = vst.msk [vmem:[#allocation7 + $0x6c8] sm:$0xff] %vm4072_vm0, %v4001_v37  ;;  %v4000_v42 = vmul.f32 %v3427_v40, %v2272_v35  ;;  %3746 = vperm.xlu0 %4673, %v5810_v28  }
 0x274   :  { %v3442_v44 = vpop.permute.xlu1 %3441  ;;  %v5822_v51 = vpop.eup %5821 }
 0x275   :  { %4289 = vst.msk [vmem:[#allocation7 + $0x6c0] sm:$0xff] %vm4072_vm0, %v4000_v42  ;;  %v4003_v46 = vmul.f32 %v3442_v44, %v2275_v41  ;;  %3761 = vperm.xlu1 %4674, %v5816_v39   ;;  %v2292_v39 = vld [vmem:[#allocation5 + $0x760] sm:$0xff]  ;;  %v2295_v42 = vld [vmem:[#allocation5 + $0x778] sm:$0xff] }
 0x276   :  { %v3437_v48 = vpop.permute.xlu0 %3436 }
 0x277   :  { %4292 = vst.msk [vmem:[#allocation7 + $0x6d8] sm:$0xff] %vm4072_vm0, %v4003_v46  ;;  %v4002_v50 = vmul.f32 %v3437_v48, %v2274_v45  ;;  %3756 = vperm.xlu0 %4673, %v5818_v43   ;;  %v2294_v45 = vld [vmem:[#allocation5 + $0x770] sm:$0xff]  ;;  %v2297_v48 = vld [vmem:[#allocation5 + $0x788] sm:$0xff] }
 0x278   :  { %v3452_v52 = vpop.permute.xlu1 %3451 }
 0x279   :  { %4291 = vst.msk [vmem:[#allocation7 + $0x6d0] sm:$0xff] %vm4072_vm0, %v4002_v50  ;;  %v4005_v54 = vmul.f32 %v3452_v52, %v2277_v49  ;;  %3771 = vperm.xlu1 %4674, %v5820_v47  }
 0x27a   :  { %v3447_v55 = vpop.permute.xlu0 %3446  ;;  %v5824_v58 = vpop.eup %5823 }
 0x27b   :  { %4294 = vst.msk [vmem:[#allocation7 + $0x6e8] sm:$0xff] %vm4072_vm0, %v4005_v54  ;;  %v4004_v57 = vmul.f32 %v3447_v55, %v2276_v53  ;;  %3766 = vperm.xlu0 %4673, %v5822_v51   ;;  %v5826_v61 = vpop.eup %5825  ;;  %v2296_v51 = vld [vmem:[#allocation5 + $0x780] sm:$0xff]  ;;  %v2299_v54 = vld [vmem:[#allocation5 + $0x798] sm:$0xff] }
 0x27c   :  { %v3462_v59 = vpop.permute.xlu1 %3461 }
 0x27d   :  { %4293 = vst.msk [vmem:[#allocation7 + $0x6e0] sm:$0xff] %vm4072_vm0, %v4004_v57  ;;  %v4007_v62 = vmul.f32 %v3462_v59, %v2279_v56  ;;  %3781 = vperm.xlu1 %4674, %v5824_v58   ;;  %v2298_v57 = vld [vmem:[#allocation5 + $0x790] sm:$0xff] }
 0x27e   :  { %v3457_v63 = vpop.permute.xlu0 %3456 }
 0x27f   :  { %4296 = vst.msk [vmem:[#allocation7 + $0x6f8] sm:$0xff] %vm4072_vm0, %v4007_v62  ;;  %v4006_v1 = vmul.f32 %v3457_v63, %v2278_v60  ;;  %3776 = vperm.xlu0 %4673, %v5826_v61   ;;  %v2301_v60 = vld [vmem:[#allocation5 + $0x7a8] sm:$0xff]  ;;  %v2300_v63 = vld [vmem:[#allocation5 + $0x7a0] sm:$0xff] }
 0x280   :  { %v3472_v2 = vpop.permute.xlu1 %3471 }
 0x281   :  { %4295 = vst.msk [vmem:[#allocation7 + $0x6f0] sm:$0xff] %vm4072_vm0, %v4006_v1  ;;  %v4009_v4 = vmul.f32 %v3472_v2, %v2281_v0  ;;  %v2303_v2 = vld [vmem:[#allocation5 + $0x7b8] sm:$0xff] }
 0x282   :  { %v3467_v5 = vpop.permute.xlu0 %3466 }
 0x283   :  { %4298 = vst.msk [vmem:[#allocation7 + $0x708] sm:$0xff] %vm4072_vm0, %v4009_v4  ;;  %v4008_v7 = vmul.f32 %v3467_v5, %v2280_v3  ;;  %v2302_v5 = vld [vmem:[#allocation5 + $0x7b0] sm:$0xff] }
 0x284   :  { %v3482_v8 = vpop.permute.xlu1 %3481 }
 0x285   :  { %4297 = vst.msk [vmem:[#allocation7 + $0x700] sm:$0xff] %vm4072_vm0, %v4008_v7  ;;  %v4011_v10 = vmul.f32 %v3482_v8, %v2283_v6  ;;  %v2305_v8 = vld [vmem:[#allocation5 + $0x7c8] sm:$0xff] }
 0x286   :  { %v3477_v11 = vpop.permute.xlu0 %3476 }
 0x287   :  { %4300 = vst.msk [vmem:[#allocation7 + $0x718] sm:$0xff] %vm4072_vm0, %v4011_v10  ;;  %v4010_v13 = vmul.f32 %v3477_v11, %v2282_v9  ;;  %v2304_v11 = vld [vmem:[#allocation5 + $0x7c0] sm:$0xff] }
 0x288   :  { %v3492_v14 = vpop.permute.xlu1 %3491 }
 0x289   :  { %4299 = vst.msk [vmem:[#allocation7 + $0x710] sm:$0xff] %vm4072_vm0, %v4010_v13  ;;  %v4013_v16 = vmul.f32 %v3492_v14, %v2285_v12  ;;  %v2307_v14 = vld [vmem:[#allocation5 + $0x7d8] sm:$0xff] }
 0x28a   :  { %v3487_v17 = vpop.permute.xlu0 %3486 }
 0x28b   :  { %4302 = vst.msk [vmem:[#allocation7 + $0x728] sm:$0xff] %vm4072_vm0, %v4013_v16  ;;  %v4012_v19 = vmul.f32 %v3487_v17, %v2284_v15  ;;  %v2306_v17 = vld [vmem:[#allocation5 + $0x7d0] sm:$0xff] }
 0x28c   :  { %v3502_v20 = vpop.permute.xlu1 %3501 }
 0x28d   :  { %4301 = vst.msk [vmem:[#allocation7 + $0x720] sm:$0xff] %vm4072_vm0, %v4012_v19  ;;  %v4015_v22 = vmul.f32 %v3502_v20, %v2287_v18  ;;  %v2309_v20 = vld [vmem:[#allocation5 + $0x7e8] sm:$0xff] }
 0x28e   :  { %v3497_v23 = vpop.permute.xlu0 %3496 }
 0x28f   :  { %4304 = vst.msk [vmem:[#allocation7 + $0x738] sm:$0xff] %vm4072_vm0, %v4015_v22  ;;  %v4014_v25 = vmul.f32 %v3497_v23, %v2286_v21  ;;  %v2308_v23 = vld [vmem:[#allocation5 + $0x7e0] sm:$0xff] }
 0x290   :  { %v3512_v26 = vpop.permute.xlu1 %3511 }
 0x291   :  { %4303 = vst.msk [vmem:[#allocation7 + $0x730] sm:$0xff] %vm4072_vm0, %v4014_v25  ;;  %v4017_v28 = vmul.f32 %v3512_v26, %v2289_v24  ;;  %v2311_v26 = vld [vmem:[#allocation5 + $0x7f8] sm:$0xff] }
 0x292   :  { %v3507_v29 = vpop.permute.xlu0 %3506 }
 0x293   :  { %4306 = vst.msk [vmem:[#allocation7 + $0x748] sm:$0xff] %vm4072_vm0, %v4017_v28  ;;  %v4016_v31 = vmul.f32 %v3507_v29, %v2288_v27  ;;  %v2310_v29 = vld [vmem:[#allocation5 + $0x7f0] sm:$0xff] }
 0x294   :  { %v3522_v32 = vpop.permute.xlu1 %3521 }
 0x295   :  { %4305 = vst.msk [vmem:[#allocation7 + $0x740] sm:$0xff] %vm4072_vm0, %v4016_v31  ;;  %v4019_v34 = vmul.f32 %v3522_v32, %v2291_v30  ;;  %v2313_v32 = vld [vmem:[#allocation5 + $0x808] sm:$0xff] }
 0x296   :  { %v3517_v35 = vpop.permute.xlu0 %3516 }
 0x297   :  { %4308 = vst.msk [vmem:[#allocation7 + $0x758] sm:$0xff] %vm4072_vm0, %v4019_v34  ;;  %v4018_v37 = vmul.f32 %v3517_v35, %v2290_v33  ;;  %v2312_v35 = vld [vmem:[#allocation5 + $0x800] sm:$0xff] }
 0x298   :  { %v3532_v38 = vpop.permute.xlu1 %3531 }
 0x299   :  { %4307 = vst.msk [vmem:[#allocation7 + $0x750] sm:$0xff] %vm4072_vm0, %v4018_v37  ;;  %v4021_v40 = vmul.f32 %v3532_v38, %v2293_v36  ;;  %v2315_v38 = vld [vmem:[#allocation5 + $0x818] sm:$0xff] }
 0x29a   :  { %v3527_v41 = vpop.permute.xlu0 %3526 }
 0x29b   :  { %4310 = vst.msk [vmem:[#allocation7 + $0x768] sm:$0xff] %vm4072_vm0, %v4021_v40  ;;  %v4020_v43 = vmul.f32 %v3527_v41, %v2292_v39  ;;  %v2314_v41 = vld [vmem:[#allocation5 + $0x810] sm:$0xff] }
 0x29c   :  { %v3542_v44 = vpop.permute.xlu1 %3541 }
 0x29d   :  { %4309 = vst.msk [vmem:[#allocation7 + $0x760] sm:$0xff] %vm4072_vm0, %v4020_v43  ;;  %v4023_v46 = vmul.f32 %v3542_v44, %v2295_v42  ;;  %v2317_v44 = vld [vmem:[#allocation5 + $0x828] sm:$0xff] }
 0x29e   :  { %v3537_v47 = vpop.permute.xlu0 %3536 }
 0x29f   :  { %4312 = vst.msk [vmem:[#allocation7 + $0x778] sm:$0xff] %vm4072_vm0, %v4023_v46  ;;  %v4022_v49 = vmul.f32 %v3537_v47, %v2294_v45  ;;  %v2316_v47 = vld [vmem:[#allocation5 + $0x820] sm:$0xff] }
 0x2a0   :  { %v3552_v50 = vpop.permute.xlu1 %3551 }
 0x2a1   :  { %4311 = vst.msk [vmem:[#allocation7 + $0x770] sm:$0xff] %vm4072_vm0, %v4022_v49  ;;  %v4025_v52 = vmul.f32 %v3552_v50, %v2297_v48  ;;  %v2319_v50 = vld [vmem:[#allocation5 + $0x838] sm:$0xff] }
 0x2a2   :  { %v3547_v53 = vpop.permute.xlu0 %3546 }
 0x2a3   :  { %4314 = vst.msk [vmem:[#allocation7 + $0x788] sm:$0xff] %vm4072_vm0, %v4025_v52  ;;  %v4024_v55 = vmul.f32 %v3547_v53, %v2296_v51  ;;  %v2318_v53 = vld [vmem:[#allocation5 + $0x830] sm:$0xff] }
 0x2a4   :  { %v3562_v56 = vpop.permute.xlu1 %3561 }
 0x2a5   :  { %4313 = vst.msk [vmem:[#allocation7 + $0x780] sm:$0xff] %vm4072_vm0, %v4024_v55  ;;  %v4027_v58 = vmul.f32 %v3562_v56, %v2299_v54  ;;  %v2321_v56 = vld [vmem:[#allocation5 + $0x848] sm:$0xff] }
 0x2a6   :  { %v3557_v59 = vpop.permute.xlu0 %3556 }
 0x2a7   :  { %4316 = vst.msk [vmem:[#allocation7 + $0x798] sm:$0xff] %vm4072_vm0, %v4027_v58  ;;  %v4026_v61 = vmul.f32 %v3557_v59, %v2298_v57  ;;  %v2320_v59 = vld [vmem:[#allocation5 + $0x840] sm:$0xff] }
 0x2a8   :  { %v3572_v62 = vpop.permute.xlu1 %3571 }
 0x2a9   :  { %4315 = vst.msk [vmem:[#allocation7 + $0x790] sm:$0xff] %vm4072_vm0, %v4026_v61  ;;  %v4029_v0 = vmul.f32 %v3572_v62, %v2301_v60  ;;  %v2323_v62 = vld [vmem:[#allocation5 + $0x858] sm:$0xff] }
 0x2aa   :  { %v3567_v1 = vpop.permute.xlu0 %3566 }
 0x2ab   :  { %4318 = vst.msk [vmem:[#allocation7 + $0x7a8] sm:$0xff] %vm4072_vm0, %v4029_v0  ;;  %v4028_v3 = vmul.f32 %v3567_v1, %v2300_v63  ;;  %v2322_v1 = vld [vmem:[#allocation5 + $0x850] sm:$0xff] }
 0x2ac   :  { %v3582_v4 = vpop.permute.xlu1 %3581 }
 0x2ad   :  { %4317 = vst.msk [vmem:[#allocation7 + $0x7a0] sm:$0xff] %vm4072_vm0, %v4028_v3  ;;  %v4031_v6 = vmul.f32 %v3582_v4, %v2303_v2  ;;  %v2325_v4 = vld [vmem:[#allocation5 + $0x868] sm:$0xff] }
 0x2ae   :  { %v3577_v7 = vpop.permute.xlu0 %3576 }
 0x2af   :  { %4320 = vst.msk [vmem:[#allocation7 + $0x7b8] sm:$0xff] %vm4072_vm0, %v4031_v6  ;;  %v4030_v9 = vmul.f32 %v3577_v7, %v2302_v5  ;;  %v2324_v7 = vld [vmem:[#allocation5 + $0x860] sm:$0xff] }
 0x2b0   :  { %v3592_v10 = vpop.permute.xlu1 %3591 }
 0x2b1   :  { %4319 = vst.msk [vmem:[#allocation7 + $0x7b0] sm:$0xff] %vm4072_vm0, %v4030_v9  ;;  %v4033_v12 = vmul.f32 %v3592_v10, %v2305_v8  ;;  %v2327_v10 = vld [vmem:[#allocation5 + $0x878] sm:$0xff] }
 0x2b2   :  { %v3587_v13 = vpop.permute.xlu0 %3586 }
 0x2b3   :  { %4322 = vst.msk [vmem:[#allocation7 + $0x7c8] sm:$0xff] %vm4072_vm0, %v4033_v12  ;;  %v4032_v15 = vmul.f32 %v3587_v13, %v2304_v11  ;;  %v2326_v13 = vld [vmem:[#allocation5 + $0x870] sm:$0xff] }
 0x2b4   :  { %v3602_v16 = vpop.permute.xlu1 %3601 }
 0x2b5   :  { %4321 = vst.msk [vmem:[#allocation7 + $0x7c0] sm:$0xff] %vm4072_vm0, %v4032_v15  ;;  %v4035_v18 = vmul.f32 %v3602_v16, %v2307_v14  ;;  %v2329_v16 = vld [vmem:[#allocation5 + $0x888] sm:$0xff] }
 0x2b6   :  { %v3597_v19 = vpop.permute.xlu0 %3596 }
 0x2b7   :  { %4324 = vst.msk [vmem:[#allocation7 + $0x7d8] sm:$0xff] %vm4072_vm0, %v4035_v18  ;;  %v4034_v21 = vmul.f32 %v3597_v19, %v2306_v17  ;;  %v2328_v19 = vld [vmem:[#allocation5 + $0x880] sm:$0xff] }
 0x2b8   :  { %v3612_v22 = vpop.permute.xlu1 %3611 }
 0x2b9   :  { %4323 = vst.msk [vmem:[#allocation7 + $0x7d0] sm:$0xff] %vm4072_vm0, %v4034_v21  ;;  %v4037_v24 = vmul.f32 %v3612_v22, %v2309_v20  ;;  %v2331_v22 = vld [vmem:[#allocation5 + $0x898] sm:$0xff] }
 0x2ba   :  { %v3607_v25 = vpop.permute.xlu0 %3606 }
 0x2bb   :  { %4326 = vst.msk [vmem:[#allocation7 + $0x7e8] sm:$0xff] %vm4072_vm0, %v4037_v24  ;;  %v4036_v27 = vmul.f32 %v3607_v25, %v2308_v23  ;;  %v2330_v25 = vld [vmem:[#allocation5 + $0x890] sm:$0xff] }
 0x2bc   :  { %v3622_v28 = vpop.permute.xlu1 %3621 }
 0x2bd   :  { %4325 = vst.msk [vmem:[#allocation7 + $0x7e0] sm:$0xff] %vm4072_vm0, %v4036_v27  ;;  %v4039_v30 = vmul.f32 %v3622_v28, %v2311_v26  ;;  %v2333_v28 = vld [vmem:[#allocation5 + $0x8a8] sm:$0xff] }
 0x2be   :  { %v3617_v31 = vpop.permute.xlu0 %3616 }
 0x2bf   :  { %4328 = vst.msk [vmem:[#allocation7 + $0x7f8] sm:$0xff] %vm4072_vm0, %v4039_v30  ;;  %v4038_v33 = vmul.f32 %v3617_v31, %v2310_v29  ;;  %v2332_v31 = vld [vmem:[#allocation5 + $0x8a0] sm:$0xff] }
 0x2c0   :  { %v3632_v34 = vpop.permute.xlu1 %3631 }
 0x2c1   :  { %4327 = vst.msk [vmem:[#allocation7 + $0x7f0] sm:$0xff] %vm4072_vm0, %v4038_v33  ;;  %v4041_v36 = vmul.f32 %v3632_v34, %v2313_v32  ;;  %v2335_v34 = vld [vmem:[#allocation5 + $0x8b8] sm:$0xff] }
 0x2c2   :  { %v3627_v37 = vpop.permute.xlu0 %3626 }
 0x2c3   :  { %4330 = vst.msk [vmem:[#allocation7 + $0x808] sm:$0xff] %vm4072_vm0, %v4041_v36  ;;  %v4040_v39 = vmul.f32 %v3627_v37, %v2312_v35  ;;  %v2334_v37 = vld [vmem:[#allocation5 + $0x8b0] sm:$0xff] }
 0x2c4   :  { %v3642_v40 = vpop.permute.xlu1 %3641 }
 0x2c5   :  { %4329 = vst.msk [vmem:[#allocation7 + $0x800] sm:$0xff] %vm4072_vm0, %v4040_v39  ;;  %v4043_v42 = vmul.f32 %v3642_v40, %v2315_v38  ;;  %v2337_v40 = vld [vmem:[#allocation5 + $0x8c8] sm:$0xff] }
 0x2c6   :  { %v3637_v43 = vpop.permute.xlu0 %3636 }
 0x2c7   :  { %4332 = vst.msk [vmem:[#allocation7 + $0x818] sm:$0xff] %vm4072_vm0, %v4043_v42  ;;  %v4042_v45 = vmul.f32 %v3637_v43, %v2314_v41  ;;  %v2336_v43 = vld [vmem:[#allocation5 + $0x8c0] sm:$0xff] }
 0x2c8   :  { %v3652_v46 = vpop.permute.xlu1 %3651 }
 0x2c9   :  { %4331 = vst.msk [vmem:[#allocation7 + $0x810] sm:$0xff] %vm4072_vm0, %v4042_v45  ;;  %v4045_v48 = vmul.f32 %v3652_v46, %v2317_v44  ;;  %v2339_v46 = vld [vmem:[#allocation5 + $0x8d8] sm:$0xff] }
 0x2ca   :  { %v3647_v49 = vpop.permute.xlu0 %3646 }
 0x2cb   :  { %4334 = vst.msk [vmem:[#allocation7 + $0x828] sm:$0xff] %vm4072_vm0, %v4045_v48  ;;  %v4044_v51 = vmul.f32 %v3647_v49, %v2316_v47  ;;  %v2338_v49 = vld [vmem:[#allocation5 + $0x8d0] sm:$0xff] }
 0x2cc   :  { %v3662_v52 = vpop.permute.xlu1 %3661 }
 0x2cd   :  { %4333 = vst.msk [vmem:[#allocation7 + $0x820] sm:$0xff] %vm4072_vm0, %v4044_v51  ;;  %v4047_v54 = vmul.f32 %v3662_v52, %v2319_v50  ;;  %v2341_v52 = vld [vmem:[#allocation5 + $0x8e8] sm:$0xff] }
 0x2ce   :  { %v3657_v55 = vpop.permute.xlu0 %3656 }
 0x2cf   :  { %4336 = vst.msk [vmem:[#allocation7 + $0x838] sm:$0xff] %vm4072_vm0, %v4047_v54  ;;  %v4046_v57 = vmul.f32 %v3657_v55, %v2318_v53  ;;  %v2340_v55 = vld [vmem:[#allocation5 + $0x8e0] sm:$0xff] }
 0x2d0   :  { %v3672_v58 = vpop.permute.xlu1 %3671 }
 0x2d1   :  { %4335 = vst.msk [vmem:[#allocation7 + $0x830] sm:$0xff] %vm4072_vm0, %v4046_v57  ;;  %v4049_v60 = vmul.f32 %v3672_v58, %v2321_v56  ;;  %v2343_v58 = vld [vmem:[#allocation5 + $0x8f8] sm:$0xff] }
 0x2d2   :  { %v3667_v61 = vpop.permute.xlu0 %3666 }
 0x2d3   :  { %4338 = vst.msk [vmem:[#allocation7 + $0x848] sm:$0xff] %vm4072_vm0, %v4049_v60  ;;  %v4048_v63 = vmul.f32 %v3667_v61, %v2320_v59  ;;  %v2342_v61 = vld [vmem:[#allocation5 + $0x8f0] sm:$0xff] }
 0x2d4   :  { %v3682_v0 = vpop.permute.xlu1 %3681 }
 0x2d5   :  { %4337 = vst.msk [vmem:[#allocation7 + $0x840] sm:$0xff] %vm4072_vm0, %v4048_v63  ;;  %v4051_v2 = vmul.f32 %v3682_v0, %v2323_v62 }
 0x2d6   :  { %v3677_v3 = vpop.permute.xlu0 %3676 }
 0x2d7   :  { %4340 = vst.msk [vmem:[#allocation7 + $0x858] sm:$0xff] %vm4072_vm0, %v4051_v2  ;;  %v4050_v5 = vmul.f32 %v3677_v3, %v2322_v1 }
 0x2d8   :  { %v3692_v6 = vpop.permute.xlu1 %3691 }
 0x2d9   :  { %4339 = vst.msk [vmem:[#allocation7 + $0x850] sm:$0xff] %vm4072_vm0, %v4050_v5  ;;  %v4053_v8 = vmul.f32 %v3692_v6, %v2325_v4 }
 0x2da   :  { %v3687_v9 = vpop.permute.xlu0 %3686 }
 0x2db   :  { %4342 = vst.msk [vmem:[#allocation7 + $0x868] sm:$0xff] %vm4072_vm0, %v4053_v8  ;;  %v4052_v11 = vmul.f32 %v3687_v9, %v2324_v7 }
 0x2dc   :  { %v3702_v12 = vpop.permute.xlu1 %3701 }
 0x2dd   :  { %4341 = vst.msk [vmem:[#allocation7 + $0x860] sm:$0xff] %vm4072_vm0, %v4052_v11  ;;  %v4055_v14 = vmul.f32 %v3702_v12, %v2327_v10 }
 0x2de   :  { %v3697_v15 = vpop.permute.xlu0 %3696 }
 0x2df   :  { %4344 = vst.msk [vmem:[#allocation7 + $0x878] sm:$0xff] %vm4072_vm0, %v4055_v14  ;;  %v4054_v17 = vmul.f32 %v3697_v15, %v2326_v13 }
 0x2e0   :  { %v3712_v18 = vpop.permute.xlu1 %3711 }
 0x2e1   :  { %4343 = vst.msk [vmem:[#allocation7 + $0x870] sm:$0xff] %vm4072_vm0, %v4054_v17  ;;  %v4057_v20 = vmul.f32 %v3712_v18, %v2329_v16 }
 0x2e2   :  { %v3707_v21 = vpop.permute.xlu0 %3706 }
 0x2e3   :  { %4346 = vst.msk [vmem:[#allocation7 + $0x888] sm:$0xff] %vm4072_vm0, %v4057_v20  ;;  %v4056_v23 = vmul.f32 %v3707_v21, %v2328_v19 }
 0x2e4   :  { %v3722_v24 = vpop.permute.xlu1 %3721 }
 0x2e5   :  { %4345 = vst.msk [vmem:[#allocation7 + $0x880] sm:$0xff] %vm4072_vm0, %v4056_v23  ;;  %v4059_v26 = vmul.f32 %v3722_v24, %v2331_v22 }
 0x2e6   :  { %v3717_v27 = vpop.permute.xlu0 %3716 }
 0x2e7   :  { %4348 = vst.msk [vmem:[#allocation7 + $0x898] sm:$0xff] %vm4072_vm0, %v4059_v26  ;;  %v4058_v29 = vmul.f32 %v3717_v27, %v2330_v25 }
 0x2e8   :  { %v3732_v30 = vpop.permute.xlu1 %3731 }
 0x2e9   :  { %4347 = vst.msk [vmem:[#allocation7 + $0x890] sm:$0xff] %vm4072_vm0, %v4058_v29  ;;  %v4061_v32 = vmul.f32 %v3732_v30, %v2333_v28 }
 0x2ea   :  { %v3727_v33 = vpop.permute.xlu0 %3726 }
 0x2eb   :  { %4350 = vst.msk [vmem:[#allocation7 + $0x8a8] sm:$0xff] %vm4072_vm0, %v4061_v32  ;;  %v4060_v35 = vmul.f32 %v3727_v33, %v2332_v31 }
 0x2ec   :  { %v3742_v36 = vpop.permute.xlu1 %3741 }
 0x2ed   :  { %4349 = vst.msk [vmem:[#allocation7 + $0x8a0] sm:$0xff] %vm4072_vm0, %v4060_v35  ;;  %v4063_v38 = vmul.f32 %v3742_v36, %v2335_v34 }
 0x2ee   :  { %v3737_v39 = vpop.permute.xlu0 %3736 }
 0x2ef   :  { %4352 = vst.msk [vmem:[#allocation7 + $0x8b8] sm:$0xff] %vm4072_vm0, %v4063_v38  ;;  %v4062_v41 = vmul.f32 %v3737_v39, %v2334_v37 }
 0x2f0   :  { %v3752_v42 = vpop.permute.xlu1 %3751 }
 0x2f1   :  { %4351 = vst.msk [vmem:[#allocation7 + $0x8b0] sm:$0xff] %vm4072_vm0, %v4062_v41  ;;  %v4065_v44 = vmul.f32 %v3752_v42, %v2337_v40 }
 0x2f2   :  { %v3747_v45 = vpop.permute.xlu0 %3746 }
 0x2f3   :  { %4354 = vst.msk [vmem:[#allocation7 + $0x8c8] sm:$0xff] %vm4072_vm0, %v4065_v44  ;;  %v4064_v47 = vmul.f32 %v3747_v45, %v2336_v43 }
 0x2f4   :  { %v3762_v48 = vpop.permute.xlu1 %3761 }
 0x2f5   :  { %4353 = vst.msk [vmem:[#allocation7 + $0x8c0] sm:$0xff] %vm4072_vm0, %v4064_v47  ;;  %v4067_v50 = vmul.f32 %v3762_v48, %v2339_v46 }
 0x2f6   :  { %v3757_v51 = vpop.permute.xlu0 %3756 }
 0x2f7   :  { %4356 = vst.msk [vmem:[#allocation7 + $0x8d8] sm:$0xff] %vm4072_vm0, %v4067_v50  ;;  %v4066_v53 = vmul.f32 %v3757_v51, %v2338_v49 }
 0x2f8   :  { %v3772_v54 = vpop.permute.xlu1 %3771 }
 0x2f9   :  { %4355 = vst.msk [vmem:[#allocation7 + $0x8d0] sm:$0xff] %vm4072_vm0, %v4066_v53  ;;  %v4069_v56 = vmul.f32 %v3772_v54, %v2341_v52 }
 0x2fa   :  { %v3767_v57 = vpop.permute.xlu0 %3766 }
 0x2fb   :  { %4358 = vst.msk [vmem:[#allocation7 + $0x8e8] sm:$0xff] %vm4072_vm0, %v4069_v56  ;;  %v4068_v59 = vmul.f32 %v3767_v57, %v2340_v55 }
 0x2fc   :  { %v3782_v60 = vpop.permute.xlu1 %3781 }
 0x2fd   :  { %4357 = vst.msk [vmem:[#allocation7 + $0x8e0] sm:$0xff] %vm4072_vm0, %v4068_v59  ;;  %v4071_v62 = vmul.f32 %v3782_v60, %v2343_v58 }
 0x2fe   :  { %v3777_v63 = vpop.permute.xlu0 %3776 }
 0x2ff   :  { %4360 = vst.msk [vmem:[#allocation7 + $0x8f8] sm:$0xff] %vm4072_vm0, %v4071_v62  ;;  %v4070_v0 = vmul.f32 %v3777_v63, %v2342_v61 }
 0x301   :  { %4359 = vst.msk [vmem:[#allocation7 + $0x8f0] sm:$0xff] %vm4072_vm0, %v4070_v0 }
 0x302   :  { %5882 = shalt.err (!%p5879_p6)
}
 0x303   :  { %s5883_s10 = scalar_lea.hbm %s6345_s2, 36864 }
 0x304   :  { %p5884_p7 = scmp.ne.s32.totalorder %s6345_s2, %s5883_s10  ;;  %p5887_p8 = scmp.lt.u32.totalorder %s5883_s10, %s6345_s2 }
 0x306   :  { %p5889_p9 = pnand %p5887_p8, %p5884_p7 }
 0x308   :  { %5892 = shalt.err (!%p5889_p9)
}
 0x309   :  { %4372 = dma.vmem_to_hbm [thread:$0]  %s4367_s6, 36864, %s6345_s2, [#allocation4], %s5900_s19, %s5900_s19, %s5901_s20  }
 0x30a   :  { %5897 = dma.done.wait [#allocation4], 36864  }
 0x30b   :  { %5898 = vsyncadd [#allocation4], 4294930432 }
 0x30c   :  { %4376 = vsyncpa [#allocation3], 1 }
 0x30d   :  { %4377 = vsyncpa [#allocation6], 1 }
 0x30e   :  { %4378 = vsyncpa [#allocation4], 1 }

</bundles_post_ra>
